<compile_context>
chip_gen: v7x
topology: tpu7x:2x2x1
jax: 0.10.0
libtpu: 0.0.40
codegen_flags: <defaults>
</compile_context>

<pallas_src>
import jax
import jax.numpy as jnp
from jax import lax
from jax.experimental import pallas as pl
from jax.experimental.pallas import tpu as pltpu


def _round_up(x, m):
  return (x + m - 1) // m * m


def _vmem_capacity_bytes():
  try:
    return int(pltpu.get_tpu_info().vmem_capacity_bytes)
  except Exception:
    return 64 * 2 ** 20          # conservative: v7x per-TensorCore VMEM


def _sigmoid_via_tanh(x):
  # One EUP tanh instead of exp + reciprocal; shortens the per-step chain.
  return 0.5 * jnp.tanh(0.5 * x) + 0.5


# ----------------------------------------------------------------------------
# Kernel factory: a stack of fused GRU layers over one T-chunk
# ----------------------------------------------------------------------------
def _make_gru_stack_kernel(n_layers, seq_len, time_tile, emit_seq, emit_head,
                           unroll):
  """Builds a kernel for `n_layers` fused GRU layers over one T-chunk.

  Ref order:
    inputs : x, h0[0..L), wih[0..L), whh[0..L), bgi[0..L), bhn[0..L),
             (fcw, fcb if emit_head)
    outputs: hT[0..L), (seq_out if emit_seq), (logits if emit_head)
    scratch: gi (tT*Bp, 3Hp) f32, (seq_buf (tT, Bp, Hp) bf16 if n_layers > 1)
  """

  def kernel(*refs):
    it = iter(refs)
    x_ref = next(it)
    h0_refs = [next(it) for _ in range(n_layers)]
    wih_refs = [next(it) for _ in range(n_layers)]
    whh_refs = [next(it) for _ in range(n_layers)]
    bgi_refs = [next(it) for _ in range(n_layers)]
    bhn_refs = [next(it) for _ in range(n_layers)]
    fcw_ref = next(it) if emit_head else None
    fcb_ref = next(it) if emit_head else None
    hT_refs = [next(it) for _ in range(n_layers)]
    seq_out_ref = next(it) if emit_seq else None
    logits_ref = next(it) if emit_head else None
    gi_ref = next(it)
    seq_buf_ref = next(it) if n_layers > 1 else None

    tT, Bp, _ = x_ref.shape
    Hp = hT_refs[0].shape[1]
    chunk = pl.program_id(0)

    @pl.when(chunk == 0)
    def _init():
      for l in range(n_layers):
        hT_refs[l][...] = h0_refs[l][...]

    # Valid steps in this chunk.  T need not divide tT: trailing steps of the
    # last chunk are computed but masked out of the recurrence carry, keeping
    # the loop bounds static so it can be partially unrolled.
    valid = seq_len - chunk * time_tile

    for l in range(n_layers):
      # Hoisted input->hidden projection: one big-M bf16 MXU matmul per chunk.
      if l == 0:
        src = x_ref[...].reshape(tT * Bp, x_ref.shape[2])
      else:
        src = seq_buf_ref[...].reshape(tT * Bp, Hp)
      gi_ref[...] = (jnp.dot(src, wih_refs[l][...],
                             preferred_element_type=jnp.float32)
                     + bgi_refs[l][...])

      whh = whh_refs[l][...]
      b_hn = bhn_refs[l][...]
      last_layer = (l == n_layers - 1)

      def step(t, h, whh=whh, b_hn=b_hn, last_layer=last_layer):
        row = pl.multiple_of(t * Bp, 8)
        gi = gi_ref[pl.ds(row, Bp), :]
        gh = jnp.dot(h.astype(jnp.bfloat16), whh,
                     preferred_element_type=jnp.float32)
        r = _sigmoid_via_tanh(gi[:, 0:Hp] + gh[:, 0:Hp])
        z = _sigmoid_via_tanh(gi[:, Hp:2 * Hp] + gh[:, Hp:2 * Hp])
        n = jnp.tanh(gi[:, 2 * Hp:3 * Hp] + r * (gh[:, 2 * Hp:3 * Hp] + b_hn))
        h_new = n + z * (h - n)                      # == (1-z)*n + z*h
        if last_layer:
          if emit_seq:
            seq_out_ref[t] = h_new.astype(seq_out_ref.dtype)
        else:
          seq_buf_ref[t] = h_new.astype(seq_buf_ref.dtype)
        return jnp.where(t < valid, h_new, h)       # tail-step mask

      h_final = lax.fori_loop(0, tT, step, hT_refs[l][...], unroll=unroll)
      hT_refs[l][...] = h_final

    if emit_head:
      # Tiny (Bp, Hp) x (Hp, Op) matmul on the resident carry; written every
      # chunk so the resident logits block never holds uninitialized data.
      a = jnp.maximum(hT_refs[n_layers - 1][...], 0.0)
      logits_ref[...] = (jnp.dot(a.astype(jnp.bfloat16), fcw_ref[...],
                                 preferred_element_type=jnp.float32)
                         + fcb_ref[...])

  return kernel


# ----------------------------------------------------------------------------
# pallas_call wrapper for one fused group of layers
# ----------------------------------------------------------------------------
def _gru_group_call(x_seq, group_params, head, seq_len, tT, vmem_cap):
  """Runs a fused group of GRU layers (plus the FC head for the last group).

  x_seq: (Tp, Bp, Din) bf16 time-major.  group_params: per-layer tuples
  (h0, wih, whh, b_gi, b_hn), already padded / gate-aligned / bf16 weights.
  head: None or (fcw, fcb).  Returns (list of hT (Bp, Hp) f32,
  seq_out bf16 or None, logits f32 or None).
  """
  Tp, Bp, Din = x_seq.shape
  nL = len(group_params)
  Hp = group_params[0][0].shape[1]
  G = 3 * Hp
  nT = Tp // tT
  emit_head = head is not None
  emit_seq = not emit_head
  Op = head[0].shape[1] if emit_head else 0

  kernel = _make_gru_stack_kernel(nL, seq_len, tT, emit_seq, emit_head,
                                  unroll=min(8, tT))

  args = [x_seq]
  in_specs = [pl.BlockSpec((tT, Bp, Din), lambda i: (i, 0, 0))]
  for sel in range(5):                      # h0, wih, whh, b_gi, b_hn
    for lp in group_params:
      arr = lp[sel]
      args.append(arr)
      in_specs.append(pl.BlockSpec(arr.shape, lambda i: (0, 0)))
  if emit_head:
    fcw, fcb = head
    args += [fcw, fcb]
    in_specs += [pl.BlockSpec(fcw.shape, lambda i: (0, 0)),
                 pl.BlockSpec(fcb.shape, lambda i: (0, 0))]

  out_shape = [jax.ShapeDtypeStruct((Bp, Hp), jnp.float32) for _ in range(nL)]
  out_specs = [pl.BlockSpec((Bp, Hp), lambda i: (0, 0)) for _ in range(nL)]
  if emit_seq:
    out_shape.append(jax.ShapeDtypeStruct((Tp, Bp, Hp), jnp.bfloat16))
    out_specs.append(pl.BlockSpec((tT, Bp, Hp), lambda i: (i, 0, 0)))
  if emit_head:
    out_shape.append(jax.ShapeDtypeStruct((Bp, Op), jnp.float32))
    out_specs.append(pl.BlockSpec((Bp, Op), lambda i: (0, 0)))

  scratch = [pltpu.VMEM((tT * Bp, G), jnp.float32)]
  if nL > 1:
    scratch.append(pltpu.VMEM((tT, Bp, Hp), jnp.bfloat16))

  in_dims = [Din] + [Hp] * (nL - 1)

  # Advisory cost estimate.
  flops = 2 * Bp * Op * Hp if emit_head else 0
  for d in in_dims:
    flops += 2 * seq_len * Bp * G * (d + Hp) + 14 * seq_len * Bp * Hp
  transcend = 3 * seq_len * Bp * Hp * nL
  bytes_acc = 2 * Tp * Bp * Din + (2 * Tp * Bp * Hp if emit_seq else 0)
  for d in in_dims:
    bytes_acc += 2 * (d + Hp) * G + 4 * (G + Hp) + 8 * Bp * Hp
  if emit_head:
    bytes_acc += 2 * Hp * Op + 4 * (Op + Bp * Op)
  cost = pl.CostEstimate(flops=int(flops), transcendentals=int(transcend),
                         bytes_accessed=int(bytes_acc))

  # VMEM: resident weights/carries + double-buffered streamed blocks + scratch.
  resident = sum(2 * (d + Hp) * G + 4 * (G + Hp) + 8 * Bp * Hp for d in in_dims)
  if emit_head:
    resident += 2 * Hp * Op + 4 * (Op + Bp * Op)
  streamed = 2 * tT * Bp * Din * 2 + (2 * tT * Bp * Hp * 2 if emit_seq else 0)
  scratch_b = 4 * tT * Bp * G + (2 * tT * Bp * Hp if nL > 1 else 0)
  est = resident + streamed + scratch_b
  vmem_limit = int(min(max(2 * est, 16 * 2 ** 20), int(0.8 * vmem_cap)))

  results = pl.pallas_call(
      kernel,
      out_shape=tuple(out_shape),
      grid_spec=pltpu.PrefetchScalarGridSpec(
          num_scalar_prefetch=0,
          grid=(nT,),
          in_specs=in_specs,
          out_specs=tuple(out_specs),
          scratch_shapes=scratch),
      compiler_params=pltpu.CompilerParams(
          dimension_semantics=("arbitrary",),
          vmem_limit_bytes=vmem_limit),
      cost_estimate=cost,
  )(*args)

  hTs = list(results[:nL])
  seq_out = results[nL] if emit_seq else None
  logits = results[nL] if emit_head else None
  return hTs, seq_out, logits


# ----------------------------------------------------------------------------
# Tiling / parameter prep / forward wrapper
# ----------------------------------------------------------------------------
def _choose_time_tile(seq_len, Bp, in_dim, Hp, has_interlayer, chunk_budget):
  def chunk_bytes(tt):
    b = 2 * tt * Bp * in_dim * 2            # streamed bf16 input, double-buffered
    b += 2 * tt * Bp * Hp * 2               # streamed bf16 output (upper bound)
    b += 4 * tt * Bp * 3 * Hp               # f32 GI scratch
    if has_interlayer:
      b += 2 * tt * Bp * Hp                 # bf16 inter-layer scratch
    return b

  # Target >= 256 rows for the hoisted GI matmul (fills a 256-wide MXU), grow
  # up to ~1024 rows / tT <= 128 to amortize per-grid-step overhead.
  target = min(128, _round_up(max(1024 // max(Bp, 1), 8), 8))
  tt = min(target, _round_up(max(seq_len, 1), 8))
  while tt > 8 and chunk_bytes(tt) > chunk_budget:
    tt = max(8, tt // 2)
  return tt


def _pad_gates(w, Hp):
  """(rows, 3H) gate-stacked [r|z|n] -> (rows, 3*Hp), each gate lane-aligned."""
  H = w.shape[1] // 3
  gates = [jnp.pad(w[:, g * H:(g + 1) * H], ((0, 0), (0, Hp - H)))
           for g in range(3)]
  return jnp.concatenate(gates, axis=1)


@jax.jit
def gru_net_forward(x, h, params):
  """x: (B, T, D) batch_first; h: (L, B, H). Returns (out (B, O), h' (L, B, H))."""
  B, T, D = x.shape
  L = len(params["gru"])
  H = params["gru"][0][1].shape[0]          # whh: (H, 3H)
  O = params["fc_w"].shape[1]

  Bp = _round_up(B, 16)                     # sublane-align bf16 activations
  Dp = _round_up(D, 128)
  Hp = _round_up(H, 128)
  Op = _round_up(O, 128)
  G = 3 * Hp

  vmem_cap = _vmem_capacity_bytes()
  budget = int(0.75 * vmem_cap)

  # Padded / gate-aligned parameters; MXU operands bf16, biases & carries f32.
  layer_p = []
  for l, (wih, whh, bih, bhh) in enumerate(params["gru"]):
    in_p = Dp if l == 0 else Hp
    wih_p = _pad_gates(jnp.pad(wih, ((0, in_p - wih.shape[0]), (0, 0))),
                       Hp).astype(jnp.bfloat16)
    whh_p = _pad_gates(jnp.pad(whh, ((0, Hp - H), (0, 0))),
                       Hp).astype(jnp.bfloat16)
    bih_g = _pad_gates(bih, Hp)
    bhh_g = _pad_gates(bhh, Hp)
    # fold b_hh(r,z) into the hoisted GI bias; b_hh(n) stays inside r*(...)
    b_gi = bih_g.at[:, :2 * Hp].add(bhh_g[:, :2 * Hp])
    b_hn = bhh_g[:, 2 * Hp:]
    h0_p = jnp.pad(h[l], ((0, Bp - B), (0, Hp - H)))
    layer_p.append((h0_p, wih_p, whh_p, b_gi, b_hn))

  fcw_p = jnp.pad(params["fc_w"], ((0, Hp - H), (0, Op - O))).astype(jnp.bfloat16)
  fcb_p = jnp.pad(params["fc_b"], ((0, 0), (0, Op - O)))

  # Group consecutive layers so each group's resident state fits VMEM; fused
  # groups keep the inter-layer sequence in VMEM scratch (no HBM round trip).
  def res_bytes(l):
    din = Dp if l == 0 else Hp
    return 2 * (din + Hp) * G + 4 * (G + Hp) + 8 * Bp * Hp
  head_bytes = 2 * Hp * Op + 4 * (Op + Bp * Op)

  groups, cur, cur_b = [], [], head_bytes
  for l in range(L):
    lb = res_bytes(l)
    if cur and cur_b + lb > budget // 2:
      groups.append(cur)
      cur, cur_b = [], head_bytes
    cur.append(l)
    cur_b += lb
  groups.append(cur)

  max_res = max(sum(res_bytes(l) for l in g) for g in groups) + head_bytes
  tT = _choose_time_tile(T, Bp, max(Dp, Hp), Hp, L > 1,
                         max(budget - max_res, budget // 4))
  Tp = pl.cdiv(T, tT) * tT

  # time-major, zero-padded to (Tp, Bp, Dp), bf16 MXU operand
  x_seq = jnp.transpose(x, (1, 0, 2))
  x_seq = jnp.pad(x_seq, ((0, Tp - T), (0, Bp - B), (0, Dp - D)))
  x_seq = x_seq.astype(jnp.bfloat16)

  # TODO(synk): training-mode inter-layer dropout not implemented (inference).
  new_hidden = [None] * L
  logits_p = None
  for g_idx, grp in enumerate(groups):
    is_last = g_idx == len(groups) - 1
    head = (fcw_p, fcb_p) if is_last else None
    hTs, seq_out, logits = _gru_group_call(
        x_seq, [layer_p[l] for l in grp], head, T, tT, vmem_cap)
    for k, l in enumerate(grp):
      new_hidden[l] = hTs[k][:B, :H]
    if is_last:
      logits_p = logits
    else:
      x_seq = seq_out

  return logits_p[:B, :O], jnp.stack(new_hidden, axis=0)


# ----------------------------------------------------------------------------
# Deterministic parameter init (PyTorch shapes, pre-transposed; U(-1/sqrt(H)..))
# ----------------------------------------------------------------------------
def init_params(key, input_dim, hidden_dim, output_dim, n_layers):
  bound = 1.0 / float(hidden_dim) ** 0.5
  params = {"gru": []}
  for l in range(n_layers):
    in_dim = input_dim if l == 0 else hidden_dim
    key, k1, k2, k3, k4 = jax.random.split(key, 5)
    wih = jax.random.uniform(k1, (in_dim, 3 * hidden_dim), jnp.float32,
                             -bound, bound)
    whh = jax.random.uniform(k2, (hidden_dim, 3 * hidden_dim), jnp.float32,
                             -bound, bound)
    bih = jax.random.uniform(k3, (1, 3 * hidden_dim), jnp.float32, -bound, bound)
    bhh = jax.random.uniform(k4, (1, 3 * hidden_dim), jnp.float32, -bound, bound)
    params["gru"].append((wih, whh, bih, bhh))
  key, k1, k2 = jax.random.split(key, 3)
  params["fc_w"] = jax.random.uniform(k1, (hidden_dim, output_dim), jnp.float32,
                                      -bound, bound)
  params["fc_b"] = jax.random.uniform(k2, (1, output_dim), jnp.float32,
                                      -bound, bound)
  return params


# ----------------------------------------------------------------------------
# Pure-JAX reference (mm_dtype controls matmul-operand precision)
# ----------------------------------------------------------------------------
def _gru_net_reference(x, h, params, mm_dtype=jnp.float32):
  def mm(a, b):
    return jnp.dot(a.astype(mm_dtype), b.astype(mm_dtype),
                   preferred_element_type=jnp.float32)

  layer_in = jnp.transpose(x, (1, 0, 2))     # (T, B, D)
  hs = []
  for l, (wih, whh, bih, bhh) in enumerate(params["gru"]):
    H = whh.shape[0]

    def step(hc, x_t, wih=wih, whh=whh, bih=bih, bhh=bhh, H=H):
      gi = mm(x_t, wih) + bih
      gh = mm(hc, whh) + bhh
      r = jax.nn.sigmoid(gi[:, :H] + gh[:, :H])
      z = jax.nn.sigmoid(gi[:, H:2 * H] + gh[:, H:2 * H])
      n = jnp.tanh(gi[:, 2 * H:] + r * gh[:, 2 * H:])
      h_new = (1.0 - z) * n + z * hc
      return h_new, h_new

    hT, outs = lax.scan(step, h[l], layer_in)
    hs.append(hT)
    layer_in = outs
  logits = mm(jnp.maximum(layer_in[-1], 0.0), params["fc_w"]) + params["fc_b"]
  return logits, jnp.stack(hs, axis=0)


# ----------------------------------------------------------------------------
if __name__ == "__main__":
  B, T = 2, 8
  INPUT_DIM, HIDDEN_DIM, OUTPUT_DIM, N_LAYERS = 16, 32, 8, 2

  root = jax.random.PRNGKey(0)
  k_param, k_x = jax.random.split(root)
  params = init_params(k_param, INPUT_DIM, HIDDEN_DIM, OUTPUT_DIM, N_LAYERS)

  x = jax.random.normal(k_x, (B, T, INPUT_DIM), jnp.float32)
  h0 = jnp.zeros((N_LAYERS, B, HIDDEN_DIM), jnp.float32)   # init_hidden()

  out, h_new = gru_net_forward(x, h0, params)
  out = jax.block_until_ready(out)
  h_new = jax.block_until_ready(h_new)

  assert out.shape == (B, OUTPUT_DIM)
  assert h_new.shape == (N_LAYERS, B, HIDDEN_DIM)

  # Tight check against a precision-matched (bf16 matmul operand) reference.
  ref_out_bf, ref_h_bf = _gru_net_reference(x, h0, params, jnp.bfloat16)
  assert jnp.allclose(out, ref_out_bf, rtol=3e-3, atol=3e-3)
  assert jnp.allclose(h_new, ref_h_bf, rtol=3e-3, atol=3e-3)

  # Loose sanity check against the full-f32 reference (bf16 operand error).
  ref_out, ref_h = _gru_net_reference(x, h0, params, jnp.float32)
  assert jnp.allclose(out, ref_out, rtol=1e-1, atol=1e-1)
  assert jnp.allclose(h_new, ref_h, rtol=1e-1, atol=1e-1)

  print("KERNEL_OK")
</pallas_src>

<mosaic_0001>
module attributes {stable_mosaic.version = 11 : i64} {
  func.func @kernel(%arg0: i32, %arg1: memref<8x16x128xbf16, #tpu.memory_space<vmem>>, %arg2: memref<16x128xf32, #tpu.memory_space<vmem>>, %arg3: memref<16x128xf32, #tpu.memory_space<vmem>>, %arg4: memref<128x384xbf16, #tpu.memory_space<vmem>>, %arg5: memref<128x384xbf16, #tpu.memory_space<vmem>>, %arg6: memref<128x384xbf16, #tpu.memory_space<vmem>>, %arg7: memref<128x384xbf16, #tpu.memory_space<vmem>>, %arg8: memref<1x384xf32, #tpu.memory_space<vmem>>, %arg9: memref<1x384xf32, #tpu.memory_space<vmem>>, %arg10: memref<1x128xf32, #tpu.memory_space<vmem>>, %arg11: memref<1x128xf32, #tpu.memory_space<vmem>>, %arg12: memref<128x128xbf16, #tpu.memory_space<vmem>>, %arg13: memref<1x128xf32, #tpu.memory_space<vmem>>, %arg14: memref<16x128xf32, #tpu.memory_space<vmem>>, %arg15: memref<16x128xf32, #tpu.memory_space<vmem>>, %arg16: memref<16x128xf32, #tpu.memory_space<vmem>>, %arg17: memref<128x384xf32, #tpu.memory_space<vmem>>, %arg18: memref<8x16x128xbf16, #tpu.memory_space<vmem>>) attributes {dimension_semantics = [#tpu.dimension_semantics<arbitrary>], iteration_bounds = array<i64: 1>, scalar_prefetch = 0 : i64, scratch_operands = 2 : i64, tpu.core_type = #tpu.core_type<tc>, window_params = [{transform_indices = @transform_0, window_bounds = array<i64: 8, 16, 128>}, {pipeline_mode = #tpu.pipeline_mode<synchronous>, transform_indices = @transform_1, window_bounds = array<i64: 16, 128>}, {pipeline_mode = #tpu.pipeline_mode<synchronous>, transform_indices = @transform_2, window_bounds = array<i64: 16, 128>}, {pipeline_mode = #tpu.pipeline_mode<synchronous>, transform_indices = @transform_3, window_bounds = array<i64: 128, 384>}, {pipeline_mode = #tpu.pipeline_mode<synchronous>, transform_indices = @transform_4, window_bounds = array<i64: 128, 384>}, {pipeline_mode = #tpu.pipeline_mode<synchronous>, transform_indices = @transform_5, window_bounds = array<i64: 128, 384>}, {pipeline_mode = #tpu.pipeline_mode<synchronous>, transform_indices = @transform_6, window_bounds = array<i64: 128, 384>}, {pipeline_mode = #tpu.pipeline_mode<synchronous>, transform_indices = @transform_7, window_bounds = array<i64: 1, 384>}, {pipeline_mode = #tpu.pipeline_mode<synchronous>, transform_indices = @transform_8, window_bounds = array<i64: 1, 384>}, {pipeline_mode = #tpu.pipeline_mode<synchronous>, transform_indices = @transform_9, window_bounds = array<i64: 1, 128>}, {pipeline_mode = #tpu.pipeline_mode<synchronous>, transform_indices = @transform_10, window_bounds = array<i64: 1, 128>}, {pipeline_mode = #tpu.pipeline_mode<synchronous>, transform_indices = @transform_11, window_bounds = array<i64: 128, 128>}, {pipeline_mode = #tpu.pipeline_mode<synchronous>, transform_indices = @transform_12, window_bounds = array<i64: 1, 128>}, {pipeline_mode = #tpu.pipeline_mode<synchronous>, transform_indices = @transform_13, window_bounds = array<i64: 16, 128>}, {pipeline_mode = #tpu.pipeline_mode<synchronous>, transform_indices = @transform_14, window_bounds = array<i64: 16, 128>}, {pipeline_mode = #tpu.pipeline_mode<synchronous>, transform_indices = @transform_15, window_bounds = array<i64: 16, 128>}]} {
    %c0_i32 = arith.constant 0 : i32
    %0 = arith.cmpi eq, %arg0, %c0_i32 : i32
    %1 = arith.extui %0 : i1 to i32
    %c0_i32_0 = arith.constant 0 : i32
    %2 = arith.cmpi ne, %1, %c0_i32_0 : i32
    scf.if %2 {
      %c0_216 = arith.constant 0 : index
      %c0_217 = arith.constant 0 : index
      %687 = vector.load %arg2[%c0_216, %c0_217] : memref<16x128xf32, #tpu.memory_space<vmem>>, vector<16x128xf32>
      %c0_218 = arith.constant 0 : index
      %c0_219 = arith.constant 0 : index
      %688 = vector.load %arg14[%c0_218, %c0_219] : memref<16x128xf32, #tpu.memory_space<vmem>>, vector<16x128xf32>
      tpu.vector_store %arg14[%c0_218, %c0_219], %687 {strides = array<i32>} : memref<16x128xf32, #tpu.memory_space<vmem>>, vector<16x128xf32>,
      %c0_220 = arith.constant 0 : index
      %c0_221 = arith.constant 0 : index
      %689 = vector.load %arg3[%c0_220, %c0_221] : memref<16x128xf32, #tpu.memory_space<vmem>>, vector<16x128xf32>
      %c0_222 = arith.constant 0 : index
      %c0_223 = arith.constant 0 : index
      %690 = vector.load %arg15[%c0_222, %c0_223] : memref<16x128xf32, #tpu.memory_space<vmem>>, vector<16x128xf32>
      tpu.vector_store %arg15[%c0_222, %c0_223], %689 {strides = array<i32>} : memref<16x128xf32, #tpu.memory_space<vmem>>, vector<16x128xf32>,
    } else {
    }
    %c8_i32 = arith.constant 8 : i32
    %3 = arith.muli %arg0, %c8_i32 : i32
    %c8_i32_1 = arith.constant 8 : i32
    %4 = arith.subi %c8_i32_1, %3 : i32
    %c0 = arith.constant 0 : index
    %c0_2 = arith.constant 0 : index
    %c0_3 = arith.constant 0 : index
    %5 = vector.load %arg1[%c0, %c0_2, %c0_3] : memref<8x16x128xbf16, #tpu.memory_space<vmem>>, vector<8x16x128xbf16>
    %6 = vector.shape_cast %5 : vector<8x16x128xbf16> to vector<128x128xbf16>
    %c0_4 = arith.constant 0 : index
    %c0_5 = arith.constant 0 : index
    %7 = vector.load %arg4[%c0_4, %c0_5] : memref<128x384xbf16, #tpu.memory_space<vmem>>, vector<128x384xbf16>
    %cst = arith.constant dense<0.000000e+00> : vector<128x384xf32>
    %8 = tpu.matmul %6, %7, %cst {dimension_numbers = #tpu.dot_dimension_numbers<[1], [0], [0], [1], [0, 0, 1, 1], [], []>} : vector<128x128xbf16>, vector<128x384xbf16>, vector<128x384xf32> -> vector<128x384xf32>
    %c0_6 = arith.constant 0 : index
    %c0_7 = arith.constant 0 : index
    %9 = vector.load %arg8[%c0_6, %c0_7] : memref<1x384xf32, #tpu.memory_space<vmem>>, vector<1x384xf32>
    %10 = vector.broadcast %9 : vector<1x384xf32> to vector<128x384xf32>
    %11 = arith.addf %8, %10 : vector<128x384xf32>
    %c0_8 = arith.constant 0 : index
    %c0_9 = arith.constant 0 : index
    %12 = vector.load %arg17[%c0_8, %c0_9] : memref<128x384xf32, #tpu.memory_space<vmem>>, vector<128x384xf32>
    tpu.vector_store %arg17[%c0_8, %c0_9], %11 {strides = array<i32>} : memref<128x384xf32, #tpu.memory_space<vmem>>, vector<128x384xf32>,
    %c0_10 = arith.constant 0 : index
    %c0_11 = arith.constant 0 : index
    %13 = vector.load %arg6[%c0_10, %c0_11] : memref<128x384xbf16, #tpu.memory_space<vmem>>, vector<128x384xbf16>
    %c0_12 = arith.constant 0 : index
    %c0_13 = arith.constant 0 : index
    %14 = vector.load %arg10[%c0_12, %c0_13] : memref<1x128xf32, #tpu.memory_space<vmem>>, vector<1x128xf32>
    %c0_14 = arith.constant 0 : index
    %c0_15 = arith.constant 0 : index
    %15 = vector.load %arg14[%c0_14, %c0_15] : memref<16x128xf32, #tpu.memory_space<vmem>>, vector<16x128xf32>
    %c0_i32_16 = arith.constant 0 : i32
    %c16_i32 = arith.constant 16 : i32
    %16 = arith.muli %c0_i32_16, %c16_i32 : i32
    %17 = tpu.assume_multiple %16, 8 : i32
    %18 = arith.index_cast %17 : i32 to index
    %c0_17 = arith.constant 0 : index
    %19 = vector.load %arg17[%18, %c0_17] : memref<128x384xf32, #tpu.memory_space<vmem>>, vector<16x384xf32>
    %20 = arith.truncf %15 : vector<16x128xf32> to vector<16x128xbf16>
    %cst_18 = arith.constant dense<0.000000e+00> : vector<16x384xf32>
    %21 = tpu.matmul %20, %13, %cst_18 {dimension_numbers = #tpu.dot_dimension_numbers<[1], [0], [0], [1], [0, 0, 1, 1], [], []>} : vector<16x128xbf16>, vector<128x384xbf16>, vector<16x384xf32> -> vector<16x384xf32>
    %22 = vector.extract_strided_slice %19 {offsets = [0, 0], sizes = [16, 128], strides = [1, 1]} : vector<16x384xf32> to vector<16x128xf32>
    %23 = vector.extract_strided_slice %21 {offsets = [0, 0], sizes = [16, 128], strides = [1, 1]} : vector<16x384xf32> to vector<16x128xf32>
    %24 = arith.addf %22, %23 : vector<16x128xf32>
    %cst_19 = arith.constant 5.000000e-01 : f32
    %25 = vector.broadcast %cst_19 : f32 to vector<16x128xf32>
    %26 = arith.mulf %25, %24 : vector<16x128xf32>
    %27 = math.tanh %26 : vector<16x128xf32>
    %cst_20 = arith.constant 5.000000e-01 : f32
    %28 = vector.broadcast %cst_20 : f32 to vector<16x128xf32>
    %29 = arith.mulf %28, %27 : vector<16x128xf32>
    %cst_21 = arith.constant 5.000000e-01 : f32
    %30 = vector.broadcast %cst_21 : f32 to vector<16x128xf32>
    %31 = arith.addf %29, %30 : vector<16x128xf32>
    %32 = vector.extract_strided_slice %19 {offsets = [0, 128], sizes = [16, 128], strides = [1, 1]} : vector<16x384xf32> to vector<16x128xf32>
    %33 = vector.extract_strided_slice %21 {offsets = [0, 128], sizes = [16, 128], strides = [1, 1]} : vector<16x384xf32> to vector<16x128xf32>
    %34 = arith.addf %32, %33 : vector<16x128xf32>
    %cst_22 = arith.constant 5.000000e-01 : f32
    %35 = vector.broadcast %cst_22 : f32 to vector<16x128xf32>
    %36 = arith.mulf %35, %34 : vector<16x128xf32>
    %37 = math.tanh %36 : vector<16x128xf32>
    %cst_23 = arith.constant 5.000000e-01 : f32
    %38 = vector.broadcast %cst_23 : f32 to vector<16x128xf32>
    %39 = arith.mulf %38, %37 : vector<16x128xf32>
    %cst_24 = arith.constant 5.000000e-01 : f32
    %40 = vector.broadcast %cst_24 : f32 to vector<16x128xf32>
    %41 = arith.addf %39, %40 : vector<16x128xf32>
    %42 = vector.extract_strided_slice %19 {offsets = [0, 256], sizes = [16, 128], strides = [1, 1]} : vector<16x384xf32> to vector<16x128xf32>
    %43 = vector.extract_strided_slice %21 {offsets = [0, 256], sizes = [16, 128], strides = [1, 1]} : vector<16x384xf32> to vector<16x128xf32>
    %44 = vector.broadcast %14 : vector<1x128xf32> to vector<16x128xf32>
    %45 = arith.addf %43, %44 : vector<16x128xf32>
    %46 = arith.mulf %31, %45 : vector<16x128xf32>
    %47 = arith.addf %42, %46 : vector<16x128xf32>
    %48 = math.tanh %47 : vector<16x128xf32>
    %49 = arith.subf %15, %48 : vector<16x128xf32>
    %50 = arith.mulf %41, %49 : vector<16x128xf32>
    %51 = arith.addf %48, %50 : vector<16x128xf32>
    %52 = arith.truncf %51 : vector<16x128xf32> to vector<16x128xbf16>
    %53 = arith.index_cast %c0_i32_16 : i32 to index
    %c0_25 = arith.constant 0 : index
    %c0_26 = arith.constant 0 : index
    %54 = vector.load %arg18[%53, %c0_25, %c0_26] : memref<8x16x128xbf16, #tpu.memory_space<vmem>>, vector<1x16x128xbf16>
    %55 = vector.shape_cast %54 : vector<1x16x128xbf16> to vector<16x128xbf16>
    %56 = vector.shape_cast %52 : vector<16x128xbf16> to vector<1x16x128xbf16>
    tpu.vector_store %arg18[%53, %c0_25, %c0_26], %56 {strides = array<i32>} : memref<8x16x128xbf16, #tpu.memory_space<vmem>>, vector<1x16x128xbf16>,
    %57 = arith.cmpi slt, %c0_i32_16, %4 : i32
    %58 = arith.select %57, %51, %15 : vector<16x128xf32>
    %c1_i32 = arith.constant 1 : i32
    %c16_i32_27 = arith.constant 16 : i32
    %59 = arith.muli %c1_i32, %c16_i32_27 : i32
    %60 = tpu.assume_multiple %59, 8 : i32
    %61 = arith.index_cast %60 : i32 to index
    %c0_28 = arith.constant 0 : index
    %62 = vector.load %arg17[%61, %c0_28] : memref<128x384xf32, #tpu.memory_space<vmem>>, vector<16x384xf32>
    %63 = arith.truncf %58 : vector<16x128xf32> to vector<16x128xbf16>
    %cst_29 = arith.constant dense<0.000000e+00> : vector<16x384xf32>
    %64 = tpu.matmul %63, %13, %cst_29 {dimension_numbers = #tpu.dot_dimension_numbers<[1], [0], [0], [1], [0, 0, 1, 1], [], []>} : vector<16x128xbf16>, vector<128x384xbf16>, vector<16x384xf32> -> vector<16x384xf32>
    %65 = vector.extract_strided_slice %62 {offsets = [0, 0], sizes = [16, 128], strides = [1, 1]} : vector<16x384xf32> to vector<16x128xf32>
    %66 = vector.extract_strided_slice %64 {offsets = [0, 0], sizes = [16, 128], strides = [1, 1]} : vector<16x384xf32> to vector<16x128xf32>
    %67 = arith.addf %65, %66 : vector<16x128xf32>
    %cst_30 = arith.constant 5.000000e-01 : f32
    %68 = vector.broadcast %cst_30 : f32 to vector<16x128xf32>
    %69 = arith.mulf %68, %67 : vector<16x128xf32>
    %70 = math.tanh %69 : vector<16x128xf32>
    %cst_31 = arith.constant 5.000000e-01 : f32
    %71 = vector.broadcast %cst_31 : f32 to vector<16x128xf32>
    %72 = arith.mulf %71, %70 : vector<16x128xf32>
    %cst_32 = arith.constant 5.000000e-01 : f32
    %73 = vector.broadcast %cst_32 : f32 to vector<16x128xf32>
    %74 = arith.addf %72, %73 : vector<16x128xf32>
    %75 = vector.extract_strided_slice %62 {offsets = [0, 128], sizes = [16, 128], strides = [1, 1]} : vector<16x384xf32> to vector<16x128xf32>
    %76 = vector.extract_strided_slice %64 {offsets = [0, 128], sizes = [16, 128], strides = [1, 1]} : vector<16x384xf32> to vector<16x128xf32>
    %77 = arith.addf %75, %76 : vector<16x128xf32>
    %cst_33 = arith.constant 5.000000e-01 : f32
    %78 = vector.broadcast %cst_33 : f32 to vector<16x128xf32>
    %79 = arith.mulf %78, %77 : vector<16x128xf32>
    %80 = math.tanh %79 : vector<16x128xf32>
    %cst_34 = arith.constant 5.000000e-01 : f32
    %81 = vector.broadcast %cst_34 : f32 to vector<16x128xf32>
    %82 = arith.mulf %81, %80 : vector<16x128xf32>
    %cst_35 = arith.constant 5.000000e-01 : f32
    %83 = vector.broadcast %cst_35 : f32 to vector<16x128xf32>
    %84 = arith.addf %82, %83 : vector<16x128xf32>
    %85 = vector.extract_strided_slice %62 {offsets = [0, 256], sizes = [16, 128], strides = [1, 1]} : vector<16x384xf32> to vector<16x128xf32>
    %86 = vector.extract_strided_slice %64 {offsets = [0, 256], sizes = [16, 128], strides = [1, 1]} : vector<16x384xf32> to vector<16x128xf32>
    %87 = vector.broadcast %14 : vector<1x128xf32> to vector<16x128xf32>
    %88 = arith.addf %86, %87 : vector<16x128xf32>
    %89 = arith.mulf %74, %88 : vector<16x128xf32>
    %90 = arith.addf %85, %89 : vector<16x128xf32>
    %91 = math.tanh %90 : vector<16x128xf32>
    %92 = arith.subf %58, %91 : vector<16x128xf32>
    %93 = arith.mulf %84, %92 : vector<16x128xf32>
    %94 = arith.addf %91, %93 : vector<16x128xf32>
    %95 = arith.truncf %94 : vector<16x128xf32> to vector<16x128xbf16>
    %96 = arith.index_cast %c1_i32 : i32 to index
    %c0_36 = arith.constant 0 : index
    %c0_37 = arith.constant 0 : index
    %97 = vector.load %arg18[%96, %c0_36, %c0_37] : memref<8x16x128xbf16, #tpu.memory_space<vmem>>, vector<1x16x128xbf16>
    %98 = vector.shape_cast %97 : vector<1x16x128xbf16> to vector<16x128xbf16>
    %99 = vector.shape_cast %95 : vector<16x128xbf16> to vector<1x16x128xbf16>
    tpu.vector_store %arg18[%96, %c0_36, %c0_37], %99 {strides = array<i32>} : memref<8x16x128xbf16, #tpu.memory_space<vmem>>, vector<1x16x128xbf16>,
    %100 = arith.cmpi slt, %c1_i32, %4 : i32
    %101 = arith.select %100, %94, %58 : vector<16x128xf32>
    %c2_i32 = arith.constant 2 : i32
    %c16_i32_38 = arith.constant 16 : i32
    %102 = arith.muli %c2_i32, %c16_i32_38 : i32
    %103 = tpu.assume_multiple %102, 8 : i32
    %104 = arith.index_cast %103 : i32 to index
    %c0_39 = arith.constant 0 : index
    %105 = vector.load %arg17[%104, %c0_39] : memref<128x384xf32, #tpu.memory_space<vmem>>, vector<16x384xf32>
    %106 = arith.truncf %101 : vector<16x128xf32> to vector<16x128xbf16>
    %cst_40 = arith.constant dense<0.000000e+00> : vector<16x384xf32>
    %107 = tpu.matmul %106, %13, %cst_40 {dimension_numbers = #tpu.dot_dimension_numbers<[1], [0], [0], [1], [0, 0, 1, 1], [], []>} : vector<16x128xbf16>, vector<128x384xbf16>, vector<16x384xf32> -> vector<16x384xf32>
    %108 = vector.extract_strided_slice %105 {offsets = [0, 0], sizes = [16, 128], strides = [1, 1]} : vector<16x384xf32> to vector<16x128xf32>
    %109 = vector.extract_strided_slice %107 {offsets = [0, 0], sizes = [16, 128], strides = [1, 1]} : vector<16x384xf32> to vector<16x128xf32>
    %110 = arith.addf %108, %109 : vector<16x128xf32>
    %cst_41 = arith.constant 5.000000e-01 : f32
    %111 = vector.broadcast %cst_41 : f32 to vector<16x128xf32>
    %112 = arith.mulf %111, %110 : vector<16x128xf32>
    %113 = math.tanh %112 : vector<16x128xf32>
    %cst_42 = arith.constant 5.000000e-01 : f32
    %114 = vector.broadcast %cst_42 : f32 to vector<16x128xf32>
    %115 = arith.mulf %114, %113 : vector<16x128xf32>
    %cst_43 = arith.constant 5.000000e-01 : f32
    %116 = vector.broadcast %cst_43 : f32 to vector<16x128xf32>
    %117 = arith.addf %115, %116 : vector<16x128xf32>
    %118 = vector.extract_strided_slice %105 {offsets = [0, 128], sizes = [16, 128], strides = [1, 1]} : vector<16x384xf32> to vector<16x128xf32>
    %119 = vector.extract_strided_slice %107 {offsets = [0, 128], sizes = [16, 128], strides = [1, 1]} : vector<16x384xf32> to vector<16x128xf32>
    %120 = arith.addf %118, %119 : vector<16x128xf32>
    %cst_44 = arith.constant 5.000000e-01 : f32
    %121 = vector.broadcast %cst_44 : f32 to vector<16x128xf32>
    %122 = arith.mulf %121, %120 : vector<16x128xf32>
    %123 = math.tanh %122 : vector<16x128xf32>
    %cst_45 = arith.constant 5.000000e-01 : f32
    %124 = vector.broadcast %cst_45 : f32 to vector<16x128xf32>
    %125 = arith.mulf %124, %123 : vector<16x128xf32>
    %cst_46 = arith.constant 5.000000e-01 : f32
    %126 = vector.broadcast %cst_46 : f32 to vector<16x128xf32>
    %127 = arith.addf %125, %126 : vector<16x128xf32>
    %128 = vector.extract_strided_slice %105 {offsets = [0, 256], sizes = [16, 128], strides = [1, 1]} : vector<16x384xf32> to vector<16x128xf32>
    %129 = vector.extract_strided_slice %107 {offsets = [0, 256], sizes = [16, 128], strides = [1, 1]} : vector<16x384xf32> to vector<16x128xf32>
    %130 = vector.broadcast %14 : vector<1x128xf32> to vector<16x128xf32>
    %131 = arith.addf %129, %130 : vector<16x128xf32>
    %132 = arith.mulf %117, %131 : vector<16x128xf32>
    %133 = arith.addf %128, %132 : vector<16x128xf32>
    %134 = math.tanh %133 : vector<16x128xf32>
    %135 = arith.subf %101, %134 : vector<16x128xf32>
    %136 = arith.mulf %127, %135 : vector<16x128xf32>
    %137 = arith.addf %134, %136 : vector<16x128xf32>
    %138 = arith.truncf %137 : vector<16x128xf32> to vector<16x128xbf16>
    %139 = arith.index_cast %c2_i32 : i32 to index
    %c0_47 = arith.constant 0 : index
    %c0_48 = arith.constant 0 : index
    %140 = vector.load %arg18[%139, %c0_47, %c0_48] : memref<8x16x128xbf16, #tpu.memory_space<vmem>>, vector<1x16x128xbf16>
    %141 = vector.shape_cast %140 : vector<1x16x128xbf16> to vector<16x128xbf16>
    %142 = vector.shape_cast %138 : vector<16x128xbf16> to vector<1x16x128xbf16>
    tpu.vector_store %arg18[%139, %c0_47, %c0_48], %142 {strides = array<i32>} : memref<8x16x128xbf16, #tpu.memory_space<vmem>>, vector<1x16x128xbf16>,
    %143 = arith.cmpi slt, %c2_i32, %4 : i32
    %144 = arith.select %143, %137, %101 : vector<16x128xf32>
    %c3_i32 = arith.constant 3 : i32
    %c16_i32_49 = arith.constant 16 : i32
    %145 = arith.muli %c3_i32, %c16_i32_49 : i32
    %146 = tpu.assume_multiple %145, 8 : i32
    %147 = arith.index_cast %146 : i32 to index
    %c0_50 = arith.constant 0 : index
    %148 = vector.load %arg17[%147, %c0_50] : memref<128x384xf32, #tpu.memory_space<vmem>>, vector<16x384xf32>
    %149 = arith.truncf %144 : vector<16x128xf32> to vector<16x128xbf16>
    %cst_51 = arith.constant dense<0.000000e+00> : vector<16x384xf32>
    %150 = tpu.matmul %149, %13, %cst_51 {dimension_numbers = #tpu.dot_dimension_numbers<[1], [0], [0], [1], [0, 0, 1, 1], [], []>} : vector<16x128xbf16>, vector<128x384xbf16>, vector<16x384xf32> -> vector<16x384xf32>
    %151 = vector.extract_strided_slice %148 {offsets = [0, 0], sizes = [16, 128], strides = [1, 1]} : vector<16x384xf32> to vector<16x128xf32>
    %152 = vector.extract_strided_slice %150 {offsets = [0, 0], sizes = [16, 128], strides = [1, 1]} : vector<16x384xf32> to vector<16x128xf32>
    %153 = arith.addf %151, %152 : vector<16x128xf32>
    %cst_52 = arith.constant 5.000000e-01 : f32
    %154 = vector.broadcast %cst_52 : f32 to vector<16x128xf32>
    %155 = arith.mulf %154, %153 : vector<16x128xf32>
    %156 = math.tanh %155 : vector<16x128xf32>
    %cst_53 = arith.constant 5.000000e-01 : f32
    %157 = vector.broadcast %cst_53 : f32 to vector<16x128xf32>
    %158 = arith.mulf %157, %156 : vector<16x128xf32>
    %cst_54 = arith.constant 5.000000e-01 : f32
    %159 = vector.broadcast %cst_54 : f32 to vector<16x128xf32>
    %160 = arith.addf %158, %159 : vector<16x128xf32>
    %161 = vector.extract_strided_slice %148 {offsets = [0, 128], sizes = [16, 128], strides = [1, 1]} : vector<16x384xf32> to vector<16x128xf32>
    %162 = vector.extract_strided_slice %150 {offsets = [0, 128], sizes = [16, 128], strides = [1, 1]} : vector<16x384xf32> to vector<16x128xf32>
    %163 = arith.addf %161, %162 : vector<16x128xf32>
    %cst_55 = arith.constant 5.000000e-01 : f32
    %164 = vector.broadcast %cst_55 : f32 to vector<16x128xf32>
    %165 = arith.mulf %164, %163 : vector<16x128xf32>
    %166 = math.tanh %165 : vector<16x128xf32>
    %cst_56 = arith.constant 5.000000e-01 : f32
    %167 = vector.broadcast %cst_56 : f32 to vector<16x128xf32>
    %168 = arith.mulf %167, %166 : vector<16x128xf32>
    %cst_57 = arith.constant 5.000000e-01 : f32
    %169 = vector.broadcast %cst_57 : f32 to vector<16x128xf32>
    %170 = arith.addf %168, %169 : vector<16x128xf32>
    %171 = vector.extract_strided_slice %148 {offsets = [0, 256], sizes = [16, 128], strides = [1, 1]} : vector<16x384xf32> to vector<16x128xf32>
    %172 = vector.extract_strided_slice %150 {offsets = [0, 256], sizes = [16, 128], strides = [1, 1]} : vector<16x384xf32> to vector<16x128xf32>
    %173 = vector.broadcast %14 : vector<1x128xf32> to vector<16x128xf32>
    %174 = arith.addf %172, %173 : vector<16x128xf32>
    %175 = arith.mulf %160, %174 : vector<16x128xf32>
    %176 = arith.addf %171, %175 : vector<16x128xf32>
    %177 = math.tanh %176 : vector<16x128xf32>
    %178 = arith.subf %144, %177 : vector<16x128xf32>
    %179 = arith.mulf %170, %178 : vector<16x128xf32>
    %180 = arith.addf %177, %179 : vector<16x128xf32>
    %181 = arith.truncf %180 : vector<16x128xf32> to vector<16x128xbf16>
    %182 = arith.index_cast %c3_i32 : i32 to index
    %c0_58 = arith.constant 0 : index
    %c0_59 = arith.constant 0 : index
    %183 = vector.load %arg18[%182, %c0_58, %c0_59] : memref<8x16x128xbf16, #tpu.memory_space<vmem>>, vector<1x16x128xbf16>
    %184 = vector.shape_cast %183 : vector<1x16x128xbf16> to vector<16x128xbf16>
    %185 = vector.shape_cast %181 : vector<16x128xbf16> to vector<1x16x128xbf16>
    tpu.vector_store %arg18[%182, %c0_58, %c0_59], %185 {strides = array<i32>} : memref<8x16x128xbf16, #tpu.memory_space<vmem>>, vector<1x16x128xbf16>,
    %186 = arith.cmpi slt, %c3_i32, %4 : i32
    %187 = arith.select %186, %180, %144 : vector<16x128xf32>
    %c4_i32 = arith.constant 4 : i32
    %c16_i32_60 = arith.constant 16 : i32
    %188 = arith.muli %c4_i32, %c16_i32_60 : i32
    %189 = tpu.assume_multiple %188, 8 : i32
    %190 = arith.index_cast %189 : i32 to index
    %c0_61 = arith.constant 0 : index
    %191 = vector.load %arg17[%190, %c0_61] : memref<128x384xf32, #tpu.memory_space<vmem>>, vector<16x384xf32>
    %192 = arith.truncf %187 : vector<16x128xf32> to vector<16x128xbf16>
    %cst_62 = arith.constant dense<0.000000e+00> : vector<16x384xf32>
    %193 = tpu.matmul %192, %13, %cst_62 {dimension_numbers = #tpu.dot_dimension_numbers<[1], [0], [0], [1], [0, 0, 1, 1], [], []>} : vector<16x128xbf16>, vector<128x384xbf16>, vector<16x384xf32> -> vector<16x384xf32>
    %194 = vector.extract_strided_slice %191 {offsets = [0, 0], sizes = [16, 128], strides = [1, 1]} : vector<16x384xf32> to vector<16x128xf32>
    %195 = vector.extract_strided_slice %193 {offsets = [0, 0], sizes = [16, 128], strides = [1, 1]} : vector<16x384xf32> to vector<16x128xf32>
    %196 = arith.addf %194, %195 : vector<16x128xf32>
    %cst_63 = arith.constant 5.000000e-01 : f32
    %197 = vector.broadcast %cst_63 : f32 to vector<16x128xf32>
    %198 = arith.mulf %197, %196 : vector<16x128xf32>
    %199 = math.tanh %198 : vector<16x128xf32>
    %cst_64 = arith.constant 5.000000e-01 : f32
    %200 = vector.broadcast %cst_64 : f32 to vector<16x128xf32>
    %201 = arith.mulf %200, %199 : vector<16x128xf32>
    %cst_65 = arith.constant 5.000000e-01 : f32
    %202 = vector.broadcast %cst_65 : f32 to vector<16x128xf32>
    %203 = arith.addf %201, %202 : vector<16x128xf32>
    %204 = vector.extract_strided_slice %191 {offsets = [0, 128], sizes = [16, 128], strides = [1, 1]} : vector<16x384xf32> to vector<16x128xf32>
    %205 = vector.extract_strided_slice %193 {offsets = [0, 128], sizes = [16, 128], strides = [1, 1]} : vector<16x384xf32> to vector<16x128xf32>
    %206 = arith.addf %204, %205 : vector<16x128xf32>
    %cst_66 = arith.constant 5.000000e-01 : f32
    %207 = vector.broadcast %cst_66 : f32 to vector<16x128xf32>
    %208 = arith.mulf %207, %206 : vector<16x128xf32>
    %209 = math.tanh %208 : vector<16x128xf32>
    %cst_67 = arith.constant 5.000000e-01 : f32
    %210 = vector.broadcast %cst_67 : f32 to vector<16x128xf32>
    %211 = arith.mulf %210, %209 : vector<16x128xf32>
    %cst_68 = arith.constant 5.000000e-01 : f32
    %212 = vector.broadcast %cst_68 : f32 to vector<16x128xf32>
    %213 = arith.addf %211, %212 : vector<16x128xf32>
    %214 = vector.extract_strided_slice %191 {offsets = [0, 256], sizes = [16, 128], strides = [1, 1]} : vector<16x384xf32> to vector<16x128xf32>
    %215 = vector.extract_strided_slice %193 {offsets = [0, 256], sizes = [16, 128], strides = [1, 1]} : vector<16x384xf32> to vector<16x128xf32>
    %216 = vector.broadcast %14 : vector<1x128xf32> to vector<16x128xf32>
    %217 = arith.addf %215, %216 : vector<16x128xf32>
    %218 = arith.mulf %203, %217 : vector<16x128xf32>
    %219 = arith.addf %214, %218 : vector<16x128xf32>
    %220 = math.tanh %219 : vector<16x128xf32>
    %221 = arith.subf %187, %220 : vector<16x128xf32>
    %222 = arith.mulf %213, %221 : vector<16x128xf32>
    %223 = arith.addf %220, %222 : vector<16x128xf32>
    %224 = arith.truncf %223 : vector<16x128xf32> to vector<16x128xbf16>
    %225 = arith.index_cast %c4_i32 : i32 to index
    %c0_69 = arith.constant 0 : index
    %c0_70 = arith.constant 0 : index
    %226 = vector.load %arg18[%225, %c0_69, %c0_70] : memref<8x16x128xbf16, #tpu.memory_space<vmem>>, vector<1x16x128xbf16>
    %227 = vector.shape_cast %226 : vector<1x16x128xbf16> to vector<16x128xbf16>
    %228 = vector.shape_cast %224 : vector<16x128xbf16> to vector<1x16x128xbf16>
    tpu.vector_store %arg18[%225, %c0_69, %c0_70], %228 {strides = array<i32>} : memref<8x16x128xbf16, #tpu.memory_space<vmem>>, vector<1x16x128xbf16>,
    %229 = arith.cmpi slt, %c4_i32, %4 : i32
    %230 = arith.select %229, %223, %187 : vector<16x128xf32>
    %c5_i32 = arith.constant 5 : i32
    %c16_i32_71 = arith.constant 16 : i32
    %231 = arith.muli %c5_i32, %c16_i32_71 : i32
    %232 = tpu.assume_multiple %231, 8 : i32
    %233 = arith.index_cast %232 : i32 to index
    %c0_72 = arith.constant 0 : index
    %234 = vector.load %arg17[%233, %c0_72] : memref<128x384xf32, #tpu.memory_space<vmem>>, vector<16x384xf32>
    %235 = arith.truncf %230 : vector<16x128xf32> to vector<16x128xbf16>
    %cst_73 = arith.constant dense<0.000000e+00> : vector<16x384xf32>
    %236 = tpu.matmul %235, %13, %cst_73 {dimension_numbers = #tpu.dot_dimension_numbers<[1], [0], [0], [1], [0, 0, 1, 1], [], []>} : vector<16x128xbf16>, vector<128x384xbf16>, vector<16x384xf32> -> vector<16x384xf32>
    %237 = vector.extract_strided_slice %234 {offsets = [0, 0], sizes = [16, 128], strides = [1, 1]} : vector<16x384xf32> to vector<16x128xf32>
    %238 = vector.extract_strided_slice %236 {offsets = [0, 0], sizes = [16, 128], strides = [1, 1]} : vector<16x384xf32> to vector<16x128xf32>
    %239 = arith.addf %237, %238 : vector<16x128xf32>
    %cst_74 = arith.constant 5.000000e-01 : f32
    %240 = vector.broadcast %cst_74 : f32 to vector<16x128xf32>
    %241 = arith.mulf %240, %239 : vector<16x128xf32>
    %242 = math.tanh %241 : vector<16x128xf32>
    %cst_75 = arith.constant 5.000000e-01 : f32
    %243 = vector.broadcast %cst_75 : f32 to vector<16x128xf32>
    %244 = arith.mulf %243, %242 : vector<16x128xf32>
    %cst_76 = arith.constant 5.000000e-01 : f32
    %245 = vector.broadcast %cst_76 : f32 to vector<16x128xf32>
    %246 = arith.addf %244, %245 : vector<16x128xf32>
    %247 = vector.extract_strided_slice %234 {offsets = [0, 128], sizes = [16, 128], strides = [1, 1]} : vector<16x384xf32> to vector<16x128xf32>
    %248 = vector.extract_strided_slice %236 {offsets = [0, 128], sizes = [16, 128], strides = [1, 1]} : vector<16x384xf32> to vector<16x128xf32>
    %249 = arith.addf %247, %248 : vector<16x128xf32>
    %cst_77 = arith.constant 5.000000e-01 : f32
    %250 = vector.broadcast %cst_77 : f32 to vector<16x128xf32>
    %251 = arith.mulf %250, %249 : vector<16x128xf32>
    %252 = math.tanh %251 : vector<16x128xf32>
    %cst_78 = arith.constant 5.000000e-01 : f32
    %253 = vector.broadcast %cst_78 : f32 to vector<16x128xf32>
    %254 = arith.mulf %253, %252 : vector<16x128xf32>
    %cst_79 = arith.constant 5.000000e-01 : f32
    %255 = vector.broadcast %cst_79 : f32 to vector<16x128xf32>
    %256 = arith.addf %254, %255 : vector<16x128xf32>
    %257 = vector.extract_strided_slice %234 {offsets = [0, 256], sizes = [16, 128], strides = [1, 1]} : vector<16x384xf32> to vector<16x128xf32>
    %258 = vector.extract_strided_slice %236 {offsets = [0, 256], sizes = [16, 128], strides = [1, 1]} : vector<16x384xf32> to vector<16x128xf32>
    %259 = vector.broadcast %14 : vector<1x128xf32> to vector<16x128xf32>
    %260 = arith.addf %258, %259 : vector<16x128xf32>
    %261 = arith.mulf %246, %260 : vector<16x128xf32>
    %262 = arith.addf %257, %261 : vector<16x128xf32>
    %263 = math.tanh %262 : vector<16x128xf32>
    %264 = arith.subf %230, %263 : vector<16x128xf32>
    %265 = arith.mulf %256, %264 : vector<16x128xf32>
    %266 = arith.addf %263, %265 : vector<16x128xf32>
    %267 = arith.truncf %266 : vector<16x128xf32> to vector<16x128xbf16>
    %268 = arith.index_cast %c5_i32 : i32 to index
    %c0_80 = arith.constant 0 : index
    %c0_81 = arith.constant 0 : index
    %269 = vector.load %arg18[%268, %c0_80, %c0_81] : memref<8x16x128xbf16, #tpu.memory_space<vmem>>, vector<1x16x128xbf16>
    %270 = vector.shape_cast %269 : vector<1x16x128xbf16> to vector<16x128xbf16>
    %271 = vector.shape_cast %267 : vector<16x128xbf16> to vector<1x16x128xbf16>
    tpu.vector_store %arg18[%268, %c0_80, %c0_81], %271 {strides = array<i32>} : memref<8x16x128xbf16, #tpu.memory_space<vmem>>, vector<1x16x128xbf16>,
    %272 = arith.cmpi slt, %c5_i32, %4 : i32
    %273 = arith.select %272, %266, %230 : vector<16x128xf32>
    %c6_i32 = arith.constant 6 : i32
    %c16_i32_82 = arith.constant 16 : i32
    %274 = arith.muli %c6_i32, %c16_i32_82 : i32
    %275 = tpu.assume_multiple %274, 8 : i32
    %276 = arith.index_cast %275 : i32 to index
    %c0_83 = arith.constant 0 : index
    %277 = vector.load %arg17[%276, %c0_83] : memref<128x384xf32, #tpu.memory_space<vmem>>, vector<16x384xf32>
    %278 = arith.truncf %273 : vector<16x128xf32> to vector<16x128xbf16>
    %cst_84 = arith.constant dense<0.000000e+00> : vector<16x384xf32>
    %279 = tpu.matmul %278, %13, %cst_84 {dimension_numbers = #tpu.dot_dimension_numbers<[1], [0], [0], [1], [0, 0, 1, 1], [], []>} : vector<16x128xbf16>, vector<128x384xbf16>, vector<16x384xf32> -> vector<16x384xf32>
    %280 = vector.extract_strided_slice %277 {offsets = [0, 0], sizes = [16, 128], strides = [1, 1]} : vector<16x384xf32> to vector<16x128xf32>
    %281 = vector.extract_strided_slice %279 {offsets = [0, 0], sizes = [16, 128], strides = [1, 1]} : vector<16x384xf32> to vector<16x128xf32>
    %282 = arith.addf %280, %281 : vector<16x128xf32>
    %cst_85 = arith.constant 5.000000e-01 : f32
    %283 = vector.broadcast %cst_85 : f32 to vector<16x128xf32>
    %284 = arith.mulf %283, %282 : vector<16x128xf32>
    %285 = math.tanh %284 : vector<16x128xf32>
    %cst_86 = arith.constant 5.000000e-01 : f32
    %286 = vector.broadcast %cst_86 : f32 to vector<16x128xf32>
    %287 = arith.mulf %286, %285 : vector<16x128xf32>
    %cst_87 = arith.constant 5.000000e-01 : f32
    %288 = vector.broadcast %cst_87 : f32 to vector<16x128xf32>
    %289 = arith.addf %287, %288 : vector<16x128xf32>
    %290 = vector.extract_strided_slice %277 {offsets = [0, 128], sizes = [16, 128], strides = [1, 1]} : vector<16x384xf32> to vector<16x128xf32>
    %291 = vector.extract_strided_slice %279 {offsets = [0, 128], sizes = [16, 128], strides = [1, 1]} : vector<16x384xf32> to vector<16x128xf32>
    %292 = arith.addf %290, %291 : vector<16x128xf32>
    %cst_88 = arith.constant 5.000000e-01 : f32
    %293 = vector.broadcast %cst_88 : f32 to vector<16x128xf32>
    %294 = arith.mulf %293, %292 : vector<16x128xf32>
    %295 = math.tanh %294 : vector<16x128xf32>
    %cst_89 = arith.constant 5.000000e-01 : f32
    %296 = vector.broadcast %cst_89 : f32 to vector<16x128xf32>
    %297 = arith.mulf %296, %295 : vector<16x128xf32>
    %cst_90 = arith.constant 5.000000e-01 : f32
    %298 = vector.broadcast %cst_90 : f32 to vector<16x128xf32>
    %299 = arith.addf %297, %298 : vector<16x128xf32>
    %300 = vector.extract_strided_slice %277 {offsets = [0, 256], sizes = [16, 128], strides = [1, 1]} : vector<16x384xf32> to vector<16x128xf32>
    %301 = vector.extract_strided_slice %279 {offsets = [0, 256], sizes = [16, 128], strides = [1, 1]} : vector<16x384xf32> to vector<16x128xf32>
    %302 = vector.broadcast %14 : vector<1x128xf32> to vector<16x128xf32>
    %303 = arith.addf %301, %302 : vector<16x128xf32>
    %304 = arith.mulf %289, %303 : vector<16x128xf32>
    %305 = arith.addf %300, %304 : vector<16x128xf32>
    %306 = math.tanh %305 : vector<16x128xf32>
    %307 = arith.subf %273, %306 : vector<16x128xf32>
    %308 = arith.mulf %299, %307 : vector<16x128xf32>
    %309 = arith.addf %306, %308 : vector<16x128xf32>
    %310 = arith.truncf %309 : vector<16x128xf32> to vector<16x128xbf16>
    %311 = arith.index_cast %c6_i32 : i32 to index
    %c0_91 = arith.constant 0 : index
    %c0_92 = arith.constant 0 : index
    %312 = vector.load %arg18[%311, %c0_91, %c0_92] : memref<8x16x128xbf16, #tpu.memory_space<vmem>>, vector<1x16x128xbf16>
    %313 = vector.shape_cast %312 : vector<1x16x128xbf16> to vector<16x128xbf16>
    %314 = vector.shape_cast %310 : vector<16x128xbf16> to vector<1x16x128xbf16>
    tpu.vector_store %arg18[%311, %c0_91, %c0_92], %314 {strides = array<i32>} : memref<8x16x128xbf16, #tpu.memory_space<vmem>>, vector<1x16x128xbf16>,
    %315 = arith.cmpi slt, %c6_i32, %4 : i32
    %316 = arith.select %315, %309, %273 : vector<16x128xf32>
    %c7_i32 = arith.constant 7 : i32
    %c16_i32_93 = arith.constant 16 : i32
    %317 = arith.muli %c7_i32, %c16_i32_93 : i32
    %318 = tpu.assume_multiple %317, 8 : i32
    %319 = arith.index_cast %318 : i32 to index
    %c0_94 = arith.constant 0 : index
    %320 = vector.load %arg17[%319, %c0_94] : memref<128x384xf32, #tpu.memory_space<vmem>>, vector<16x384xf32>
    %321 = arith.truncf %316 : vector<16x128xf32> to vector<16x128xbf16>
    %cst_95 = arith.constant dense<0.000000e+00> : vector<16x384xf32>
    %322 = tpu.matmul %321, %13, %cst_95 {dimension_numbers = #tpu.dot_dimension_numbers<[1], [0], [0], [1], [0, 0, 1, 1], [], []>} : vector<16x128xbf16>, vector<128x384xbf16>, vector<16x384xf32> -> vector<16x384xf32>
    %323 = vector.extract_strided_slice %320 {offsets = [0, 0], sizes = [16, 128], strides = [1, 1]} : vector<16x384xf32> to vector<16x128xf32>
    %324 = vector.extract_strided_slice %322 {offsets = [0, 0], sizes = [16, 128], strides = [1, 1]} : vector<16x384xf32> to vector<16x128xf32>
    %325 = arith.addf %323, %324 : vector<16x128xf32>
    %cst_96 = arith.constant 5.000000e-01 : f32
    %326 = vector.broadcast %cst_96 : f32 to vector<16x128xf32>
    %327 = arith.mulf %326, %325 : vector<16x128xf32>
    %328 = math.tanh %327 : vector<16x128xf32>
    %cst_97 = arith.constant 5.000000e-01 : f32
    %329 = vector.broadcast %cst_97 : f32 to vector<16x128xf32>
    %330 = arith.mulf %329, %328 : vector<16x128xf32>
    %cst_98 = arith.constant 5.000000e-01 : f32
    %331 = vector.broadcast %cst_98 : f32 to vector<16x128xf32>
    %332 = arith.addf %330, %331 : vector<16x128xf32>
    %333 = vector.extract_strided_slice %320 {offsets = [0, 128], sizes = [16, 128], strides = [1, 1]} : vector<16x384xf32> to vector<16x128xf32>
    %334 = vector.extract_strided_slice %322 {offsets = [0, 128], sizes = [16, 128], strides = [1, 1]} : vector<16x384xf32> to vector<16x128xf32>
    %335 = arith.addf %333, %334 : vector<16x128xf32>
    %cst_99 = arith.constant 5.000000e-01 : f32
    %336 = vector.broadcast %cst_99 : f32 to vector<16x128xf32>
    %337 = arith.mulf %336, %335 : vector<16x128xf32>
    %338 = math.tanh %337 : vector<16x128xf32>
    %cst_100 = arith.constant 5.000000e-01 : f32
    %339 = vector.broadcast %cst_100 : f32 to vector<16x128xf32>
    %340 = arith.mulf %339, %338 : vector<16x128xf32>
    %cst_101 = arith.constant 5.000000e-01 : f32
    %341 = vector.broadcast %cst_101 : f32 to vector<16x128xf32>
    %342 = arith.addf %340, %341 : vector<16x128xf32>
    %343 = vector.extract_strided_slice %320 {offsets = [0, 256], sizes = [16, 128], strides = [1, 1]} : vector<16x384xf32> to vector<16x128xf32>
    %344 = vector.extract_strided_slice %322 {offsets = [0, 256], sizes = [16, 128], strides = [1, 1]} : vector<16x384xf32> to vector<16x128xf32>
    %345 = vector.broadcast %14 : vector<1x128xf32> to vector<16x128xf32>
    %346 = arith.addf %344, %345 : vector<16x128xf32>
    %347 = arith.mulf %332, %346 : vector<16x128xf32>
    %348 = arith.addf %343, %347 : vector<16x128xf32>
    %349 = math.tanh %348 : vector<16x128xf32>
    %350 = arith.subf %316, %349 : vector<16x128xf32>
    %351 = arith.mulf %342, %350 : vector<16x128xf32>
    %352 = arith.addf %349, %351 : vector<16x128xf32>
    %353 = arith.truncf %352 : vector<16x128xf32> to vector<16x128xbf16>
    %354 = arith.index_cast %c7_i32 : i32 to index
    %c0_102 = arith.constant 0 : index
    %c0_103 = arith.constant 0 : index
    %355 = vector.load %arg18[%354, %c0_102, %c0_103] : memref<8x16x128xbf16, #tpu.memory_space<vmem>>, vector<1x16x128xbf16>
    %356 = vector.shape_cast %355 : vector<1x16x128xbf16> to vector<16x128xbf16>
    %357 = vector.shape_cast %353 : vector<16x128xbf16> to vector<1x16x128xbf16>
    tpu.vector_store %arg18[%354, %c0_102, %c0_103], %357 {strides = array<i32>} : memref<8x16x128xbf16, #tpu.memory_space<vmem>>, vector<1x16x128xbf16>,
    %358 = arith.cmpi slt, %c7_i32, %4 : i32
    %359 = arith.select %358, %352, %316 : vector<16x128xf32>
    %c8_i32_104 = arith.constant 8 : i32
    %c0_105 = arith.constant 0 : index
    %c0_106 = arith.constant 0 : index
    %360 = vector.load %arg14[%c0_105, %c0_106] : memref<16x128xf32, #tpu.memory_space<vmem>>, vector<16x128xf32>
    tpu.vector_store %arg14[%c0_105, %c0_106], %359 {strides = array<i32>} : memref<16x128xf32, #tpu.memory_space<vmem>>, vector<16x128xf32>,
    %c0_107 = arith.constant 0 : index
    %c0_108 = arith.constant 0 : index
    %c0_109 = arith.constant 0 : index
    %361 = vector.load %arg18[%c0_107, %c0_108, %c0_109] : memref<8x16x128xbf16, #tpu.memory_space<vmem>>, vector<8x16x128xbf16>
    %362 = vector.shape_cast %361 : vector<8x16x128xbf16> to vector<128x128xbf16>
    %c0_110 = arith.constant 0 : index
    %c0_111 = arith.constant 0 : index
    %363 = vector.load %arg5[%c0_110, %c0_111] : memref<128x384xbf16, #tpu.memory_space<vmem>>, vector<128x384xbf16>
    %cst_112 = arith.constant dense<0.000000e+00> : vector<128x384xf32>
    %364 = tpu.matmul %362, %363, %cst_112 {dimension_numbers = #tpu.dot_dimension_numbers<[1], [0], [0], [1], [0, 0, 1, 1], [], []>} : vector<128x128xbf16>, vector<128x384xbf16>, vector<128x384xf32> -> vector<128x384xf32>
    %c0_113 = arith.constant 0 : index
    %c0_114 = arith.constant 0 : index
    %365 = vector.load %arg9[%c0_113, %c0_114] : memref<1x384xf32, #tpu.memory_space<vmem>>, vector<1x384xf32>
    %366 = vector.broadcast %365 : vector<1x384xf32> to vector<128x384xf32>
    %367 = arith.addf %364, %366 : vector<128x384xf32>
    %c0_115 = arith.constant 0 : index
    %c0_116 = arith.constant 0 : index
    %368 = vector.load %arg17[%c0_115, %c0_116] : memref<128x384xf32, #tpu.memory_space<vmem>>, vector<128x384xf32>
    tpu.vector_store %arg17[%c0_115, %c0_116], %367 {strides = array<i32>} : memref<128x384xf32, #tpu.memory_space<vmem>>, vector<128x384xf32>,
    %c0_117 = arith.constant 0 : index
    %c0_118 = arith.constant 0 : index
    %369 = vector.load %arg7[%c0_117, %c0_118] : memref<128x384xbf16, #tpu.memory_space<vmem>>, vector<128x384xbf16>
    %c0_119 = arith.constant 0 : index
    %c0_120 = arith.constant 0 : index
    %370 = vector.load %arg11[%c0_119, %c0_120] : memref<1x128xf32, #tpu.memory_space<vmem>>, vector<1x128xf32>
    %c0_121 = arith.constant 0 : index
    %c0_122 = arith.constant 0 : index
    %371 = vector.load %arg15[%c0_121, %c0_122] : memref<16x128xf32, #tpu.memory_space<vmem>>, vector<16x128xf32>
    %c0_i32_123 = arith.constant 0 : i32
    %c16_i32_124 = arith.constant 16 : i32
    %372 = arith.muli %c0_i32_123, %c16_i32_124 : i32
    %373 = tpu.assume_multiple %372, 8 : i32
    %374 = arith.index_cast %373 : i32 to index
    %c0_125 = arith.constant 0 : index
    %375 = vector.load %arg17[%374, %c0_125] : memref<128x384xf32, #tpu.memory_space<vmem>>, vector<16x384xf32>
    %376 = arith.truncf %371 : vector<16x128xf32> to vector<16x128xbf16>
    %cst_126 = arith.constant dense<0.000000e+00> : vector<16x384xf32>
    %377 = tpu.matmul %376, %369, %cst_126 {dimension_numbers = #tpu.dot_dimension_numbers<[1], [0], [0], [1], [0, 0, 1, 1], [], []>} : vector<16x128xbf16>, vector<128x384xbf16>, vector<16x384xf32> -> vector<16x384xf32>
    %378 = vector.extract_strided_slice %375 {offsets = [0, 0], sizes = [16, 128], strides = [1, 1]} : vector<16x384xf32> to vector<16x128xf32>
    %379 = vector.extract_strided_slice %377 {offsets = [0, 0], sizes = [16, 128], strides = [1, 1]} : vector<16x384xf32> to vector<16x128xf32>
    %380 = arith.addf %378, %379 : vector<16x128xf32>
    %cst_127 = arith.constant 5.000000e-01 : f32
    %381 = vector.broadcast %cst_127 : f32 to vector<16x128xf32>
    %382 = arith.mulf %381, %380 : vector<16x128xf32>
    %383 = math.tanh %382 : vector<16x128xf32>
    %cst_128 = arith.constant 5.000000e-01 : f32
    %384 = vector.broadcast %cst_128 : f32 to vector<16x128xf32>
    %385 = arith.mulf %384, %383 : vector<16x128xf32>
    %cst_129 = arith.constant 5.000000e-01 : f32
    %386 = vector.broadcast %cst_129 : f32 to vector<16x128xf32>
    %387 = arith.addf %385, %386 : vector<16x128xf32>
    %388 = vector.extract_strided_slice %375 {offsets = [0, 128], sizes = [16, 128], strides = [1, 1]} : vector<16x384xf32> to vector<16x128xf32>
    %389 = vector.extract_strided_slice %377 {offsets = [0, 128], sizes = [16, 128], strides = [1, 1]} : vector<16x384xf32> to vector<16x128xf32>
    %390 = arith.addf %388, %389 : vector<16x128xf32>
    %cst_130 = arith.constant 5.000000e-01 : f32
    %391 = vector.broadcast %cst_130 : f32 to vector<16x128xf32>
    %392 = arith.mulf %391, %390 : vector<16x128xf32>
    %393 = math.tanh %392 : vector<16x128xf32>
    %cst_131 = arith.constant 5.000000e-01 : f32
    %394 = vector.broadcast %cst_131 : f32 to vector<16x128xf32>
    %395 = arith.mulf %394, %393 : vector<16x128xf32>
    %cst_132 = arith.constant 5.000000e-01 : f32
    %396 = vector.broadcast %cst_132 : f32 to vector<16x128xf32>
    %397 = arith.addf %395, %396 : vector<16x128xf32>
    %398 = vector.extract_strided_slice %375 {offsets = [0, 256], sizes = [16, 128], strides = [1, 1]} : vector<16x384xf32> to vector<16x128xf32>
    %399 = vector.extract_strided_slice %377 {offsets = [0, 256], sizes = [16, 128], strides = [1, 1]} : vector<16x384xf32> to vector<16x128xf32>
    %400 = vector.broadcast %370 : vector<1x128xf32> to vector<16x128xf32>
    %401 = arith.addf %399, %400 : vector<16x128xf32>
    %402 = arith.mulf %387, %401 : vector<16x128xf32>
    %403 = arith.addf %398, %402 : vector<16x128xf32>
    %404 = math.tanh %403 : vector<16x128xf32>
    %405 = arith.subf %371, %404 : vector<16x128xf32>
    %406 = arith.mulf %397, %405 : vector<16x128xf32>
    %407 = arith.addf %404, %406 : vector<16x128xf32>
    %408 = arith.cmpi slt, %c0_i32_123, %4 : i32
    %409 = arith.select %408, %407, %371 : vector<16x128xf32>
    %c1_i32_133 = arith.constant 1 : i32
    %c16_i32_134 = arith.constant 16 : i32
    %410 = arith.muli %c1_i32_133, %c16_i32_134 : i32
    %411 = tpu.assume_multiple %410, 8 : i32
    %412 = arith.index_cast %411 : i32 to index
    %c0_135 = arith.constant 0 : index
    %413 = vector.load %arg17[%412, %c0_135] : memref<128x384xf32, #tpu.memory_space<vmem>>, vector<16x384xf32>
    %414 = arith.truncf %409 : vector<16x128xf32> to vector<16x128xbf16>
    %cst_136 = arith.constant dense<0.000000e+00> : vector<16x384xf32>
    %415 = tpu.matmul %414, %369, %cst_136 {dimension_numbers = #tpu.dot_dimension_numbers<[1], [0], [0], [1], [0, 0, 1, 1], [], []>} : vector<16x128xbf16>, vector<128x384xbf16>, vector<16x384xf32> -> vector<16x384xf32>
    %416 = vector.extract_strided_slice %413 {offsets = [0, 0], sizes = [16, 128], strides = [1, 1]} : vector<16x384xf32> to vector<16x128xf32>
    %417 = vector.extract_strided_slice %415 {offsets = [0, 0], sizes = [16, 128], strides = [1, 1]} : vector<16x384xf32> to vector<16x128xf32>
    %418 = arith.addf %416, %417 : vector<16x128xf32>
    %cst_137 = arith.constant 5.000000e-01 : f32
    %419 = vector.broadcast %cst_137 : f32 to vector<16x128xf32>
    %420 = arith.mulf %419, %418 : vector<16x128xf32>
    %421 = math.tanh %420 : vector<16x128xf32>
    %cst_138 = arith.constant 5.000000e-01 : f32
    %422 = vector.broadcast %cst_138 : f32 to vector<16x128xf32>
    %423 = arith.mulf %422, %421 : vector<16x128xf32>
    %cst_139 = arith.constant 5.000000e-01 : f32
    %424 = vector.broadcast %cst_139 : f32 to vector<16x128xf32>
    %425 = arith.addf %423, %424 : vector<16x128xf32>
    %426 = vector.extract_strided_slice %413 {offsets = [0, 128], sizes = [16, 128], strides = [1, 1]} : vector<16x384xf32> to vector<16x128xf32>
    %427 = vector.extract_strided_slice %415 {offsets = [0, 128], sizes = [16, 128], strides = [1, 1]} : vector<16x384xf32> to vector<16x128xf32>
    %428 = arith.addf %426, %427 : vector<16x128xf32>
    %cst_140 = arith.constant 5.000000e-01 : f32
    %429 = vector.broadcast %cst_140 : f32 to vector<16x128xf32>
    %430 = arith.mulf %429, %428 : vector<16x128xf32>
    %431 = math.tanh %430 : vector<16x128xf32>
    %cst_141 = arith.constant 5.000000e-01 : f32
    %432 = vector.broadcast %cst_141 : f32 to vector<16x128xf32>
    %433 = arith.mulf %432, %431 : vector<16x128xf32>
    %cst_142 = arith.constant 5.000000e-01 : f32
    %434 = vector.broadcast %cst_142 : f32 to vector<16x128xf32>
    %435 = arith.addf %433, %434 : vector<16x128xf32>
    %436 = vector.extract_strided_slice %413 {offsets = [0, 256], sizes = [16, 128], strides = [1, 1]} : vector<16x384xf32> to vector<16x128xf32>
    %437 = vector.extract_strided_slice %415 {offsets = [0, 256], sizes = [16, 128], strides = [1, 1]} : vector<16x384xf32> to vector<16x128xf32>
    %438 = vector.broadcast %370 : vector<1x128xf32> to vector<16x128xf32>
    %439 = arith.addf %437, %438 : vector<16x128xf32>
    %440 = arith.mulf %425, %439 : vector<16x128xf32>
    %441 = arith.addf %436, %440 : vector<16x128xf32>
    %442 = math.tanh %441 : vector<16x128xf32>
    %443 = arith.subf %409, %442 : vector<16x128xf32>
    %444 = arith.mulf %435, %443 : vector<16x128xf32>
    %445 = arith.addf %442, %444 : vector<16x128xf32>
    %446 = arith.cmpi slt, %c1_i32_133, %4 : i32
    %447 = arith.select %446, %445, %409 : vector<16x128xf32>
    %c2_i32_143 = arith.constant 2 : i32
    %c16_i32_144 = arith.constant 16 : i32
    %448 = arith.muli %c2_i32_143, %c16_i32_144 : i32
    %449 = tpu.assume_multiple %448, 8 : i32
    %450 = arith.index_cast %449 : i32 to index
    %c0_145 = arith.constant 0 : index
    %451 = vector.load %arg17[%450, %c0_145] : memref<128x384xf32, #tpu.memory_space<vmem>>, vector<16x384xf32>
    %452 = arith.truncf %447 : vector<16x128xf32> to vector<16x128xbf16>
    %cst_146 = arith.constant dense<0.000000e+00> : vector<16x384xf32>
    %453 = tpu.matmul %452, %369, %cst_146 {dimension_numbers = #tpu.dot_dimension_numbers<[1], [0], [0], [1], [0, 0, 1, 1], [], []>} : vector<16x128xbf16>, vector<128x384xbf16>, vector<16x384xf32> -> vector<16x384xf32>
    %454 = vector.extract_strided_slice %451 {offsets = [0, 0], sizes = [16, 128], strides = [1, 1]} : vector<16x384xf32> to vector<16x128xf32>
    %455 = vector.extract_strided_slice %453 {offsets = [0, 0], sizes = [16, 128], strides = [1, 1]} : vector<16x384xf32> to vector<16x128xf32>
    %456 = arith.addf %454, %455 : vector<16x128xf32>
    %cst_147 = arith.constant 5.000000e-01 : f32
    %457 = vector.broadcast %cst_147 : f32 to vector<16x128xf32>
    %458 = arith.mulf %457, %456 : vector<16x128xf32>
    %459 = math.tanh %458 : vector<16x128xf32>
    %cst_148 = arith.constant 5.000000e-01 : f32
    %460 = vector.broadcast %cst_148 : f32 to vector<16x128xf32>
    %461 = arith.mulf %460, %459 : vector<16x128xf32>
    %cst_149 = arith.constant 5.000000e-01 : f32
    %462 = vector.broadcast %cst_149 : f32 to vector<16x128xf32>
    %463 = arith.addf %461, %462 : vector<16x128xf32>
    %464 = vector.extract_strided_slice %451 {offsets = [0, 128], sizes = [16, 128], strides = [1, 1]} : vector<16x384xf32> to vector<16x128xf32>
    %465 = vector.extract_strided_slice %453 {offsets = [0, 128], sizes = [16, 128], strides = [1, 1]} : vector<16x384xf32> to vector<16x128xf32>
    %466 = arith.addf %464, %465 : vector<16x128xf32>
    %cst_150 = arith.constant 5.000000e-01 : f32
    %467 = vector.broadcast %cst_150 : f32 to vector<16x128xf32>
    %468 = arith.mulf %467, %466 : vector<16x128xf32>
    %469 = math.tanh %468 : vector<16x128xf32>
    %cst_151 = arith.constant 5.000000e-01 : f32
    %470 = vector.broadcast %cst_151 : f32 to vector<16x128xf32>
    %471 = arith.mulf %470, %469 : vector<16x128xf32>
    %cst_152 = arith.constant 5.000000e-01 : f32
    %472 = vector.broadcast %cst_152 : f32 to vector<16x128xf32>
    %473 = arith.addf %471, %472 : vector<16x128xf32>
    %474 = vector.extract_strided_slice %451 {offsets = [0, 256], sizes = [16, 128], strides = [1, 1]} : vector<16x384xf32> to vector<16x128xf32>
    %475 = vector.extract_strided_slice %453 {offsets = [0, 256], sizes = [16, 128], strides = [1, 1]} : vector<16x384xf32> to vector<16x128xf32>
    %476 = vector.broadcast %370 : vector<1x128xf32> to vector<16x128xf32>
    %477 = arith.addf %475, %476 : vector<16x128xf32>
    %478 = arith.mulf %463, %477 : vector<16x128xf32>
    %479 = arith.addf %474, %478 : vector<16x128xf32>
    %480 = math.tanh %479 : vector<16x128xf32>
    %481 = arith.subf %447, %480 : vector<16x128xf32>
    %482 = arith.mulf %473, %481 : vector<16x128xf32>
    %483 = arith.addf %480, %482 : vector<16x128xf32>
    %484 = arith.cmpi slt, %c2_i32_143, %4 : i32
    %485 = arith.select %484, %483, %447 : vector<16x128xf32>
    %c3_i32_153 = arith.constant 3 : i32
    %c16_i32_154 = arith.constant 16 : i32
    %486 = arith.muli %c3_i32_153, %c16_i32_154 : i32
    %487 = tpu.assume_multiple %486, 8 : i32
    %488 = arith.index_cast %487 : i32 to index
    %c0_155 = arith.constant 0 : index
    %489 = vector.load %arg17[%488, %c0_155] : memref<128x384xf32, #tpu.memory_space<vmem>>, vector<16x384xf32>
    %490 = arith.truncf %485 : vector<16x128xf32> to vector<16x128xbf16>
    %cst_156 = arith.constant dense<0.000000e+00> : vector<16x384xf32>
    %491 = tpu.matmul %490, %369, %cst_156 {dimension_numbers = #tpu.dot_dimension_numbers<[1], [0], [0], [1], [0, 0, 1, 1], [], []>} : vector<16x128xbf16>, vector<128x384xbf16>, vector<16x384xf32> -> vector<16x384xf32>
    %492 = vector.extract_strided_slice %489 {offsets = [0, 0], sizes = [16, 128], strides = [1, 1]} : vector<16x384xf32> to vector<16x128xf32>
    %493 = vector.extract_strided_slice %491 {offsets = [0, 0], sizes = [16, 128], strides = [1, 1]} : vector<16x384xf32> to vector<16x128xf32>
    %494 = arith.addf %492, %493 : vector<16x128xf32>
    %cst_157 = arith.constant 5.000000e-01 : f32
    %495 = vector.broadcast %cst_157 : f32 to vector<16x128xf32>
    %496 = arith.mulf %495, %494 : vector<16x128xf32>
    %497 = math.tanh %496 : vector<16x128xf32>
    %cst_158 = arith.constant 5.000000e-01 : f32
    %498 = vector.broadcast %cst_158 : f32 to vector<16x128xf32>
    %499 = arith.mulf %498, %497 : vector<16x128xf32>
    %cst_159 = arith.constant 5.000000e-01 : f32
    %500 = vector.broadcast %cst_159 : f32 to vector<16x128xf32>
    %501 = arith.addf %499, %500 : vector<16x128xf32>
    %502 = vector.extract_strided_slice %489 {offsets = [0, 128], sizes = [16, 128], strides = [1, 1]} : vector<16x384xf32> to vector<16x128xf32>
    %503 = vector.extract_strided_slice %491 {offsets = [0, 128], sizes = [16, 128], strides = [1, 1]} : vector<16x384xf32> to vector<16x128xf32>
    %504 = arith.addf %502, %503 : vector<16x128xf32>
    %cst_160 = arith.constant 5.000000e-01 : f32
    %505 = vector.broadcast %cst_160 : f32 to vector<16x128xf32>
    %506 = arith.mulf %505, %504 : vector<16x128xf32>
    %507 = math.tanh %506 : vector<16x128xf32>
    %cst_161 = arith.constant 5.000000e-01 : f32
    %508 = vector.broadcast %cst_161 : f32 to vector<16x128xf32>
    %509 = arith.mulf %508, %507 : vector<16x128xf32>
    %cst_162 = arith.constant 5.000000e-01 : f32
    %510 = vector.broadcast %cst_162 : f32 to vector<16x128xf32>
    %511 = arith.addf %509, %510 : vector<16x128xf32>
    %512 = vector.extract_strided_slice %489 {offsets = [0, 256], sizes = [16, 128], strides = [1, 1]} : vector<16x384xf32> to vector<16x128xf32>
    %513 = vector.extract_strided_slice %491 {offsets = [0, 256], sizes = [16, 128], strides = [1, 1]} : vector<16x384xf32> to vector<16x128xf32>
    %514 = vector.broadcast %370 : vector<1x128xf32> to vector<16x128xf32>
    %515 = arith.addf %513, %514 : vector<16x128xf32>
    %516 = arith.mulf %501, %515 : vector<16x128xf32>
    %517 = arith.addf %512, %516 : vector<16x128xf32>
    %518 = math.tanh %517 : vector<16x128xf32>
    %519 = arith.subf %485, %518 : vector<16x128xf32>
    %520 = arith.mulf %511, %519 : vector<16x128xf32>
    %521 = arith.addf %518, %520 : vector<16x128xf32>
    %522 = arith.cmpi slt, %c3_i32_153, %4 : i32
    %523 = arith.select %522, %521, %485 : vector<16x128xf32>
    %c4_i32_163 = arith.constant 4 : i32
    %c16_i32_164 = arith.constant 16 : i32
    %524 = arith.muli %c4_i32_163, %c16_i32_164 : i32
    %525 = tpu.assume_multiple %524, 8 : i32
    %526 = arith.index_cast %525 : i32 to index
    %c0_165 = arith.constant 0 : index
    %527 = vector.load %arg17[%526, %c0_165] : memref<128x384xf32, #tpu.memory_space<vmem>>, vector<16x384xf32>
    %528 = arith.truncf %523 : vector<16x128xf32> to vector<16x128xbf16>
    %cst_166 = arith.constant dense<0.000000e+00> : vector<16x384xf32>
    %529 = tpu.matmul %528, %369, %cst_166 {dimension_numbers = #tpu.dot_dimension_numbers<[1], [0], [0], [1], [0, 0, 1, 1], [], []>} : vector<16x128xbf16>, vector<128x384xbf16>, vector<16x384xf32> -> vector<16x384xf32>
    %530 = vector.extract_strided_slice %527 {offsets = [0, 0], sizes = [16, 128], strides = [1, 1]} : vector<16x384xf32> to vector<16x128xf32>
    %531 = vector.extract_strided_slice %529 {offsets = [0, 0], sizes = [16, 128], strides = [1, 1]} : vector<16x384xf32> to vector<16x128xf32>
    %532 = arith.addf %530, %531 : vector<16x128xf32>
    %cst_167 = arith.constant 5.000000e-01 : f32
    %533 = vector.broadcast %cst_167 : f32 to vector<16x128xf32>
    %534 = arith.mulf %533, %532 : vector<16x128xf32>
    %535 = math.tanh %534 : vector<16x128xf32>
    %cst_168 = arith.constant 5.000000e-01 : f32
    %536 = vector.broadcast %cst_168 : f32 to vector<16x128xf32>
    %537 = arith.mulf %536, %535 : vector<16x128xf32>
    %cst_169 = arith.constant 5.000000e-01 : f32
    %538 = vector.broadcast %cst_169 : f32 to vector<16x128xf32>
    %539 = arith.addf %537, %538 : vector<16x128xf32>
    %540 = vector.extract_strided_slice %527 {offsets = [0, 128], sizes = [16, 128], strides = [1, 1]} : vector<16x384xf32> to vector<16x128xf32>
    %541 = vector.extract_strided_slice %529 {offsets = [0, 128], sizes = [16, 128], strides = [1, 1]} : vector<16x384xf32> to vector<16x128xf32>
    %542 = arith.addf %540, %541 : vector<16x128xf32>
    %cst_170 = arith.constant 5.000000e-01 : f32
    %543 = vector.broadcast %cst_170 : f32 to vector<16x128xf32>
    %544 = arith.mulf %543, %542 : vector<16x128xf32>
    %545 = math.tanh %544 : vector<16x128xf32>
    %cst_171 = arith.constant 5.000000e-01 : f32
    %546 = vector.broadcast %cst_171 : f32 to vector<16x128xf32>
    %547 = arith.mulf %546, %545 : vector<16x128xf32>
    %cst_172 = arith.constant 5.000000e-01 : f32
    %548 = vector.broadcast %cst_172 : f32 to vector<16x128xf32>
    %549 = arith.addf %547, %548 : vector<16x128xf32>
    %550 = vector.extract_strided_slice %527 {offsets = [0, 256], sizes = [16, 128], strides = [1, 1]} : vector<16x384xf32> to vector<16x128xf32>
    %551 = vector.extract_strided_slice %529 {offsets = [0, 256], sizes = [16, 128], strides = [1, 1]} : vector<16x384xf32> to vector<16x128xf32>
    %552 = vector.broadcast %370 : vector<1x128xf32> to vector<16x128xf32>
    %553 = arith.addf %551, %552 : vector<16x128xf32>
    %554 = arith.mulf %539, %553 : vector<16x128xf32>
    %555 = arith.addf %550, %554 : vector<16x128xf32>
    %556 = math.tanh %555 : vector<16x128xf32>
    %557 = arith.subf %523, %556 : vector<16x128xf32>
    %558 = arith.mulf %549, %557 : vector<16x128xf32>
    %559 = arith.addf %556, %558 : vector<16x128xf32>
    %560 = arith.cmpi slt, %c4_i32_163, %4 : i32
    %561 = arith.select %560, %559, %523 : vector<16x128xf32>
    %c5_i32_173 = arith.constant 5 : i32
    %c16_i32_174 = arith.constant 16 : i32
    %562 = arith.muli %c5_i32_173, %c16_i32_174 : i32
    %563 = tpu.assume_multiple %562, 8 : i32
    %564 = arith.index_cast %563 : i32 to index
    %c0_175 = arith.constant 0 : index
    %565 = vector.load %arg17[%564, %c0_175] : memref<128x384xf32, #tpu.memory_space<vmem>>, vector<16x384xf32>
    %566 = arith.truncf %561 : vector<16x128xf32> to vector<16x128xbf16>
    %cst_176 = arith.constant dense<0.000000e+00> : vector<16x384xf32>
    %567 = tpu.matmul %566, %369, %cst_176 {dimension_numbers = #tpu.dot_dimension_numbers<[1], [0], [0], [1], [0, 0, 1, 1], [], []>} : vector<16x128xbf16>, vector<128x384xbf16>, vector<16x384xf32> -> vector<16x384xf32>
    %568 = vector.extract_strided_slice %565 {offsets = [0, 0], sizes = [16, 128], strides = [1, 1]} : vector<16x384xf32> to vector<16x128xf32>
    %569 = vector.extract_strided_slice %567 {offsets = [0, 0], sizes = [16, 128], strides = [1, 1]} : vector<16x384xf32> to vector<16x128xf32>
    %570 = arith.addf %568, %569 : vector<16x128xf32>
    %cst_177 = arith.constant 5.000000e-01 : f32
    %571 = vector.broadcast %cst_177 : f32 to vector<16x128xf32>
    %572 = arith.mulf %571, %570 : vector<16x128xf32>
    %573 = math.tanh %572 : vector<16x128xf32>
    %cst_178 = arith.constant 5.000000e-01 : f32
    %574 = vector.broadcast %cst_178 : f32 to vector<16x128xf32>
    %575 = arith.mulf %574, %573 : vector<16x128xf32>
    %cst_179 = arith.constant 5.000000e-01 : f32
    %576 = vector.broadcast %cst_179 : f32 to vector<16x128xf32>
    %577 = arith.addf %575, %576 : vector<16x128xf32>
    %578 = vector.extract_strided_slice %565 {offsets = [0, 128], sizes = [16, 128], strides = [1, 1]} : vector<16x384xf32> to vector<16x128xf32>
    %579 = vector.extract_strided_slice %567 {offsets = [0, 128], sizes = [16, 128], strides = [1, 1]} : vector<16x384xf32> to vector<16x128xf32>
    %580 = arith.addf %578, %579 : vector<16x128xf32>
    %cst_180 = arith.constant 5.000000e-01 : f32
    %581 = vector.broadcast %cst_180 : f32 to vector<16x128xf32>
    %582 = arith.mulf %581, %580 : vector<16x128xf32>
    %583 = math.tanh %582 : vector<16x128xf32>
    %cst_181 = arith.constant 5.000000e-01 : f32
    %584 = vector.broadcast %cst_181 : f32 to vector<16x128xf32>
    %585 = arith.mulf %584, %583 : vector<16x128xf32>
    %cst_182 = arith.constant 5.000000e-01 : f32
    %586 = vector.broadcast %cst_182 : f32 to vector<16x128xf32>
    %587 = arith.addf %585, %586 : vector<16x128xf32>
    %588 = vector.extract_strided_slice %565 {offsets = [0, 256], sizes = [16, 128], strides = [1, 1]} : vector<16x384xf32> to vector<16x128xf32>
    %589 = vector.extract_strided_slice %567 {offsets = [0, 256], sizes = [16, 128], strides = [1, 1]} : vector<16x384xf32> to vector<16x128xf32>
    %590 = vector.broadcast %370 : vector<1x128xf32> to vector<16x128xf32>
    %591 = arith.addf %589, %590 : vector<16x128xf32>
    %592 = arith.mulf %577, %591 : vector<16x128xf32>
    %593 = arith.addf %588, %592 : vector<16x128xf32>
    %594 = math.tanh %593 : vector<16x128xf32>
    %595 = arith.subf %561, %594 : vector<16x128xf32>
    %596 = arith.mulf %587, %595 : vector<16x128xf32>
    %597 = arith.addf %594, %596 : vector<16x128xf32>
    %598 = arith.cmpi slt, %c5_i32_173, %4 : i32
    %599 = arith.select %598, %597, %561 : vector<16x128xf32>
    %c6_i32_183 = arith.constant 6 : i32
    %c16_i32_184 = arith.constant 16 : i32
    %600 = arith.muli %c6_i32_183, %c16_i32_184 : i32
    %601 = tpu.assume_multiple %600, 8 : i32
    %602 = arith.index_cast %601 : i32 to index
    %c0_185 = arith.constant 0 : index
    %603 = vector.load %arg17[%602, %c0_185] : memref<128x384xf32, #tpu.memory_space<vmem>>, vector<16x384xf32>
    %604 = arith.truncf %599 : vector<16x128xf32> to vector<16x128xbf16>
    %cst_186 = arith.constant dense<0.000000e+00> : vector<16x384xf32>
    %605 = tpu.matmul %604, %369, %cst_186 {dimension_numbers = #tpu.dot_dimension_numbers<[1], [0], [0], [1], [0, 0, 1, 1], [], []>} : vector<16x128xbf16>, vector<128x384xbf16>, vector<16x384xf32> -> vector<16x384xf32>
    %606 = vector.extract_strided_slice %603 {offsets = [0, 0], sizes = [16, 128], strides = [1, 1]} : vector<16x384xf32> to vector<16x128xf32>
    %607 = vector.extract_strided_slice %605 {offsets = [0, 0], sizes = [16, 128], strides = [1, 1]} : vector<16x384xf32> to vector<16x128xf32>
    %608 = arith.addf %606, %607 : vector<16x128xf32>
    %cst_187 = arith.constant 5.000000e-01 : f32
    %609 = vector.broadcast %cst_187 : f32 to vector<16x128xf32>
    %610 = arith.mulf %609, %608 : vector<16x128xf32>
    %611 = math.tanh %610 : vector<16x128xf32>
    %cst_188 = arith.constant 5.000000e-01 : f32
    %612 = vector.broadcast %cst_188 : f32 to vector<16x128xf32>
    %613 = arith.mulf %612, %611 : vector<16x128xf32>
    %cst_189 = arith.constant 5.000000e-01 : f32
    %614 = vector.broadcast %cst_189 : f32 to vector<16x128xf32>
    %615 = arith.addf %613, %614 : vector<16x128xf32>
    %616 = vector.extract_strided_slice %603 {offsets = [0, 128], sizes = [16, 128], strides = [1, 1]} : vector<16x384xf32> to vector<16x128xf32>
    %617 = vector.extract_strided_slice %605 {offsets = [0, 128], sizes = [16, 128], strides = [1, 1]} : vector<16x384xf32> to vector<16x128xf32>
    %618 = arith.addf %616, %617 : vector<16x128xf32>
    %cst_190 = arith.constant 5.000000e-01 : f32
    %619 = vector.broadcast %cst_190 : f32 to vector<16x128xf32>
    %620 = arith.mulf %619, %618 : vector<16x128xf32>
    %621 = math.tanh %620 : vector<16x128xf32>
    %cst_191 = arith.constant 5.000000e-01 : f32
    %622 = vector.broadcast %cst_191 : f32 to vector<16x128xf32>
    %623 = arith.mulf %622, %621 : vector<16x128xf32>
    %cst_192 = arith.constant 5.000000e-01 : f32
    %624 = vector.broadcast %cst_192 : f32 to vector<16x128xf32>
    %625 = arith.addf %623, %624 : vector<16x128xf32>
    %626 = vector.extract_strided_slice %603 {offsets = [0, 256], sizes = [16, 128], strides = [1, 1]} : vector<16x384xf32> to vector<16x128xf32>
    %627 = vector.extract_strided_slice %605 {offsets = [0, 256], sizes = [16, 128], strides = [1, 1]} : vector<16x384xf32> to vector<16x128xf32>
    %628 = vector.broadcast %370 : vector<1x128xf32> to vector<16x128xf32>
    %629 = arith.addf %627, %628 : vector<16x128xf32>
    %630 = arith.mulf %615, %629 : vector<16x128xf32>
    %631 = arith.addf %626, %630 : vector<16x128xf32>
    %632 = math.tanh %631 : vector<16x128xf32>
    %633 = arith.subf %599, %632 : vector<16x128xf32>
    %634 = arith.mulf %625, %633 : vector<16x128xf32>
    %635 = arith.addf %632, %634 : vector<16x128xf32>
    %636 = arith.cmpi slt, %c6_i32_183, %4 : i32
    %637 = arith.select %636, %635, %599 : vector<16x128xf32>
    %c7_i32_193 = arith.constant 7 : i32
    %c16_i32_194 = arith.constant 16 : i32
    %638 = arith.muli %c7_i32_193, %c16_i32_194 : i32
    %639 = tpu.assume_multiple %638, 8 : i32
    %640 = arith.index_cast %639 : i32 to index
    %c0_195 = arith.constant 0 : index
    %641 = vector.load %arg17[%640, %c0_195] : memref<128x384xf32, #tpu.memory_space<vmem>>, vector<16x384xf32>
    %642 = arith.truncf %637 : vector<16x128xf32> to vector<16x128xbf16>
    %cst_196 = arith.constant dense<0.000000e+00> : vector<16x384xf32>
    %643 = tpu.matmul %642, %369, %cst_196 {dimension_numbers = #tpu.dot_dimension_numbers<[1], [0], [0], [1], [0, 0, 1, 1], [], []>} : vector<16x128xbf16>, vector<128x384xbf16>, vector<16x384xf32> -> vector<16x384xf32>
    %644 = vector.extract_strided_slice %641 {offsets = [0, 0], sizes = [16, 128], strides = [1, 1]} : vector<16x384xf32> to vector<16x128xf32>
    %645 = vector.extract_strided_slice %643 {offsets = [0, 0], sizes = [16, 128], strides = [1, 1]} : vector<16x384xf32> to vector<16x128xf32>
    %646 = arith.addf %644, %645 : vector<16x128xf32>
    %cst_197 = arith.constant 5.000000e-01 : f32
    %647 = vector.broadcast %cst_197 : f32 to vector<16x128xf32>
    %648 = arith.mulf %647, %646 : vector<16x128xf32>
    %649 = math.tanh %648 : vector<16x128xf32>
    %cst_198 = arith.constant 5.000000e-01 : f32
    %650 = vector.broadcast %cst_198 : f32 to vector<16x128xf32>
    %651 = arith.mulf %650, %649 : vector<16x128xf32>
    %cst_199 = arith.constant 5.000000e-01 : f32
    %652 = vector.broadcast %cst_199 : f32 to vector<16x128xf32>
    %653 = arith.addf %651, %652 : vector<16x128xf32>
    %654 = vector.extract_strided_slice %641 {offsets = [0, 128], sizes = [16, 128], strides = [1, 1]} : vector<16x384xf32> to vector<16x128xf32>
    %655 = vector.extract_strided_slice %643 {offsets = [0, 128], sizes = [16, 128], strides = [1, 1]} : vector<16x384xf32> to vector<16x128xf32>
    %656 = arith.addf %654, %655 : vector<16x128xf32>
    %cst_200 = arith.constant 5.000000e-01 : f32
    %657 = vector.broadcast %cst_200 : f32 to vector<16x128xf32>
    %658 = arith.mulf %657, %656 : vector<16x128xf32>
    %659 = math.tanh %658 : vector<16x128xf32>
    %cst_201 = arith.constant 5.000000e-01 : f32
    %660 = vector.broadcast %cst_201 : f32 to vector<16x128xf32>
    %661 = arith.mulf %660, %659 : vector<16x128xf32>
    %cst_202 = arith.constant 5.000000e-01 : f32
    %662 = vector.broadcast %cst_202 : f32 to vector<16x128xf32>
    %663 = arith.addf %661, %662 : vector<16x128xf32>
    %664 = vector.extract_strided_slice %641 {offsets = [0, 256], sizes = [16, 128], strides = [1, 1]} : vector<16x384xf32> to vector<16x128xf32>
    %665 = vector.extract_strided_slice %643 {offsets = [0, 256], sizes = [16, 128], strides = [1, 1]} : vector<16x384xf32> to vector<16x128xf32>
    %666 = vector.broadcast %370 : vector<1x128xf32> to vector<16x128xf32>
    %667 = arith.addf %665, %666 : vector<16x128xf32>
    %668 = arith.mulf %653, %667 : vector<16x128xf32>
    %669 = arith.addf %664, %668 : vector<16x128xf32>
    %670 = math.tanh %669 : vector<16x128xf32>
    %671 = arith.subf %637, %670 : vector<16x128xf32>
    %672 = arith.mulf %663, %671 : vector<16x128xf32>
    %673 = arith.addf %670, %672 : vector<16x128xf32>
    %674 = arith.cmpi slt, %c7_i32_193, %4 : i32
    %675 = arith.select %674, %673, %637 : vector<16x128xf32>
    %c8_i32_203 = arith.constant 8 : i32
    %c0_204 = arith.constant 0 : index
    %c0_205 = arith.constant 0 : index
    %676 = vector.load %arg15[%c0_204, %c0_205] : memref<16x128xf32, #tpu.memory_space<vmem>>, vector<16x128xf32>
    tpu.vector_store %arg15[%c0_204, %c0_205], %675 {strides = array<i32>} : memref<16x128xf32, #tpu.memory_space<vmem>>, vector<16x128xf32>,
    %c0_206 = arith.constant 0 : index
    %c0_207 = arith.constant 0 : index
    %677 = vector.load %arg15[%c0_206, %c0_207] : memref<16x128xf32, #tpu.memory_space<vmem>>, vector<16x128xf32>
    %cst_208 = arith.constant 0.000000e+00 : f32
    %678 = vector.broadcast %cst_208 : f32 to vector<16x128xf32>
    %679 = arith.maximumf %677, %678 : vector<16x128xf32>
    %680 = arith.truncf %679 : vector<16x128xf32> to vector<16x128xbf16>
    %c0_209 = arith.constant 0 : index
    %c0_210 = arith.constant 0 : index
    %681 = vector.load %arg12[%c0_209, %c0_210] : memref<128x128xbf16, #tpu.memory_space<vmem>>, vector<128x128xbf16>
    %cst_211 = arith.constant dense<0.000000e+00> : vector<16x128xf32>
    %682 = tpu.matmul %680, %681, %cst_211 {dimension_numbers = #tpu.dot_dimension_numbers<[1], [0], [0], [1], [0, 0, 1, 1], [], []>} : vector<16x128xbf16>, vector<128x128xbf16>, vector<16x128xf32> -> vector<16x128xf32>
    %c0_212 = arith.constant 0 : index
    %c0_213 = arith.constant 0 : index
    %683 = vector.load %arg13[%c0_212, %c0_213] : memref<1x128xf32, #tpu.memory_space<vmem>>, vector<1x128xf32>
    %684 = vector.broadcast %683 : vector<1x128xf32> to vector<16x128xf32>
    %685 = arith.addf %682, %684 : vector<16x128xf32>
    %c0_214 = arith.constant 0 : index
    %c0_215 = arith.constant 0 : index
    %686 = vector.load %arg16[%c0_214, %c0_215] : memref<16x128xf32, #tpu.memory_space<vmem>>, vector<16x128xf32>
    tpu.vector_store %arg16[%c0_214, %c0_215], %685 {strides = array<i32>} : memref<16x128xf32, #tpu.memory_space<vmem>>, vector<16x128xf32>,
    return
  }
  func.func @transform_0(%arg0: i32) -> (i32, i32, i32) {
    %c0_i32 = arith.constant 0 : i32
    %c0_i32_0 = arith.constant 0 : i32
    %c0_i32_1 = arith.constant 0 : i32
    return %arg0, %c0_i32, %c0_i32_0 : i32, i32, i32
  }
  func.func @transform_1(%arg0: i32) -> (i32, i32) {
    %c0_i32 = arith.constant 0 : i32
    %c0_i32_0 = arith.constant 0 : i32
    %c0_i32_1 = arith.constant 0 : i32
    return %c0_i32, %c0_i32_0 : i32, i32
  }
  func.func @transform_2(%arg0: i32) -> (i32, i32) {
    %c0_i32 = arith.constant 0 : i32
    %c0_i32_0 = arith.constant 0 : i32
    %c0_i32_1 = arith.constant 0 : i32
    return %c0_i32, %c0_i32_0 : i32, i32
  }
  func.func @transform_3(%arg0: i32) -> (i32, i32) {
    %c0_i32 = arith.constant 0 : i32
    %c0_i32_0 = arith.constant 0 : i32
    %c0_i32_1 = arith.constant 0 : i32
    return %c0_i32, %c0_i32_0 : i32, i32
  }
  func.func @transform_4(%arg0: i32) -> (i32, i32) {
    %c0_i32 = arith.constant 0 : i32
    %c0_i32_0 = arith.constant 0 : i32
    %c0_i32_1 = arith.constant 0 : i32
    return %c0_i32, %c0_i32_0 : i32, i32
  }
  func.func @transform_5(%arg0: i32) -> (i32, i32) {
    %c0_i32 = arith.constant 0 : i32
    %c0_i32_0 = arith.constant 0 : i32
    %c0_i32_1 = arith.constant 0 : i32
    return %c0_i32, %c0_i32_0 : i32, i32
  }
  func.func @transform_6(%arg0: i32) -> (i32, i32) {
    %c0_i32 = arith.constant 0 : i32
    %c0_i32_0 = arith.constant 0 : i32
    %c0_i32_1 = arith.constant 0 : i32
    return %c0_i32, %c0_i32_0 : i32, i32
  }
  func.func @transform_7(%arg0: i32) -> (i32, i32) {
    %c0_i32 = arith.constant 0 : i32
    %c0_i32_0 = arith.constant 0 : i32
    %c0_i32_1 = arith.constant 0 : i32
    return %c0_i32, %c0_i32_0 : i32, i32
  }
  func.func @transform_8(%arg0: i32) -> (i32, i32) {
    %c0_i32 = arith.constant 0 : i32
    %c0_i32_0 = arith.constant 0 : i32
    %c0_i32_1 = arith.constant 0 : i32
    return %c0_i32, %c0_i32_0 : i32, i32
  }
  func.func @transform_9(%arg0: i32) -> (i32, i32) {
    %c0_i32 = arith.constant 0 : i32
    %c0_i32_0 = arith.constant 0 : i32
    %c0_i32_1 = arith.constant 0 : i32
    return %c0_i32, %c0_i32_0 : i32, i32
  }
  func.func @transform_10(%arg0: i32) -> (i32, i32) {
    %c0_i32 = arith.constant 0 : i32
    %c0_i32_0 = arith.constant 0 : i32
    %c0_i32_1 = arith.constant 0 : i32
    return %c0_i32, %c0_i32_0 : i32, i32
  }
  func.func @transform_11(%arg0: i32) -> (i32, i32) {
    %c0_i32 = arith.constant 0 : i32
    %c0_i32_0 = arith.constant 0 : i32
    %c0_i32_1 = arith.constant 0 : i32
    return %c0_i32, %c0_i32_0 : i32, i32
  }
  func.func @transform_12(%arg0: i32) -> (i32, i32) {
    %c0_i32 = arith.constant 0 : i32
    %c0_i32_0 = arith.constant 0 : i32
    %c0_i32_1 = arith.constant 0 : i32
    return %c0_i32, %c0_i32_0 : i32, i32
  }
  func.func @transform_13(%arg0: i32) -> (i32, i32) {
    %c0_i32 = arith.constant 0 : i32
    %c0_i32_0 = arith.constant 0 : i32
    %c0_i32_1 = arith.constant 0 : i32
    return %c0_i32, %c0_i32_0 : i32, i32
  }
  func.func @transform_14(%arg0: i32) -> (i32, i32) {
    %c0_i32 = arith.constant 0 : i32
    %c0_i32_0 = arith.constant 0 : i32
    %c0_i32_1 = arith.constant 0 : i32
    return %c0_i32, %c0_i32_0 : i32, i32
  }
  func.func @transform_15(%arg0: i32) -> (i32, i32) {
    %c0_i32 = arith.constant 0 : i32
    %c0_i32_0 = arith.constant 0 : i32
    %c0_i32_1 = arith.constant 0 : i32
    return %c0_i32, %c0_i32_0 : i32, i32
  }
}

</mosaic_0001>

<bundles_post_ra>
// kernel: gru_net_forward.1
= control target key start
LH: loop header
LB: loop body
LE: loop exit
PB: predicated region body
PF: predicated region fallthrough
CT: control target
= control target key end

     0   :  { %v6652_v1 = vmov 0   ;;  %v6654_v39 = vmov 0.0   ;;  %vm4818_vm0 = vmmov 0   ;;  %v112_v61 = vlaneseq  ;;  %s6633_s3 = inlined_call_operand.vmem [shape: bf16[128,384], index: 3, kind: input, shape index: {}]   ;;  %s6634_s0 = inlined_call_operand.vmem [shape: bf16[8,16,128], index: 0, kind: input, shape index: {}]   ;;  %s6635_s5 = inlined_call_operand.vmem [shape: bf16[128,384], index: 5, kind: input, shape index: {}]   ;;  %s6636_s1 = inlined_call_operand.vmem [shape: f32[16,128], index: 1, kind: input, shape index: {}]   ;;  %s6637_s7 = inlined_call_operand.vmem [shape: f32[1,384], index: 7, kind: input, shape index: {}]   ;;  %s6638_s9 = inlined_call_operand.vmem [shape: f32[1,128], index: 9, kind: input, shape index: {}]   ;;  %s6639_s4 = inlined_call_operand.vmem [shape: bf16[128,384], index: 4, kind: input, shape index: {}]   ;;  %s6640_s6 = inlined_call_operand.vmem [shape: bf16[128,384], index: 6, kind: input, shape index: {}]   ;;  %s6641_s13 = inlined_call_operand.vmem [shape: f32[16,128], index: 13, kind: output, shape index: {0}]   ;;  %s6642_s2 = inlined_call_operand.vmem [shape: f32[16,128], index: 2, kind: input, shape index: {}]   ;;  %s6643_s8 = inlined_call_operand.vmem [shape: f32[1,384], index: 8, kind: input, shape index: {}]   ;;  %s6644_s10 = inlined_call_operand.vmem [shape: f32[1,128], index: 10, kind: input, shape index: {}]   ;;  %s6645_s11 = inlined_call_operand.vmem [shape: bf16[128,128], index: 11, kind: input, shape index: {}]   ;;  %s6646_s14 = inlined_call_operand.vmem [shape: f32[16,128], index: 14, kind: output, shape index: {1}]   ;;  %s6647_s12 = inlined_call_operand.vmem [shape: f32[1,128], index: 12, kind: input, shape index: {}]   ;;  %s6648_s15 = inlined_call_operand.vmem [shape: f32[16,128], index: 15, kind: output, shape index: {2}]  }
   0x1   :  { %v4430_v0 = vld [vmem:[%s6633_s3 + $0x4] ss:$12 sps:$4 sm:$0xff]   ;;  %335 = vmatprep.mubr.bf16.mxu0 %v6652_v1  ;;  %v4432_v2 = vld [vmem:[%s6633_s3] ss:$12 sps:$4 sm:$0xff]   ;;  %v4433_v3 = vld [vmem:[%s6633_s3 + $0x1c] ss:$12 sps:$4 sm:$0xff]  }
   0x2   :  { %303 = vmatprep.subr.bf16.mxu0 %v4430_v0  ;;  %v4435_v4 = vld [vmem:[%s6633_s3 + $0x18] ss:$12 sps:$4 sm:$0xff]   ;;  %v4436_v5 = vld [vmem:[%s6633_s3 + $0x34] ss:$12 sps:$4 sm:$0xff]   ;;  %v4438_v6 = vld [vmem:[%s6633_s3 + $0x30] ss:$12 sps:$4 sm:$0xff]  }
   0x3   :  { %304 = vmatpush1.bf16.msra.mxu0 %v4432_v2  ;;  %v4439_v7 = vld [vmem:[%s6633_s3 + $0x4c] ss:$12 sps:$4 sm:$0xff]   ;;  %v4441_v8 = vld [vmem:[%s6633_s3 + $0x48] ss:$12 sps:$4 sm:$0xff]   ;;  %v4454_v9 = vld [vmem:[%s6634_s0] sm:$0xff]   ;;  %v5207_v62 = vshrl.u32 %v112_v61, 7 }
   0x4   :  { %305 = vmatprep.subr.bf16.mxu0 %v4433_v3  ;;  %v4442_v10 = vld [vmem:[%s6633_s3 + $0x64] ss:$12 sps:$4 sm:$0xff]   ;;  %3911 = vmatprep.mubr.bf16.mxu1 %v4454_v9  ;;  %v4444_v11 = vld [vmem:[%s6633_s3 + $0x60] ss:$12 sps:$4 sm:$0xff]   ;;  %v4445_v12 = vld [vmem:[%s6633_s3 + $0x7c] ss:$12 sps:$4 sm:$0xff]  }
   0x5   :  { %v4462_v13 = vld [vmem:[%s6633_s3 + $0x8] ss:$12 sps:$4 sm:$0xff]   ;;  %v4447_v14 = vld [vmem:[%s6633_s3 + $0x78] ss:$12 sps:$4 sm:$0xff]   ;;  %v4467_v16 = vld [vmem:[%s6633_s3 + $0x20] ss:$12 sps:$4 sm:$0xff]  }
   0x6   :  { %v4448_v15 = vld [vmem:[%s6633_s3 + $0x94] ss:$12 sps:$4 sm:$0xff]   ;;  %3895 = vmatprep.subr.bf16.mxu1 %v4462_v13  ;;  %v4468_v17 = vld [vmem:[%s6633_s3 + $0x38] ss:$12 sps:$4 sm:$0xff]   ;;  %v4450_v18 = vld [vmem:[%s6633_s3 + $0x90] ss:$12 sps:$4 sm:$0xff]  }
   0x7   :  { %306 = vmatpush1.bf16.msra.mxu0 %v4435_v4  ;;  %3896 = vmatpush3.bf16.msra.mxu1 %v4462_v13  ;;  %v4451_v19 = vld [vmem:[%s6633_s3 + $0xac] ss:$12 sps:$4 sm:$0xff]   ;;  %v4473_v20 = vld [vmem:[%s6633_s3 + $0x50] ss:$12 sps:$4 sm:$0xff]   ;;  %v4453_v21 = vld [vmem:[%s6633_s3 + $0xa8] ss:$12 sps:$4 sm:$0xff]  }
   0x8   :  { %307 = vmatprep.subr.bf16.mxu0 %v4436_v5  ;;  %3897 = vmatprep.subr.bf16.mxu1 %v4467_v16  ;;  %v4966_v22 = vld [vmem:[%s6635_s5 + $0x4] ss:$12 sps:$4 sm:$0xff]   ;;  %v4474_v23 = vld [vmem:[%s6633_s3 + $0x68] ss:$12 sps:$4 sm:$0xff]   ;;  %v4974_v24 = vld [vmem:[%s6635_s5] ss:$12 sps:$4 sm:$0xff]  }
   0x9   :  { %v4980_v25 = vld [vmem:[%s6635_s5 + $0x1c] ss:$12 sps:$4 sm:$0xff]   ;;  %v4479_v26 = vld [vmem:[%s6633_s3 + $0x80] ss:$12 sps:$4 sm:$0xff]   ;;  %v4990_v27 = vld [vmem:[%s6635_s5 + $0x18] ss:$12 sps:$4 sm:$0xff]  }
   0xa   :  { %v4996_v28 = vld [vmem:[%s6635_s5 + $0x34] ss:$12 sps:$4 sm:$0xff]   ;;  %v4480_v29 = vld [vmem:[%s6633_s3 + $0x98] ss:$12 sps:$4 sm:$0xff]   ;;  %v4458_v30 = vld [vmem:[%s6634_s0 + $0x8] sm:$0xff]   ;;  %6658 = vst [vmem:[#allocation4_spill] sm:$0xff] %v5207_v62 }
   0xb   :  { %308 = vmatpush1.bf16.msra.mxu0 %v4438_v6  ;;  %3898 = vmatpush3.bf16.msra.mxu1 %v4467_v16  ;;  %v5008_v31 = vld [vmem:[%s6635_s5 + $0x30] ss:$12 sps:$4 sm:$0xff]   ;;  %v5014_v32 = vld [vmem:[%s6635_s5 + $0x4c] ss:$12 sps:$4 sm:$0xff]   ;;  %v5024_v34 = vld [vmem:[%s6635_s5 + $0x48] ss:$12 sps:$4 sm:$0xff]  }
   0xc   :  { %309 = vmatprep.subr.bf16.mxu0 %v4439_v7  ;;  %3899 = vmatprep.subr.bf16.mxu1 %v4468_v17  ;;  %v4485_v33 = vld [vmem:[%s6633_s3 + $0xb0] ss:$12 sps:$4 sm:$0xff]   ;;  %v5039_v37 = vld [vmem:[%s6635_s5 + $0x60] ss:$12 sps:$4 sm:$0xff]   ;;  %v5051_v40 = vld [vmem:[%s6635_s5 + $0x8] ss:$12 sps:$4 sm:$0xff]  }
   0xd   :  { %v5030_v35 = vld [vmem:[%s6635_s5 + $0x64] ss:$12 sps:$4 sm:$0xff]   ;;  %v5045_v38 = vld [vmem:[%s6635_s5 + $0x7c] ss:$12 sps:$4 sm:$0xff]   ;;  %v5064_v42 = vld [vmem:[%s6635_s5 + $0x94] ss:$12 sps:$4 sm:$0xff]  }
   0xe   :  { %v4463_v36 = vld [vmem:[%s6634_s0 + $0x10] sm:$0xff]   ;;  %v5058_v41 = vld [vmem:[%s6635_s5 + $0x78] ss:$12 sps:$4 sm:$0xff]   ;;  %v5070_v43 = vld [vmem:[%s6635_s5 + $0x20] ss:$12 sps:$4 sm:$0xff]   ;;  %v6649_v63 = vsub.s32 2, %v5207_v62 }
   0xf   :  { %310 = vmatpush1.bf16.msra.mxu0 %v4441_v8  ;;  %3900 = vmatpush3.bf16.msra.mxu1 %v4468_v17  ;;  %v4469_v44 = vld [vmem:[%s6634_s0 + $0x18] sm:$0xff]   ;;  %v4475_v48 = vld [vmem:[%s6634_s0 + $0x20] sm:$0xff]   ;;  %v5103_v49 = vld [vmem:[%s6635_s5 + $0xa8] ss:$12 sps:$4 sm:$0xff]  }
  0x10   :  { %311 = vmatprep.subr.bf16.mxu0 %v4442_v10  ;;  %3901 = vmatprep.subr.bf16.mxu1 %v4473_v20  ;;  %v5080_v45 = vld [vmem:[%s6635_s5 + $0x90] ss:$12 sps:$4 sm:$0xff]   ;;  %v5086_v46 = vld [vmem:[%s6635_s5 + $0xac] ss:$12 sps:$4 sm:$0xff]   ;;  %v5119_v51 = vld [vmem:[%s6635_s5 + $0x68] ss:$12 sps:$4 sm:$0xff]  }
  0x11   :  { %v5092_v47 = vld [vmem:[%s6635_s5 + $0x38] ss:$12 sps:$4 sm:$0xff]   ;;  %v5110_v50 = vld [vmem:[%s6635_s5 + $0x50] ss:$12 sps:$4 sm:$0xff]   ;;  %v4481_v52 = vld [vmem:[%s6634_s0 + $0x28] sm:$0xff]  }
  0x12   :  { %v4486_v53 = vld [vmem:[%s6634_s0 + $0x30] sm:$0xff]   ;;  %v5133_v54 = vld [vmem:[%s6635_s5 + $0x80] ss:$12 sps:$4 sm:$0xff]   ;;  %v5140_v55 = vld [vmem:[%s6635_s5 + $0x98] ss:$12 sps:$4 sm:$0xff]  }
  0x13   :  { %312 = vmatpush1.bf16.msra.mxu0 %v4444_v11  ;;  %3902 = vmatpush3.bf16.msra.mxu1 %v4473_v20  ;;  %v4492_v56 = vld [vmem:[%s6634_s0 + $0x38] sm:$0xff]   ;;  %v5159_v58 = vld [vmem:[%s6636_s1] sm:$0xff]  ;;  %v5164_v59 = vld [vmem:[%s6636_s1 + $0x8] sm:$0xff] }
  0x14   :  { %313 = vmatprep.subr.bf16.mxu0 %v4445_v12  ;;  %3903 = vmatprep.subr.bf16.mxu1 %v4474_v23  ;;  %v5151_v57 = vld [vmem:[%s6635_s5 + $0xb0] ss:$12 sps:$4 sm:$0xff]   ;;  %v605_v60 = vpack.c.bf16 %v5164_v59, %v5159_v58  ;;  %v110_v0 = vld [vmem:[%s6637_s7] sm:$0x7] }
  0x15   :  { %v5215_v2 = vrot.slane %v110_v0, %v6649_v63 }
  0x17   :  { %314 = vmatpush1.bf16.msra.mxu0 %v4447_v14  ;;  %3904 = vmatpush3.bf16.msra.mxu1 %v4474_v23 }
  0x18   :  { %315 = vmatprep.subr.bf16.mxu0 %v4448_v15  ;;  %3905 = vmatprep.subr.bf16.mxu1 %v4479_v26 }
  0x1b   :  { %316 = vmatpush1.bf16.msra.mxu0 %v4450_v18  ;;  %3906 = vmatpush3.bf16.msra.mxu1 %v4479_v26 }
  0x1c   :  { %317 = vmatprep.subr.bf16.mxu0 %v4451_v19  ;;  %3907 = vmatprep.subr.bf16.mxu1 %v4480_v29 }
  0x1f   :  { %318 = vmatpush1.bf16.msra.mxu0 %v4453_v21  ;;  %3908 = vmatpush3.bf16.msra.mxu1 %v4480_v29 }
  0x20   :  { %734 = vmatprep.subr.bf16.mxu0 %v4966_v22  ;;  %3909 = vmatprep.subr.bf16.mxu1 %v4485_v33 }
  0x22   :  { %336 = vmatmul.mubr.bf16.vlgmr.msra.gmra.mrb[0].mxu0 %v4454_v9 }
  0x23   :  { %735 = vmatpush1.bf16.msra.mxu0 %v4974_v24  ;;  %345 = vmatprep.mubr.bf16.mxu0 %v6652_v1 }
  0x24   :  { %736 = vmatprep.subr.bf16.mxu0 %v4980_v25  ;;  %3910 = vmatpush3.bf16.msra.mxu1 %v4485_v33 }
  0x25   :  { %3927 = vmatprep.subr.bf16.mxu1 %v6654_v39 }
  0x27   :  { %737 = vmatpush1.bf16.msra.mxu0 %v4990_v27  ;;  %3912 = vmatmul.mubr.bf16.vlgmr.msra.gmra.mrb[0].mxu1 %v4458_v30 }
  0x28   :  { %738 = vmatprep.subr.bf16.mxu0 %v4996_v28  ;;  %3928 = vmatpush3.bf16.msra.mxu1 %v5051_v40 }
  0x29   :  { %3915 = vmatprep.mubr.bf16.mxu1 %v4463_v36  ;;  %3929 = vmatprep.subr.bf16.mxu1 %v6654_v39 }
  0x2a   :  { %346 = vmatmul.mubr.bf16.gmra.mrb[4].mxu0 %v4458_v30 }
  0x2b   :  { %355 = vmatprep.mubr.bf16.mxu0 %v6652_v1  ;;  %739 = vmatpush1.bf16.msra.mxu0 %v5008_v31 }
  0x2c   :  { %740 = vmatprep.subr.bf16.mxu0 %v5014_v32  ;;  %3930 = vmatpush3.bf16.msra.mxu1 %v5070_v43 }
  0x2d   :  { %3931 = vmatprep.subr.bf16.mxu1 %v6654_v39 }
  0x2f   :  { %741 = vmatpush1.bf16.msra.mxu0 %v5024_v34  ;;  %3916 = vmatmul.mubr.bf16.gmra.mrb[4].mxu1 %v4469_v44 }
  0x30   :  { %742 = vmatprep.subr.bf16.mxu0 %v5030_v35  ;;  %3932 = vmatpush3.bf16.msra.mxu1 %v5092_v47 }
  0x31   :  { %3919 = vmatprep.mubr.bf16.mxu1 %v4475_v48  ;;  %3933 = vmatprep.subr.bf16.mxu1 %v6654_v39 }
  0x32   :  { %356 = vmatmul.mubr.bf16.gmra.mrb[8].mxu0 %v4463_v36 }
  0x33   :  { %365 = vmatprep.mubr.bf16.mxu0 %v6652_v1  ;;  %743 = vmatpush1.bf16.msra.mxu0 %v5039_v37 }
  0x34   :  { %744 = vmatprep.subr.bf16.mxu0 %v5045_v38  ;;  %3934 = vmatpush3.bf16.msra.mxu1 %v5110_v50 }
  0x35   :  { %3935 = vmatprep.subr.bf16.mxu1 %v6654_v39 }
  0x37   :  { %745 = vmatpush1.bf16.msra.mxu0 %v5058_v41  ;;  %3920 = vmatmul.mubr.bf16.gmra.mrb[8].mxu1 %v4481_v52 }
  0x38   :  { %746 = vmatprep.subr.bf16.mxu0 %v5064_v42  ;;  %3936 = vmatpush3.bf16.msra.mxu1 %v5119_v51 }
  0x39   :  { %3923 = vmatprep.mubr.bf16.mxu1 %v4486_v53  ;;  %3937 = vmatprep.subr.bf16.mxu1 %v6654_v39 }
  0x3a   :  { %366 = vmatmul.mubr.bf16.gmra.mrb[12].mxu0 %v4469_v44 }
  0x3b   :  { %375 = vmatprep.mubr.bf16.mxu0 %v6652_v1  ;;  %747 = vmatpush1.bf16.msra.mxu0 %v5080_v45 }
  0x3c   :  { %748 = vmatprep.subr.bf16.mxu0 %v5086_v46  ;;  %3938 = vmatpush3.bf16.msra.mxu1 %v5133_v54 }
  0x3d   :  { %3939 = vmatprep.subr.bf16.mxu1 %v6654_v39 }
  0x3f   :  { %749 = vmatpush1.bf16.msra.mxu0 %v5103_v49  ;;  %3924 = vmatmul.mubr.bf16.gmra.mrb[12].mxu1 %v4492_v56 }
  0x40   :  { %876 = vmatprep.subr.bf16.mxu0 %v4966_v22  ;;  %3940 = vmatpush3.bf16.msra.mxu1 %v5140_v55 }
  0x41   :  { %3943 = vmatprep.mubr.msk.bf16.mxu1 %vm4818_vm0, %v6654_v39  ;;  %3941 = vmatprep.subr.bf16.mxu1 %v6654_v39 }
  0x42   :  { %376 = vmatmul.mubr.bf16.gmra.mrb[16].mxu0 %v4475_v48 }
  0x43   :  { %385 = vmatprep.mubr.bf16.mxu0 %v6652_v1 }
  0x44   :  { %3942 = vmatpush3.bf16.msra.mxu1 %v5151_v57 }
  0x45   :  { %3947 = vmatprep.subr.bf16.mxu1 %v6654_v39 }
  0x47   :  { %3944 = vmatmul.mubr.bf16.vlgmr.msra.gmra.mrb[16].mxu1 %v605_v60 }
  0x48   :  { %3948 = vmatpush3.bf16.msra.mxu1 %v5051_v40  ;;  %3963 = vmatprep.mubr.msk.bf16.mxu1 %vm4818_vm0, %v6654_v39 }
  0x49   :  { %3949 = vmatprep.subr.bf16.mxu1 %v6654_v39 }
  0x4a   :  { %386 = vmatmul.mubr.bf16.gmra.mrb[20].mxu0 %v4481_v52 }
  0x4b   :  { %395 = vmatprep.mubr.bf16.mxu0 %v6652_v1 }
  0x4c   :  { %3950 = vmatpush3.bf16.msra.mxu1 %v5070_v43 }
  0x4d   :  { %3951 = vmatprep.subr.bf16.mxu1 %v6654_v39 }
  0x50   :  { %3952 = vmatpush3.bf16.msra.mxu1 %v5092_v47 }
  0x51   :  { %3953 = vmatprep.subr.bf16.mxu1 %v6654_v39 }
  0x52   :  { %396 = vmatmul.mubr.bf16.gmra.mrb[24].mxu0 %v4486_v53 }
  0x53   :  { %405 = vmatprep.mubr.bf16.mxu0 %v6652_v1 }
  0x54   :  { %3954 = vmatpush3.bf16.msra.mxu1 %v5110_v50 }
  0x55   :  { %3955 = vmatprep.subr.bf16.mxu1 %v6654_v39 }
  0x58   :  { %3956 = vmatpush3.bf16.msra.mxu1 %v5119_v51 }
  0x59   :  { %3957 = vmatprep.subr.bf16.mxu1 %v6654_v39 }
  0x5a   :  { %406 = vmatmul.mubr.bf16.gmra.mrb[28].mxu0 %v4492_v56 }
  0x5b   :  { %766 = vmatprep.mubr.bf16.mxu0 %v6652_v1 }
  0x5c   :  { %3958 = vmatpush3.bf16.msra.mxu1 %v5133_v54 }
  0x5d   :  { %3959 = vmatprep.subr.bf16.mxu1 %v6654_v39 }
  0x60   :  { %3960 = vmatpush3.bf16.msra.mxu1 %v5140_v55 }
  0x61   :  { %3961 = vmatprep.subr.bf16.mxu1 %v6654_v39 }
  0x62   :  { %767 = vmatmul.mubr.bf16.vlgmr.msra.gmra.mrb[0].mxu0 %v605_v60 }
  0x63   :  { %877 = vmatpush1.bf16.msra.mxu0 %v4974_v24  ;;  %908 = vmatprep.mubr.bf16.mxu0 %v6652_v1 }
  0x64   :  { %878 = vmatprep.subr.bf16.mxu0 %v4980_v25  ;;  %3962 = vmatpush3.bf16.msra.mxu1 %v5151_v57 }
  0x65   :  { %3967 = vmatprep.subr.bf16.mxu1 %v6654_v39 }
  0x67   :  { %879 = vmatpush1.bf16.msra.mxu0 %v4990_v27 }
  0x68   :  { %880 = vmatprep.subr.bf16.mxu0 %v4996_v28 }
  0x6b   :  { %881 = vmatpush1.bf16.msra.mxu0 %v5008_v31 }
  0x6c   :  { %882 = vmatprep.subr.bf16.mxu0 %v5014_v32 }
  0x6f   :  { %883 = vmatpush1.bf16.msra.mxu0 %v5024_v34 }
  0x70   :  { %884 = vmatprep.subr.bf16.mxu0 %v5030_v35 }
  0x73   :  { %885 = vmatpush1.bf16.msra.mxu0 %v5039_v37 }
  0x74   :  { %886 = vmatprep.subr.bf16.mxu0 %v5045_v38 }
  0x77   :  { %887 = vmatpush1.bf16.msra.mxu0 %v5058_v41 }
  0x78   :  { %888 = vmatprep.subr.bf16.mxu0 %v5064_v42 }
  0x7b   :  { %889 = vmatpush1.bf16.msra.mxu0 %v5080_v45 }
  0x7c   :  { %890 = vmatprep.subr.bf16.mxu0 %v5086_v46 }
  0x7f   :  { %891 = vmatpush1.bf16.msra.mxu0 %v5103_v49 }
  0x80   :  { %1013 = vmatprep.subr.bf16.mxu0 %v4966_v22 }
  0xfa   :  { %v3913_v3 = vpop.f32.mrb[0].mxu1 }
  0xfb   :  { %v5218_v4 = vadd.f32 %v3913_v3, %v5215_v2  ;;  %v450_v5 = vpop.f32.mrb[1].mxu1 }
  0xfc   :  { %v3914_v6 = vpop.f32.mrb[2].mxu1 }
  0xfd   :  { %v5221_v7 = vadd.f32 %v3914_v6, %v5215_v2  ;;  %v453_v8 = vpop.f32.mrb[3].mxu1 }
  0xfe   :  { %v454_v39 = vadd.f32 %v453_v8, %v5215_v2 }
 0x102   :  { %v3917_v9 = vpop.f32.mrb[4].mxu1 }
 0x103   :  { %v5224_v10 = vadd.f32 %v3917_v9, %v5215_v2  ;;  %v466_v11 = vpop.f32.mrb[5].mxu1  ;;  %v6650_v9 = vsub.s32 0, %v5207_v62 }
 0x104   :  { %v5227_v12 = vadd.f32 %v466_v11, %v5215_v2  ;;  %v3918_v13 = vpop.f32.mrb[6].mxu1 }
 0x105   :  { %v5230_v14 = vadd.f32 %v3918_v13, %v5215_v2  ;;  %v469_v15 = vpop.f32.mrb[7].mxu1  ;;  %v5262_v11 = vrot.slane %v110_v0, %v6650_v9 }
 0x106   :  { %v5233_v16 = vadd.f32 %v469_v15, %v5215_v2 }
 0x10a   :  { %v3921_v17 = vpop.f32.mrb[8].mxu1 }
 0x10b   :  { %v5236_v18 = vadd.f32 %v3921_v17, %v5215_v2  ;;  %v482_v19 = vpop.f32.mrb[9].mxu1 }
 0x10c   :  { %v5239_v20 = vadd.f32 %v482_v19, %v5215_v2  ;;  %v3922_v21 = vpop.f32.mrb[10].mxu1  ;;  %v6651_v19 = vsub.s32 1, %v5207_v62 }
 0x10d   :  { %v5242_v23 = vadd.f32 %v3922_v21, %v5215_v2  ;;  %v485_v26 = vpop.f32.mrb[11].mxu1 }
 0x10e   :  { %v5245_v29 = vadd.f32 %v485_v26, %v5215_v2 }
 0x112   :  { %v3925_v30 = vpop.f32.mrb[12].mxu1 }
 0x113   :  { %v5248_v33 = vadd.f32 %v3925_v30, %v5215_v2  ;;  %v498_v36 = vpop.f32.mrb[13].mxu1 }
 0x114   :  { %v5251_v44 = vadd.f32 %v498_v36, %v5215_v2  ;;  %v3926_v48 = vpop.f32.mrb[14].mxu1 }
 0x115   :  { %6659 = vst [vmem:[#allocation5_spill] sm:$0xff] %v5248_v33  ;;  %v5254_v52 = vadd.f32 %v3926_v48, %v5215_v2  ;;  %v501_v53 = vpop.f32.mrb[15].mxu1 }
 0x116   :  { %v5257_v56 = vadd.f32 %v501_v53, %v5215_v2  ;;  %v5269_v53 = vrot.slane %v110_v0, %v6651_v19 }
 0x117   :  { %6660 = vst [vmem:[#allocation6_spill] sm:$0xff] %v5254_v52 }
 0x11a   :  { %v811_v60 = vpop.f32.mrb[16].mxu1 }
 0x11b   :  { %v3945_v61 = vpop.f32.mrb[17].mxu1 }
 0x11c   :  { %v814_v3 = vpop.f32.mrb[18].mxu1 }
 0x11d   :  { %v3946_v6 = vpop.f32.mrb[19].mxu1 }
 0x135   :  { %v768_v13 = vpop.f32.mrb[0].mxu0 }
 0x136   :  { %v4299_v15 = vadd.f32 %v768_v13, %v5262_v11  ;;  %v770_v17 = vpop.f32.mrb[1].mxu0  ;;  %v5276_v13 = vld [vmem:[%s6638_s9] ss:$0 sm:$0xff] }
 0x137   :  { %v772_v21 = vpop.f32.mrb[2].mxu0  ;;  %v4300_v61 = vadd.f32 %v770_v17, %v5269_v53  ;;  %v845_v1 = vadd.f32 %v5276_v13, %v814_v3 }
 0x138   :  { %v820_v26 = vmul.f32 0.5, %v4299_v15  ;;  %v4301_v30 = vadd.f32 %v772_v21, %v5262_v11  ;;  %v774_v36 = vpop.f32.mrb[3].mxu0 }
 0x139   :  { %v4302_v6 = vadd.f32 %v774_v36, %v5269_v53  ;;  %v830_v15 = vmul.f32 0.5, %v4300_v61 }
 0x13a   :  { %4574 = vtanh.f32 %v820_v26  ;;  %v821_v48 = vmul.f32 0.5, %v4301_v30  ;;  %v844_v26 = vadd.f32 %v5276_v13, %v811_v60 }
 0x13b   :  { %v831_v9 = vmul.f32 0.5, %v4302_v6 }
 0x13c   :  { %4576 = vtanh.f32 %v821_v48  ;;  %v451_v48 = vadd.f32 %v450_v5, %v5215_v2 }
 0x13d   :  { %4578 = vtanh.f32 %v830_v15 }
 0x13e   :  { %4580 = vtanh.f32 %v831_v9 }
 0x144   :  { %v4575_v63 = vpop.eup %4574 }
 0x145   :  { %v824_v21 = vmul.f32 0.5, %v4575_v63 }
 0x146   :  { %v4577_v30 = vpop.eup %4576 }
 0x147   :  { %v825_v0 = vmul.f32 0.5, %v4577_v30  ;;  %v826_v19 = vadd.f32 0.5, %v824_v21  ;;  %v4579_v6 = vpop.eup %4578 }
 0x148   :  { %v4581_v60 = vpop.eup %4580  ;;  %v834_v52 = vmul.f32 0.5, %v4579_v6 }
 0x149   :  { %v846_v17 = vmul.f32 %v844_v26, %v826_v19  ;;  %v827_v36 = vadd.f32 0.5, %v825_v0  ;;  %v835_v15 = vmul.f32 0.5, %v4581_v60 }
 0x14a   :  { %v836_v21 = vadd.f32 0.5, %v834_v52 }
 0x14b   :  { %v848_v62 = vadd.f32 %v846_v17, %v451_v48  ;;  %v847_v61 = vmul.f32 %v845_v1, %v827_v36  ;;  %v837_v19 = vadd.f32 0.5, %v835_v15 }
 0x14d   :  { %4582 = vtanh.f32 %v848_v62  ;;  %v849_v63 = vadd.f32 %v847_v61, %v454_v39 }
 0x14f   :  { %4584 = vtanh.f32 %v849_v63 }
 0x157   :  { %v4583_v30 = vpop.eup %4582 }
 0x158   :  { %v852_v5 = vsub.f32 %v5159_v58, %v4583_v30  ;;  %v6661_v58 = vmov 0.0  }
 0x159   :  { %v4585_v9 = vpop.eup %4584 }
 0x15a   :  { %v853_v26 = vsub.f32 %v5164_v59, %v4585_v9  ;;  %v854_v3 = vmul.f32 %v852_v5, %v836_v21  ;;  %v6662_v59 = vmov 0  }
 0x15c   :  { %v855_v0 = vmul.f32 %v853_v26, %v837_v19  ;;  %v5284_v2 = vadd.f32 %v4583_v30, %v854_v3 }
 0x15e   :  { %v5286_v1 = vadd.f32 %v4585_v9, %v855_v0 }
 0x160   :  { %v5290_v39 = vpack.c.bf16 %v5286_v1, %v5284_v2 }
 0x162   :  { %909 = vmatmul.mubr.bf16.vlgmr.msra.gmra.mrb[4].mxu0 %v5290_v39  ;;  %3964 = vmatmul.mubr.bf16.vlgmr.msra.gmra.mrb[20].mxu1 %v5290_v39 }
 0x163   :  { %1014 = vmatpush1.bf16.msra.mxu0 %v4974_v24  ;;  %3968 = vmatpush3.bf16.msra.mxu1 %v5051_v40 }
 0x164   :  { %1015 = vmatprep.subr.bf16.mxu0 %v4980_v25  ;;  %3969 = vmatprep.subr.bf16.mxu1 %v6661_v58 }
 0x165   :  { %1045 = vmatprep.mubr.bf16.mxu0 %v6662_v59  ;;  %3983 = vmatprep.mubr.msk.bf16.mxu1 %vm4818_vm0, %v6661_v58 }
 0x167   :  { %1016 = vmatpush1.bf16.msra.mxu0 %v4990_v27  ;;  %3970 = vmatpush3.bf16.msra.mxu1 %v5070_v43 }
 0x168   :  { %1017 = vmatprep.subr.bf16.mxu0 %v4996_v28  ;;  %3971 = vmatprep.subr.bf16.mxu1 %v6661_v58 }
 0x16b   :  { %1018 = vmatpush1.bf16.msra.mxu0 %v5008_v31  ;;  %3972 = vmatpush3.bf16.msra.mxu1 %v5092_v47 }
 0x16c   :  { %1019 = vmatprep.subr.bf16.mxu0 %v5014_v32  ;;  %3973 = vmatprep.subr.bf16.mxu1 %v6661_v58 }
 0x16f   :  { %1020 = vmatpush1.bf16.msra.mxu0 %v5024_v34  ;;  %3974 = vmatpush3.bf16.msra.mxu1 %v5110_v50 }
 0x170   :  { %1021 = vmatprep.subr.bf16.mxu0 %v5030_v35  ;;  %3975 = vmatprep.subr.bf16.mxu1 %v6661_v58 }
 0x173   :  { %1022 = vmatpush1.bf16.msra.mxu0 %v5039_v37  ;;  %3976 = vmatpush3.bf16.msra.mxu1 %v5119_v51 }
 0x174   :  { %1023 = vmatprep.subr.bf16.mxu0 %v5045_v38  ;;  %3977 = vmatprep.subr.bf16.mxu1 %v6661_v58 }
 0x177   :  { %1024 = vmatpush1.bf16.msra.mxu0 %v5058_v41  ;;  %3978 = vmatpush3.bf16.msra.mxu1 %v5133_v54 }
 0x178   :  { %1025 = vmatprep.subr.bf16.mxu0 %v5064_v42  ;;  %3979 = vmatprep.subr.bf16.mxu1 %v6661_v58 }
 0x17b   :  { %1026 = vmatpush1.bf16.msra.mxu0 %v5080_v45  ;;  %3980 = vmatpush3.bf16.msra.mxu1 %v5140_v55 }
 0x17c   :  { %1027 = vmatprep.subr.bf16.mxu0 %v5086_v46  ;;  %3981 = vmatprep.subr.bf16.mxu1 %v6661_v58 }
 0x17f   :  { %1028 = vmatpush1.bf16.msra.mxu0 %v5103_v49  ;;  %3982 = vmatpush3.bf16.msra.mxu1 %v5151_v57 }
 0x180   :  { %1150 = vmatprep.subr.bf16.mxu0 %v4966_v22  ;;  %3987 = vmatprep.subr.bf16.mxu1 %v6661_v58 }
 0x235   :  { %v910_v62 = vpop.f32.mrb[4].mxu0  ;;  %v953_v8 = vpop.f32.mrb[20].mxu1 }
 0x236   :  { %v4303_v52 = vadd.f32 %v910_v62, %v5262_v11  ;;  %v912_v48 = vpop.f32.mrb[5].mxu0  ;;  %v3965_v17 = vpop.f32.mrb[21].mxu1 }
 0x237   :  { %v914_v36 = vpop.f32.mrb[6].mxu0  ;;  %v956_v61 = vpop.f32.mrb[22].mxu1  ;;  %v4304_v21 = vadd.f32 %v912_v48, %v5269_v53  ;;  %v980_v17 = vadd.f32 %v5276_v13, %v953_v8 }
 0x238   :  { %v962_v63 = vmul.f32 0.5, %v4303_v52  ;;  %v4305_v6 = vadd.f32 %v914_v36, %v5262_v11  ;;  %v916_v60 = vpop.f32.mrb[7].mxu0  ;;  %v3966_v15 = vpop.f32.mrb[23].mxu1 }
 0x239   :  { %v4306_v5 = vadd.f32 %v916_v60, %v5269_v53  ;;  %v972_v9 = vmul.f32 0.5, %v4304_v21 }
 0x23a   :  { %4586 = vtanh.f32 %v962_v63  ;;  %v963_v30 = vmul.f32 0.5, %v4305_v6  ;;  %v981_v63 = vadd.f32 %v5276_v13, %v956_v61 }
 0x23b   :  { %v973_v3 = vmul.f32 0.5, %v4306_v5 }
 0x23c   :  { %4588 = vtanh.f32 %v963_v30 }
 0x23d   :  { %4590 = vtanh.f32 %v972_v9 }
 0x23e   :  { %4592 = vtanh.f32 %v973_v3 }
 0x244   :  { %v4587_v19 = vpop.eup %4586 }
 0x245   :  { %v966_v26 = vmul.f32 0.5, %v4587_v19 }
 0x246   :  { %v4589_v0 = vpop.eup %4588 }
 0x247   :  { %v968_v62 = vadd.f32 0.5, %v966_v26  ;;  %v967_v52 = vmul.f32 0.5, %v4589_v0  ;;  %v4591_v15 = vpop.eup %4590 }
 0x248   :  { %v4593_v30 = vpop.eup %4592  ;;  %v976_v21 = vmul.f32 0.5, %v4591_v15 }
 0x249   :  { %v982_v36 = vmul.f32 %v980_v17, %v968_v62  ;;  %v969_v33 = vadd.f32 0.5, %v967_v52  ;;  %v977_v5 = vmul.f32 0.5, %v4593_v30 }
 0x24a   :  { %v978_v8 = vadd.f32 0.5, %v976_v21 }
 0x24b   :  { %v984_v6 = vadd.f32 %v982_v36, %v5218_v4  ;;  %v983_v48 = vmul.f32 %v981_v63, %v969_v33  ;;  %v979_v62 = vadd.f32 0.5, %v977_v5 }
 0x24d   :  { %4594 = vtanh.f32 %v984_v6  ;;  %v985_v60 = vadd.f32 %v983_v48, %v5221_v7 }
 0x24f   :  { %4596 = vtanh.f32 %v985_v60 }
 0x257   :  { %v4595_v19 = vpop.eup %4594 }
 0x258   :  { %v988_v9 = vsub.f32 %v5284_v2, %v4595_v19 }
 0x259   :  { %v4597_v26 = vpop.eup %4596 }
 0x25a   :  { %v990_v0 = vmul.f32 %v988_v9, %v978_v8  ;;  %v989_v61 = vsub.f32 %v5286_v1, %v4597_v26 }
 0x25c   :  { %v5339_v3 = vadd.f32 %v4595_v19, %v990_v0  ;;  %v991_v4 = vmul.f32 %v989_v61, %v979_v62 }
 0x25e   :  { %v5341_v33 = vadd.f32 %v4597_v26, %v991_v4 }
 0x260   :  { %v5345_v7 = vpack.c.bf16 %v5341_v33, %v5339_v3 }
 0x262   :  { %1046 = vmatmul.mubr.bf16.vlgmr.msra.gmra.mrb[8].mxu0 %v5345_v7  ;;  %3984 = vmatmul.mubr.bf16.vlgmr.msra.gmra.mrb[24].mxu1 %v5345_v7 }
 0x263   :  { %1151 = vmatpush1.bf16.msra.mxu0 %v4974_v24  ;;  %3988 = vmatpush3.bf16.msra.mxu1 %v5051_v40 }
 0x264   :  { %1152 = vmatprep.subr.bf16.mxu0 %v4980_v25  ;;  %3989 = vmatprep.subr.bf16.mxu1 %v6661_v58 }
 0x265   :  { %1182 = vmatprep.mubr.bf16.mxu0 %v6662_v59  ;;  %4003 = vmatprep.mubr.msk.bf16.mxu1 %vm4818_vm0, %v6661_v58 }
 0x267   :  { %1153 = vmatpush1.bf16.msra.mxu0 %v4990_v27  ;;  %3990 = vmatpush3.bf16.msra.mxu1 %v5070_v43 }
 0x268   :  { %1154 = vmatprep.subr.bf16.mxu0 %v4996_v28  ;;  %3991 = vmatprep.subr.bf16.mxu1 %v6661_v58 }
 0x26b   :  { %1155 = vmatpush1.bf16.msra.mxu0 %v5008_v31  ;;  %3992 = vmatpush3.bf16.msra.mxu1 %v5092_v47 }
 0x26c   :  { %1156 = vmatprep.subr.bf16.mxu0 %v5014_v32  ;;  %3993 = vmatprep.subr.bf16.mxu1 %v6661_v58 }
 0x26f   :  { %1157 = vmatpush1.bf16.msra.mxu0 %v5024_v34  ;;  %3994 = vmatpush3.bf16.msra.mxu1 %v5110_v50 }
 0x270   :  { %1158 = vmatprep.subr.bf16.mxu0 %v5030_v35  ;;  %3995 = vmatprep.subr.bf16.mxu1 %v6661_v58 }
 0x273   :  { %1159 = vmatpush1.bf16.msra.mxu0 %v5039_v37  ;;  %3996 = vmatpush3.bf16.msra.mxu1 %v5119_v51 }
 0x274   :  { %1160 = vmatprep.subr.bf16.mxu0 %v5045_v38  ;;  %3997 = vmatprep.subr.bf16.mxu1 %v6661_v58 }
 0x277   :  { %1161 = vmatpush1.bf16.msra.mxu0 %v5058_v41  ;;  %3998 = vmatpush3.bf16.msra.mxu1 %v5133_v54 }
 0x278   :  { %1162 = vmatprep.subr.bf16.mxu0 %v5064_v42  ;;  %3999 = vmatprep.subr.bf16.mxu1 %v6661_v58 }
 0x27b   :  { %1163 = vmatpush1.bf16.msra.mxu0 %v5080_v45  ;;  %4000 = vmatpush3.bf16.msra.mxu1 %v5140_v55 }
 0x27c   :  { %1164 = vmatprep.subr.bf16.mxu0 %v5086_v46  ;;  %4001 = vmatprep.subr.bf16.mxu1 %v6661_v58 }
 0x27f   :  { %1165 = vmatpush1.bf16.msra.mxu0 %v5103_v49  ;;  %4002 = vmatpush3.bf16.msra.mxu1 %v5151_v57 }
 0x280   :  { %1287 = vmatprep.subr.bf16.mxu0 %v4966_v22  ;;  %4007 = vmatprep.subr.bf16.mxu1 %v6661_v58 }
 0x335   :  { %v1047_v2 = vpop.f32.mrb[8].mxu0  ;;  %v1090_v1 = vpop.f32.mrb[24].mxu1 }
 0x336   :  { %v4307_v17 = vadd.f32 %v1047_v2, %v5262_v11  ;;  %v1049_v52 = vpop.f32.mrb[9].mxu0  ;;  %v3985_v36 = vpop.f32.mrb[25].mxu1  ;;  %v1117_v4 = vadd.f32 %v5276_v13, %v1090_v1 }
 0x337   :  { %v1051_v63 = vpop.f32.mrb[10].mxu0  ;;  %v1093_v6 = vpop.f32.mrb[26].mxu1  ;;  %v4308_v5 = vadd.f32 %v1049_v52, %v5269_v53 }
 0x338   :  { %v1099_v48 = vmul.f32 0.5, %v4307_v17  ;;  %v4309_v60 = vadd.f32 %v1051_v63, %v5262_v11  ;;  %v1053_v15 = vpop.f32.mrb[11].mxu0  ;;  %v3986_v30 = vpop.f32.mrb[27].mxu1  ;;  %v1118_v63 = vadd.f32 %v5276_v13, %v1093_v6 }
 0x339   :  { %v4310_v19 = vadd.f32 %v1053_v15, %v5269_v53  ;;  %v1109_v8 = vmul.f32 0.5, %v4308_v5 }
 0x33a   :  { %4598 = vtanh.f32 %v1099_v48  ;;  %v1100_v21 = vmul.f32 0.5, %v4309_v60 }
 0x33b   :  { %v1110_v0 = vmul.f32 0.5, %v4310_v19 }
 0x33c   :  { %4600 = vtanh.f32 %v1100_v21 }
 0x33d   :  { %4602 = vtanh.f32 %v1109_v8 }
 0x33e   :  { %4604 = vtanh.f32 %v1110_v0 }
 0x344   :  { %v4599_v9 = vpop.eup %4598 }
 0x345   :  { %v1103_v26 = vmul.f32 0.5, %v4599_v9 }
 0x346   :  { %v4601_v62 = vpop.eup %4600 }
 0x347   :  { %v1105_v61 = vadd.f32 0.5, %v1103_v26  ;;  %v1104_v2 = vmul.f32 0.5, %v4601_v62  ;;  %v4603_v15 = vpop.eup %4602 }
 0x348   :  { %v4605_v30 = vpop.eup %4604  ;;  %v1113_v21 = vmul.f32 0.5, %v4603_v15 }
 0x349   :  { %v1119_v17 = vmul.f32 %v1117_v4, %v1105_v61  ;;  %v1106_v36 = vadd.f32 0.5, %v1104_v2  ;;  %v1114_v5 = vmul.f32 0.5, %v4605_v30 }
 0x34a   :  { %v1115_v1 = vadd.f32 0.5, %v1113_v21 }
 0x34b   :  { %v1121_v48 = vadd.f32 %v1119_v17, %v5227_v12  ;;  %v1120_v52 = vmul.f32 %v1118_v63, %v1106_v36  ;;  %v1116_v62 = vadd.f32 0.5, %v1114_v5 }
 0x34d   :  { %4606 = vtanh.f32 %v1121_v48  ;;  %v1122_v60 = vadd.f32 %v1120_v52, %v5233_v16 }
 0x34f   :  { %4608 = vtanh.f32 %v1122_v60 }
 0x357   :  { %v4607_v19 = vpop.eup %4606 }
 0x358   :  { %v1125_v8 = vsub.f32 %v5339_v3, %v4607_v19 }
 0x359   :  { %v4609_v9 = vpop.eup %4608 }
 0x35a   :  { %v1127_v26 = vmul.f32 %v1125_v8, %v1115_v1  ;;  %v1126_v6 = vsub.f32 %v5341_v33, %v4609_v9 }
 0x35c   :  { %v5394_v0 = vadd.f32 %v4607_v19, %v1127_v26  ;;  %v1128_v12 = vmul.f32 %v1126_v6, %v1116_v62 }
 0x35e   :  { %v5396_v61 = vadd.f32 %v4609_v9, %v1128_v12 }
 0x360   :  { %v5400_v16 = vpack.c.bf16 %v5396_v61, %v5394_v0 }
 0x362   :  { %1183 = vmatmul.mubr.bf16.vlgmr.msra.gmra.mrb[12].mxu0 %v5400_v16  ;;  %4004 = vmatmul.mubr.bf16.vlgmr.msra.gmra.mrb[28].mxu1 %v5400_v16 }
 0x363   :  { %1288 = vmatpush1.bf16.msra.mxu0 %v4974_v24  ;;  %4008 = vmatpush3.bf16.msra.mxu1 %v5051_v40 }
 0x364   :  { %1289 = vmatprep.subr.bf16.mxu0 %v4980_v25  ;;  %4009 = vmatprep.subr.bf16.mxu1 %v6661_v58 }
 0x365   :  { %1319 = vmatprep.mubr.bf16.mxu0 %v6662_v59  ;;  %4023 = vmatprep.mubr.msk.bf16.mxu1 %vm4818_vm0, %v6661_v58 }
 0x367   :  { %1290 = vmatpush1.bf16.msra.mxu0 %v4990_v27  ;;  %4010 = vmatpush3.bf16.msra.mxu1 %v5070_v43 }
 0x368   :  { %1291 = vmatprep.subr.bf16.mxu0 %v4996_v28  ;;  %4011 = vmatprep.subr.bf16.mxu1 %v6661_v58 }
 0x36b   :  { %1292 = vmatpush1.bf16.msra.mxu0 %v5008_v31  ;;  %4012 = vmatpush3.bf16.msra.mxu1 %v5092_v47 }
 0x36c   :  { %1293 = vmatprep.subr.bf16.mxu0 %v5014_v32  ;;  %4013 = vmatprep.subr.bf16.mxu1 %v6661_v58 }
 0x36f   :  { %1294 = vmatpush1.bf16.msra.mxu0 %v5024_v34  ;;  %4014 = vmatpush3.bf16.msra.mxu1 %v5110_v50 }
 0x370   :  { %1295 = vmatprep.subr.bf16.mxu0 %v5030_v35  ;;  %4015 = vmatprep.subr.bf16.mxu1 %v6661_v58 }
 0x373   :  { %1296 = vmatpush1.bf16.msra.mxu0 %v5039_v37  ;;  %4016 = vmatpush3.bf16.msra.mxu1 %v5119_v51 }
 0x374   :  { %1297 = vmatprep.subr.bf16.mxu0 %v5045_v38  ;;  %4017 = vmatprep.subr.bf16.mxu1 %v6661_v58 }
 0x377   :  { %1298 = vmatpush1.bf16.msra.mxu0 %v5058_v41  ;;  %4018 = vmatpush3.bf16.msra.mxu1 %v5133_v54 }
 0x378   :  { %1299 = vmatprep.subr.bf16.mxu0 %v5064_v42  ;;  %4019 = vmatprep.subr.bf16.mxu1 %v6661_v58 }
 0x37b   :  { %1300 = vmatpush1.bf16.msra.mxu0 %v5080_v45  ;;  %4020 = vmatpush3.bf16.msra.mxu1 %v5140_v55 }
 0x37c   :  { %1301 = vmatprep.subr.bf16.mxu0 %v5086_v46  ;;  %4021 = vmatprep.subr.bf16.mxu1 %v6661_v58 }
 0x37f   :  { %1302 = vmatpush1.bf16.msra.mxu0 %v5103_v49  ;;  %4022 = vmatpush3.bf16.msra.mxu1 %v5151_v57 }
 0x380   :  { %1424 = vmatprep.subr.bf16.mxu0 %v4966_v22  ;;  %4027 = vmatprep.subr.bf16.mxu1 %v6661_v58 }
 0x435   :  { %v1184_v24 = vpop.f32.mrb[12].mxu0  ;;  %v1227_v25 = vpop.f32.mrb[28].mxu1 }
 0x436   :  { %v4311_v3 = vadd.f32 %v1184_v24, %v5262_v11  ;;  %v1186_v33 = vpop.f32.mrb[13].mxu0  ;;  %v4005_v4 = vpop.f32.mrb[29].mxu1  ;;  %v1254_v9 = vadd.f32 %v5276_v13, %v1227_v25 }
 0x437   :  { %v1188_v2 = vpop.f32.mrb[14].mxu0  ;;  %v1230_v17 = vpop.f32.mrb[30].mxu1  ;;  %v4312_v22 = vadd.f32 %v1186_v33, %v5269_v53 }
 0x438   :  { %v1236_v36 = vmul.f32 0.5, %v4311_v3  ;;  %v4313_v63 = vadd.f32 %v1188_v2, %v5262_v11  ;;  %v1190_v48 = vpop.f32.mrb[15].mxu0  ;;  %v4006_v52 = vpop.f32.mrb[31].mxu1  ;;  %v1255_v12 = vadd.f32 %v5276_v13, %v1230_v17 }
 0x439   :  { %v4314_v15 = vadd.f32 %v1190_v48, %v5269_v53  ;;  %v1246_v30 = vmul.f32 0.5, %v4312_v22 }
 0x43a   :  { %4610 = vtanh.f32 %v1236_v36  ;;  %v1237_v60 = vmul.f32 0.5, %v4313_v63 }
 0x43b   :  { %v1247_v19 = vmul.f32 0.5, %v4314_v15 }
 0x43c   :  { %4612 = vtanh.f32 %v1237_v60 }
 0x43d   :  { %4614 = vtanh.f32 %v1246_v30 }
 0x43e   :  { %4616 = vtanh.f32 %v1247_v19 }
 0x444   :  { %v4611_v21 = vpop.eup %4610 }
 0x445   :  { %v1240_v5 = vmul.f32 0.5, %v4611_v21 }
 0x446   :  { %v4613_v1 = vpop.eup %4612 }
 0x447   :  { %v1242_v8 = vadd.f32 0.5, %v1240_v5  ;;  %v1241_v26 = vmul.f32 0.5, %v4613_v1  ;;  %v4615_v4 = vpop.eup %4614 }
 0x448   :  { %v4617_v2 = vpop.eup %4616  ;;  %v1250_v36 = vmul.f32 0.5, %v4615_v4 }
 0x449   :  { %v1256_v62 = vmul.f32 %v1254_v9, %v1242_v8  ;;  %v1243_v6 = vadd.f32 0.5, %v1241_v26  ;;  %v1251_v63 = vmul.f32 0.5, %v4617_v2 }
 0x44a   :  { %v1252_v25 = vadd.f32 0.5, %v1250_v36 }
 0x44b   :  { %v1258_v24 = vadd.f32 %v1256_v62, %v5224_v10  ;;  %v1257_v3 = vmul.f32 %v1255_v12, %v1243_v6  ;;  %v1253_v15 = vadd.f32 0.5, %v1251_v63 }
 0x44d   :  { %4618 = vtanh.f32 %v1258_v24  ;;  %v1259_v33 = vadd.f32 %v1257_v3, %v5230_v14 }
 0x44f   :  { %4620 = vtanh.f32 %v1259_v33 }
 0x457   :  { %v4619_v48 = vpop.eup %4618 }
 0x458   :  { %v1262_v52 = vsub.f32 %v5394_v0, %v4619_v48  ;;  %v5462_v0 = vld [vmem:[%s6635_s5] ss:$12 sps:$4 sm:$0xff]  }
 0x459   :  { %v4621_v60 = vpop.eup %4620 }
 0x45a   :  { %v1264_v22 = vmul.f32 %v1262_v52, %v1252_v25  ;;  %v1263_v17 = vsub.f32 %v5396_v61, %v4621_v60  ;;  %v5469_v61 = vld [vmem:[%s6635_s5 + $0x1c] ss:$12 sps:$4 sm:$0xff]  }
 0x45c   :  { %v5449_v30 = vadd.f32 %v4619_v48, %v1264_v22  ;;  %v1265_v10 = vmul.f32 %v1263_v17, %v1253_v15  ;;  %v5533_v15 = vld [vmem:[%s6635_s5 + $0x8] ss:$12 sps:$4 sm:$0xff]   ;;  %v5544_v17 = vld [vmem:[%s6635_s5 + $0x18] ss:$12 sps:$4 sm:$0xff]  }
 0x45e   :  { %v5451_v21 = vadd.f32 %v4621_v60, %v1265_v10  ;;  %v5556_v10 = vld [vmem:[%s6635_s5 + $0x34] ss:$12 sps:$4 sm:$0xff]  }
 0x460   :  { %v5455_v14 = vpack.c.bf16 %v5451_v21, %v5449_v30 }
 0x462   :  { %1320 = vmatmul.mubr.bf16.vlgmr.msra.gmra.mrb[16].mxu0 %v5455_v14  ;;  %4024 = vmatmul.mubr.bf16.vlgmr.msra.gmra.mrb[32].mxu1 %v5455_v14 }
 0x463   :  { %1425 = vmatpush1.bf16.msra.mxu0 %v5462_v0  ;;  %4028 = vmatpush3.bf16.msra.mxu1 %v5051_v40 }
 0x464   :  { %1426 = vmatprep.subr.bf16.mxu0 %v5469_v61  ;;  %4029 = vmatprep.subr.bf16.mxu1 %v6661_v58 }
 0x465   :  { %1456 = vmatprep.mubr.bf16.mxu0 %v6662_v59  ;;  %4043 = vmatprep.mubr.msk.bf16.mxu1 %vm4818_vm0, %v6661_v58 }
 0x467   :  { %1427 = vmatpush1.bf16.msra.mxu0 %v4990_v27  ;;  %4030 = vmatpush3.bf16.msra.mxu1 %v5070_v43  ;;  %v5505_v27 = vld [vmem:[%s6635_s5 + $0x4] ss:$12 sps:$4 sm:$0xff]  }
 0x468   :  { %1428 = vmatprep.subr.bf16.mxu0 %v4996_v28  ;;  %4031 = vmatprep.subr.bf16.mxu1 %v6661_v58 }
 0x46b   :  { %1429 = vmatpush1.bf16.msra.mxu0 %v5008_v31  ;;  %4032 = vmatpush3.bf16.msra.mxu1 %v5092_v47 }
 0x46c   :  { %1430 = vmatprep.subr.bf16.mxu0 %v5014_v32  ;;  %4033 = vmatprep.subr.bf16.mxu1 %v6661_v58 }
 0x46f   :  { %1431 = vmatpush1.bf16.msra.mxu0 %v5024_v34  ;;  %4034 = vmatpush3.bf16.msra.mxu1 %v5110_v50 }
 0x470   :  { %1432 = vmatprep.subr.bf16.mxu0 %v5030_v35  ;;  %4035 = vmatprep.subr.bf16.mxu1 %v6661_v58 }
 0x473   :  { %1433 = vmatpush1.bf16.msra.mxu0 %v5039_v37  ;;  %4036 = vmatpush3.bf16.msra.mxu1 %v5119_v51 }
 0x474   :  { %1434 = vmatprep.subr.bf16.mxu0 %v5045_v38  ;;  %4037 = vmatprep.subr.bf16.mxu1 %v6661_v58 }
 0x477   :  { %1435 = vmatpush1.bf16.msra.mxu0 %v5058_v41  ;;  %4038 = vmatpush3.bf16.msra.mxu1 %v5133_v54 }
 0x478   :  { %1436 = vmatprep.subr.bf16.mxu0 %v5064_v42  ;;  %4039 = vmatprep.subr.bf16.mxu1 %v6661_v58 }
 0x47b   :  { %1437 = vmatpush1.bf16.msra.mxu0 %v5080_v45  ;;  %4040 = vmatpush3.bf16.msra.mxu1 %v5140_v55 }
 0x47c   :  { %1438 = vmatprep.subr.bf16.mxu0 %v5086_v46  ;;  %4041 = vmatprep.subr.bf16.mxu1 %v6661_v58 }
 0x47f   :  { %1439 = vmatpush1.bf16.msra.mxu0 %v5103_v49  ;;  %4042 = vmatpush3.bf16.msra.mxu1 %v5151_v57 }
 0x480   :  { %1561 = vmatprep.subr.bf16.mxu0 %v5505_v27  ;;  %4047 = vmatprep.subr.bf16.mxu1 %v6661_v58 }
 0x535   :  { %v1321_v28 = vpop.f32.mrb[16].mxu0  ;;  %v1364_v31 = vpop.f32.mrb[32].mxu1 }
 0x536   :  { %v4315_v32 = vadd.f32 %v1321_v28, %v5262_v11  ;;  %v1323_v34 = vpop.f32.mrb[17].mxu0  ;;  %v4025_v35 = vpop.f32.mrb[33].mxu1  ;;  %v1391_v5 = vadd.f32 %v5276_v13, %v1364_v31  ;;  %v5569_v28 = vld [vmem:[%s6635_s5 + $0x38] ss:$12 sps:$4 sm:$0xff]  }
 0x537   :  { %v1325_v37 = vpop.f32.mrb[18].mxu0  ;;  %v1367_v38 = vpop.f32.mrb[34].mxu1  ;;  %v4316_v46 = vadd.f32 %v1323_v34, %v5269_v53  ;;  %v5575_v31 = vld [vmem:[%s6635_s5 + $0x4c] ss:$12 sps:$4 sm:$0xff]   ;;  %v5588_v34 = vld [vmem:[%s6635_s5 + $0x50] ss:$12 sps:$4 sm:$0xff]  }
 0x538   :  { %v1373_v40 = vmul.f32 0.5, %v4315_v32  ;;  %v4317_v41 = vadd.f32 %v1325_v37, %v5262_v11  ;;  %v1327_v42 = vpop.f32.mrb[19].mxu0  ;;  %v4026_v43 = vpop.f32.mrb[35].mxu1  ;;  %v1392_v9 = vadd.f32 %v5276_v13, %v1367_v38  ;;  %v5582_v32 = vld [vmem:[%s6635_s5 + $0x48] ss:$12 sps:$4 sm:$0xff]  }
 0x539   :  { %v4318_v47 = vadd.f32 %v1327_v42, %v5269_v53  ;;  %v1383_v49 = vmul.f32 0.5, %v4316_v46  ;;  %v5594_v35 = vld [vmem:[%s6635_s5 + $0x64] ss:$12 sps:$4 sm:$0xff]   ;;  %v5601_v37 = vld [vmem:[%s6635_s5 + $0x60] ss:$12 sps:$4 sm:$0xff]  }
 0x53a   :  { %4622 = vtanh.f32 %v1373_v40  ;;  %v1374_v45 = vmul.f32 0.5, %v4317_v41  ;;  %v5607_v38 = vld [vmem:[%s6635_s5 + $0x68] ss:$12 sps:$4 sm:$0xff]   ;;  %v5620_v41 = vld [vmem:[%s6635_s5 + $0x78] ss:$12 sps:$4 sm:$0xff]  }
 0x53b   :  { %v1384_v54 = vmul.f32 0.5, %v4318_v47  ;;  %v5613_v40 = vld [vmem:[%s6635_s5 + $0x7c] ss:$12 sps:$4 sm:$0xff]   ;;  %v5626_v42 = vld [vmem:[%s6635_s5 + $0x80] ss:$12 sps:$4 sm:$0xff]  }
 0x53c   :  { %4624 = vtanh.f32 %v1374_v45  ;;  %v5632_v43 = vld [vmem:[%s6635_s5 + $0x94] ss:$12 sps:$4 sm:$0xff]   ;;  %v5639_v45 = vld [vmem:[%s6635_s5 + $0x90] ss:$12 sps:$4 sm:$0xff]   ;;  %v5645_v46 = vld [vmem:[%s6635_s5 + $0x98] ss:$12 sps:$4 sm:$0xff]  }
 0x53d   :  { %4626 = vtanh.f32 %v1383_v49  ;;  %v5651_v47 = vld [vmem:[%s6635_s5 + $0xac] ss:$12 sps:$4 sm:$0xff]   ;;  %v5658_v49 = vld [vmem:[%s6635_s5 + $0xa8] ss:$12 sps:$4 sm:$0xff]  }
 0x53e   :  { %4628 = vtanh.f32 %v1384_v54 }
 0x544   :  { %v4623_v50 = vpop.eup %4622 }
 0x545   :  { %v1377_v51 = vmul.f32 0.5, %v4623_v50  ;;  %v5664_v50 = vld [vmem:[%s6635_s5 + $0xb0] ss:$12 sps:$4 sm:$0xff]  }
 0x546   :  { %v4625_v55 = vpop.eup %4624 }
 0x547   :  { %v1379_v57 = vadd.f32 0.5, %v1377_v51  ;;  %v1378_v19 = vmul.f32 0.5, %v4625_v55  ;;  %v4627_v12 = vpop.eup %4626 }
 0x548   :  { %v4629_v24 = vpop.eup %4628  ;;  %v1387_v3 = vmul.f32 0.5, %v4627_v12 }
 0x549   :  { %v1393_v1 = vmul.f32 %v1391_v5, %v1379_v57  ;;  %v1380_v8 = vadd.f32 0.5, %v1378_v19  ;;  %v1388_v33 = vmul.f32 0.5, %v4629_v24 }
 0x54a   :  { %v1389_v2 = vadd.f32 0.5, %v1387_v3 }
 0x54b   :  { %v1395_v26 = vadd.f32 %v1393_v1, %v5239_v20  ;;  %v1394_v62 = vmul.f32 %v1392_v9, %v1380_v8  ;;  %v1390_v25 = vadd.f32 0.5, %v1388_v33 }
 0x54d   :  { %4630 = vtanh.f32 %v1395_v26  ;;  %v1396_v6 = vadd.f32 %v1394_v62, %v5245_v29 }
 0x54f   :  { %4632 = vtanh.f32 %v1396_v6 }
 0x557   :  { %v4631_v4 = vpop.eup %4630 }
 0x558   :  { %v1399_v36 = vsub.f32 %v5449_v30, %v4631_v4  ;;  %v5550_v30 = vld [vmem:[%s6635_s5 + $0x20] ss:$12 sps:$4 sm:$0xff]  }
 0x559   :  { %v4633_v63 = vpop.eup %4632 }
 0x55a   :  { %v1401_v48 = vmul.f32 %v1399_v36, %v1389_v2  ;;  %v1400_v52 = vsub.f32 %v5451_v21, %v4633_v63  ;;  %v5563_v21 = vld [vmem:[%s6635_s5 + $0x30] ss:$12 sps:$4 sm:$0xff]  }
 0x55c   :  { %v5519_v60 = vadd.f32 %v4631_v4, %v1401_v48  ;;  %v1402_v20 = vmul.f32 %v1400_v52, %v1390_v25 }
 0x55e   :  { %v5521_v22 = vadd.f32 %v4633_v63, %v1402_v20 }
 0x560   :  { %v5525_v29 = vpack.c.bf16 %v5521_v22, %v5519_v60 }
 0x562   :  { %1457 = vmatmul.mubr.bf16.vlgmr.msra.gmra.mrb[20].mxu0 %v5525_v29  ;;  %4044 = vmatmul.mubr.bf16.vlgmr.msra.gmra.mrb[36].mxu1 %v5525_v29 }
 0x563   :  { %1562 = vmatpush1.bf16.msra.mxu0 %v5462_v0  ;;  %4048 = vmatpush3.bf16.msra.mxu1 %v5533_v15 }
 0x564   :  { %1563 = vmatprep.subr.bf16.mxu0 %v5469_v61  ;;  %4049 = vmatprep.subr.bf16.mxu1 %v6661_v58 }
 0x565   :  { %1593 = vmatprep.mubr.bf16.mxu0 %v6662_v59  ;;  %4063 = vmatprep.mubr.msk.bf16.mxu1 %vm4818_vm0, %v6661_v58 }
 0x567   :  { %1564 = vmatpush1.bf16.msra.mxu0 %v5544_v17  ;;  %4050 = vmatpush3.bf16.msra.mxu1 %v5550_v30 }
 0x568   :  { %1565 = vmatprep.subr.bf16.mxu0 %v5556_v10  ;;  %4051 = vmatprep.subr.bf16.mxu1 %v6661_v58 }
 0x56b   :  { %1566 = vmatpush1.bf16.msra.mxu0 %v5563_v21  ;;  %4052 = vmatpush3.bf16.msra.mxu1 %v5569_v28 }
 0x56c   :  { %1567 = vmatprep.subr.bf16.mxu0 %v5575_v31  ;;  %4053 = vmatprep.subr.bf16.mxu1 %v6661_v58 }
 0x56f   :  { %1568 = vmatpush1.bf16.msra.mxu0 %v5582_v32  ;;  %4054 = vmatpush3.bf16.msra.mxu1 %v5588_v34 }
 0x570   :  { %1569 = vmatprep.subr.bf16.mxu0 %v5594_v35  ;;  %4055 = vmatprep.subr.bf16.mxu1 %v6661_v58 }
 0x573   :  { %1570 = vmatpush1.bf16.msra.mxu0 %v5601_v37  ;;  %4056 = vmatpush3.bf16.msra.mxu1 %v5607_v38 }
 0x574   :  { %1571 = vmatprep.subr.bf16.mxu0 %v5613_v40  ;;  %4057 = vmatprep.subr.bf16.mxu1 %v6661_v58 }
 0x577   :  { %1572 = vmatpush1.bf16.msra.mxu0 %v5620_v41  ;;  %4058 = vmatpush3.bf16.msra.mxu1 %v5626_v42 }
 0x578   :  { %1573 = vmatprep.subr.bf16.mxu0 %v5632_v43  ;;  %4059 = vmatprep.subr.bf16.mxu1 %v6661_v58 }
 0x57b   :  { %1574 = vmatpush1.bf16.msra.mxu0 %v5639_v45  ;;  %4060 = vmatpush3.bf16.msra.mxu1 %v5645_v46 }
 0x57c   :  { %1575 = vmatprep.subr.bf16.mxu0 %v5651_v47  ;;  %4061 = vmatprep.subr.bf16.mxu1 %v6661_v58 }
 0x57f   :  { %1576 = vmatpush1.bf16.msra.mxu0 %v5658_v49  ;;  %4062 = vmatpush3.bf16.msra.mxu1 %v5664_v50 }
 0x580   :  { %1698 = vmatprep.subr.bf16.mxu0 %v5505_v27  ;;  %4067 = vmatprep.subr.bf16.mxu1 %v6661_v58 }
 0x635   :  { %v1458_v51 = vpop.f32.mrb[20].mxu0  ;;  %v1501_v54 = vpop.f32.mrb[36].mxu1 }
 0x636   :  { %v4319_v55 = vadd.f32 %v1458_v51, %v5262_v11  ;;  %v1460_v57 = vpop.f32.mrb[21].mxu0  ;;  %v4045_v5 = vpop.f32.mrb[37].mxu1  ;;  %v1528_v63 = vadd.f32 %v5276_v13, %v1501_v54 }
 0x637   :  { %v1462_v19 = vpop.f32.mrb[22].mxu0  ;;  %v1504_v1 = vpop.f32.mrb[38].mxu1  ;;  %v4320_v27 = vadd.f32 %v1460_v57, %v5269_v53 }
 0x638   :  { %v1510_v8 = vmul.f32 0.5, %v4319_v55  ;;  %v4321_v9 = vadd.f32 %v1462_v19, %v5262_v11  ;;  %v1464_v26 = vpop.f32.mrb[23].mxu0  ;;  %v4046_v62 = vpop.f32.mrb[39].mxu1  ;;  %v1529_v20 = vadd.f32 %v5276_v13, %v1504_v1 }
 0x639   :  { %v4322_v12 = vadd.f32 %v1464_v26, %v5269_v53  ;;  %v1520_v24 = vmul.f32 0.5, %v4320_v27 }
 0x63a   :  { %4634 = vtanh.f32 %v1510_v8  ;;  %v1511_v6 = vmul.f32 0.5, %v4321_v9 }
 0x63b   :  { %v1521_v4 = vmul.f32 0.5, %v4322_v12 }
 0x63c   :  { %4636 = vtanh.f32 %v1511_v6 }
 0x63d   :  { %4638 = vtanh.f32 %v1520_v24 }
 0x63e   :  { %4640 = vtanh.f32 %v1521_v4 }
 0x644   :  { %v4635_v3 = vpop.eup %4634 }
 0x645   :  { %v1514_v33 = vmul.f32 0.5, %v4635_v3 }
 0x646   :  { %v4637_v2 = vpop.eup %4636 }
 0x647   :  { %v1516_v36 = vadd.f32 0.5, %v1514_v33  ;;  %v1515_v48 = vmul.f32 0.5, %v4637_v2  ;;  %v4639_v5 = vpop.eup %4638 }
 0x648   :  { %v4641_v19 = vpop.eup %4640  ;;  %v1524_v8 = vmul.f32 0.5, %v4639_v5 }
 0x649   :  { %v1530_v25 = vmul.f32 %v1528_v63, %v1516_v36  ;;  %v1517_v52 = vadd.f32 0.5, %v1515_v48  ;;  %v1525_v9 = vmul.f32 0.5, %v4641_v19 }
 0x64a   :  { %v1526_v54 = vadd.f32 0.5, %v1524_v8 }
 0x64b   :  { %v1532_v51 = vadd.f32 %v1530_v25, %v5236_v18  ;;  %v1531_v55 = vmul.f32 %v1529_v20, %v1517_v52  ;;  %v1527_v12 = vadd.f32 0.5, %v1525_v9 }
 0x64d   :  { %4642 = vtanh.f32 %v1532_v51  ;;  %v1533_v57 = vadd.f32 %v1531_v55, %v5242_v23 }
 0x64f   :  { %4644 = vtanh.f32 %v1533_v57 }
 0x657   :  { %v4643_v26 = vpop.eup %4642 }
 0x658   :  { %v1536_v62 = vsub.f32 %v5519_v60, %v4643_v26 }
 0x659   :  { %v4645_v6 = vpop.eup %4644 }
 0x65a   :  { %v1538_v27 = vmul.f32 %v1536_v62, %v1526_v54  ;;  %v1537_v13 = vsub.f32 %v5521_v22, %v4645_v6 }
 0x65c   :  { %v5679_v1 = vadd.f32 %v4643_v26, %v1538_v27  ;;  %v1539_v18 = vmul.f32 %v1537_v13, %v1527_v12  ;;  %v4509_v27 = vld [vmem:[%s6639_s4 + $0x20] ss:$12 sps:$4 sm:$0xff]   ;;  %v4506_v12 = vld [vmem:[%s6639_s4 + $0x18] ss:$12 sps:$4 sm:$0xff]  }
 0x65d   :  { %v4512_v13 = vld [vmem:[%s6639_s4 + $0x34] ss:$12 sps:$4 sm:$0xff]  }
 0x65e   :  { %v5681_v24 = vadd.f32 %v4645_v6, %v1539_v18  ;;  %v4508_v6 = vld [vmem:[%s6639_s4 + $0x1c] ss:$12 sps:$4 sm:$0xff]  }
 0x65f   :  { %v4510_v18 = vld [vmem:[%s6639_s4 + $0x30] ss:$12 sps:$4 sm:$0xff]  }
 0x660   :  { %v5685_v23 = vpack.c.bf16 %v5681_v24, %v5679_v1 }
 0x662   :  { %1594 = vmatmul.mubr.bf16.vlgmr.msra.gmra.mrb[24].mxu0 %v5685_v23  ;;  %4064 = vmatmul.mubr.bf16.vlgmr.msra.gmra.mrb[40].mxu1 %v5685_v23 }
 0x663   :  { %1699 = vmatpush1.bf16.msra.mxu0 %v5462_v0  ;;  %4068 = vmatpush3.bf16.msra.mxu1 %v5533_v15  ;;  %v4504_v0 = vld [vmem:[%s6639_s4 + $0x4] ss:$12 sps:$4 sm:$0xff]  }
 0x664   :  { %1700 = vmatprep.subr.bf16.mxu0 %v5469_v61  ;;  %4069 = vmatprep.subr.bf16.mxu1 %v6661_v58  ;;  %v4505_v61 = vld [vmem:[%s6639_s4 + $0x8] ss:$12 sps:$4 sm:$0xff]  }
 0x665   :  { %1730 = vmatprep.mubr.bf16.mxu0 %v6662_v59  ;;  %4083 = vmatprep.mubr.msk.bf16.mxu1 %vm4818_vm0, %v6661_v58 }
 0x667   :  { %1701 = vmatpush1.bf16.msra.mxu0 %v5544_v17  ;;  %4070 = vmatpush3.bf16.msra.mxu1 %v5550_v30 }
 0x668   :  { %1702 = vmatprep.subr.bf16.mxu0 %v5556_v10  ;;  %4071 = vmatprep.subr.bf16.mxu1 %v6661_v58 }
 0x66b   :  { %1703 = vmatpush1.bf16.msra.mxu0 %v5563_v21  ;;  %4072 = vmatpush3.bf16.msra.mxu1 %v5569_v28 }
 0x66c   :  { %1704 = vmatprep.subr.bf16.mxu0 %v5575_v31  ;;  %4073 = vmatprep.subr.bf16.mxu1 %v6661_v58 }
 0x66f   :  { %1705 = vmatpush1.bf16.msra.mxu0 %v5582_v32  ;;  %4074 = vmatpush3.bf16.msra.mxu1 %v5588_v34 }
 0x670   :  { %1706 = vmatprep.subr.bf16.mxu0 %v5594_v35  ;;  %4075 = vmatprep.subr.bf16.mxu1 %v6661_v58 }
 0x673   :  { %1707 = vmatpush1.bf16.msra.mxu0 %v5601_v37  ;;  %4076 = vmatpush3.bf16.msra.mxu1 %v5607_v38 }
 0x674   :  { %1708 = vmatprep.subr.bf16.mxu0 %v5613_v40  ;;  %4077 = vmatprep.subr.bf16.mxu1 %v6661_v58 }
 0x677   :  { %1709 = vmatpush1.bf16.msra.mxu0 %v5620_v41  ;;  %4078 = vmatpush3.bf16.msra.mxu1 %v5626_v42 }
 0x678   :  { %1710 = vmatprep.subr.bf16.mxu0 %v5632_v43  ;;  %4079 = vmatprep.subr.bf16.mxu1 %v6661_v58 }
 0x67b   :  { %1711 = vmatpush1.bf16.msra.mxu0 %v5639_v45  ;;  %4080 = vmatpush3.bf16.msra.mxu1 %v5645_v46 }
 0x67c   :  { %1712 = vmatprep.subr.bf16.mxu0 %v5651_v47  ;;  %4081 = vmatprep.subr.bf16.mxu1 %v6661_v58  ;;  %v5735_v47 = vld [vmem:[%s6638_s9] ss:$0 sm:$0xff] }
 0x67f   :  { %1713 = vmatpush1.bf16.msra.mxu0 %v5658_v49  ;;  %4082 = vmatpush3.bf16.msra.mxu1 %v5664_v50 }
 0x680   :  { %2012 = vmatprep.subr.bf16.mxu1 %v4504_v0  ;;  %4087 = vmatprep.subr.bf16.mxu0 %v4505_v61  ;;  %v4517_v0 = vld [vmem:[%s6639_s4 + $0x50] ss:$12 sps:$4 sm:$0xff]  }
 0x735   :  { %v1595_v60 = vpop.f32.mrb[24].mxu0  ;;  %v1638_v22 = vpop.f32.mrb[40].mxu1 }
 0x736   :  { %v4323_v15 = vadd.f32 %v1595_v60, %v5262_v11  ;;  %v1597_v17 = vpop.f32.mrb[25].mxu0  ;;  %v4065_v30 = vpop.f32.mrb[41].mxu1  ;;  %v1665_v49 = vadd.f32 %v5735_v47, %v1638_v22  ;;  %v4520_v60 = vld [vmem:[%s6639_s4 + $0x64] ss:$12 sps:$4 sm:$0xff]   ;;  %v4521_v22 = vld [vmem:[%s6639_s4 + $0x68] ss:$12 sps:$4 sm:$0xff]  }
 0x737   :  { %v1599_v10 = vpop.f32.mrb[26].mxu0  ;;  %v1641_v21 = vpop.f32.mrb[42].mxu1  ;;  %v4324_v37 = vadd.f32 %v1597_v17, %v5269_v53  ;;  %v4524_v17 = vld [vmem:[%s6639_s4 + $0x7c] ss:$12 sps:$4 sm:$0xff]   ;;  %v4525_v30 = vld [vmem:[%s6639_s4 + $0x80] ss:$12 sps:$4 sm:$0xff]  }
 0x738   :  { %v1647_v28 = vmul.f32 0.5, %v4323_v15  ;;  %v4325_v31 = vadd.f32 %v1599_v10, %v5262_v11  ;;  %v1601_v32 = vpop.f32.mrb[27].mxu0  ;;  %v4066_v34 = vpop.f32.mrb[43].mxu1  ;;  %v1666_v4 = vadd.f32 %v5735_v47, %v1641_v21  ;;  %v4518_v15 = vld [vmem:[%s6639_s4 + $0x60] ss:$12 sps:$4 sm:$0xff]  }
 0x739   :  { %v4326_v38 = vadd.f32 %v1601_v32, %v5269_v53  ;;  %v1657_v40 = vmul.f32 0.5, %v4324_v37  ;;  %v4522_v10 = vld [vmem:[%s6639_s4 + $0x78] ss:$12 sps:$4 sm:$0xff]   ;;  %v4528_v21 = vld [vmem:[%s6639_s4 + $0x94] ss:$12 sps:$4 sm:$0xff]  }
 0x73a   :  { %4646 = vtanh.f32 %v1647_v28  ;;  %v1648_v35 = vmul.f32 0.5, %v4325_v31  ;;  %v4529_v28 = vld [vmem:[%s6639_s4 + $0x98] ss:$12 sps:$4 sm:$0xff]   ;;  %v4526_v31 = vld [vmem:[%s6639_s4 + $0x90] ss:$12 sps:$4 sm:$0xff]  }
 0x73b   :  { %v1658_v43 = vmul.f32 0.5, %v4326_v38  ;;  %v4532_v32 = vld [vmem:[%s6639_s4 + $0xac] ss:$12 sps:$4 sm:$0xff]   ;;  %v4533_v34 = vld [vmem:[%s6639_s4 + $0xb0] ss:$12 sps:$4 sm:$0xff]  }
 0x73c   :  { %4648 = vtanh.f32 %v1648_v35  ;;  %v4530_v35 = vld [vmem:[%s6639_s4 + $0xa8] ss:$12 sps:$4 sm:$0xff]   ;;  %v5824_v37 = vld [vmem:[%s6640_s6 + $0x4] ss:$12 sps:$4 sm:$0xff]   ;;  %v5830_v38 = vld [vmem:[%s6640_s6] ss:$12 sps:$4 sm:$0xff]  }
 0x73d   :  { %4650 = vtanh.f32 %v1657_v40  ;;  %v5836_v40 = vld [vmem:[%s6640_s6 + $0x1c] ss:$12 sps:$4 sm:$0xff]  }
 0x73e   :  { %4652 = vtanh.f32 %v1658_v43  ;;  %v5912_v43 = vld [vmem:[%s6640_s6 + $0x7c] ss:$12 sps:$4 sm:$0xff]  }
 0x744   :  { %v4647_v41 = vpop.eup %4646 }
 0x745   :  { %v1651_v42 = vmul.f32 0.5, %v4647_v41  ;;  %v5846_v41 = vld [vmem:[%s6640_s6 + $0x18] ss:$12 sps:$4 sm:$0xff]  }
 0x746   :  { %v4649_v45 = vpop.eup %4648 }
 0x747   :  { %v1653_v46 = vadd.f32 0.5, %v1651_v42  ;;  %v1652_v50 = vmul.f32 0.5, %v4649_v45  ;;  %v4651_v48 = vpop.eup %4650  ;;  %v5903_v42 = vld [vmem:[%s6640_s6 + $0x60] ss:$12 sps:$4 sm:$0xff]   ;;  %v5917_v45 = vld [vmem:[%s6640_s6 + $0x78] ss:$12 sps:$4 sm:$0xff]  }
 0x748   :  { %v4653_v25 = vpop.eup %4652  ;;  %v1661_v52 = vmul.f32 0.5, %v4651_v48  ;;  %v5983_v48 = vld [vmem:[%s6640_s6 + $0x98] ss:$12 sps:$4 sm:$0xff]  }
 0x749   :  { %v1667_v3 = vmul.f32 %v1665_v49, %v1653_v46  ;;  %v1654_v33 = vadd.f32 0.5, %v1652_v50  ;;  %v1662_v20 = vmul.f32 0.5, %v4653_v25  ;;  %v5922_v46 = vld [vmem:[%s6640_s6 + $0x94] ss:$12 sps:$4 sm:$0xff]   ;;  %v5935_v50 = vld [vmem:[%s6640_s6 + $0x90] ss:$12 sps:$4 sm:$0xff]  }
 0x74a   :  { %v1663_v55 = vadd.f32 0.5, %v1661_v52  ;;  %v5927_v49 = vld [vmem:[%s6640_s6 + $0x20] ss:$12 sps:$4 sm:$0xff]   ;;  %v5990_v25 = vld [vmem:[%s6640_s6 + $0xb0] ss:$12 sps:$4 sm:$0xff]  }
 0x74b   :  { %v1669_v2 = vadd.f32 %v1667_v3, %v5251_v44  ;;  %v1668_v36 = vmul.f32 %v1666_v4, %v1654_v33  ;;  %v1664_v8 = vadd.f32 0.5, %v1662_v20  ;;  %v5941_v3 = vld [vmem:[%s6640_s6 + $0x38] ss:$12 sps:$4 sm:$0xff]   ;;  %v5954_v4 = vld [vmem:[%s6640_s6 + $0xa8] ss:$12 sps:$4 sm:$0xff]  }
 0x74c   :  { %v5947_v33 = vld [vmem:[%s6640_s6 + $0xac] ss:$12 sps:$4 sm:$0xff]  }
 0x74d   :  { %4654 = vtanh.f32 %v1669_v2  ;;  %v1670_v63 = vadd.f32 %v1668_v36, %v5257_v56  ;;  %v4502_v56 = vld [vmem:[%s6639_s4] ss:$12 sps:$4 sm:$0xff]   ;;  %v5960_v2 = vld [vmem:[%s6640_s6 + $0x50] ss:$12 sps:$4 sm:$0xff]   ;;  %v5969_v36 = vld [vmem:[%s6640_s6 + $0x68] ss:$12 sps:$4 sm:$0xff]  }
 0x74f   :  { %4656 = vtanh.f32 %v1670_v63  ;;  %v5976_v63 = vld [vmem:[%s6640_s6 + $0x80] ss:$12 sps:$4 sm:$0xff]  }
 0x757   :  { %v4655_v51 = vpop.eup %4654 }
 0x758   :  { %v1673_v57 = vsub.f32 %v5679_v1, %v4655_v51  ;;  %v4513_v1 = vld [vmem:[%s6639_s4 + $0x38] ss:$12 sps:$4 sm:$0xff]  }
 0x759   :  { %v4657_v5 = vpop.eup %4656 }
 0x75a   :  { %v1675_v19 = vmul.f32 %v1673_v57, %v1663_v55  ;;  %v1674_v9 = vsub.f32 %v5681_v24, %v4657_v5  ;;  %v4516_v24 = vld [vmem:[%s6639_s4 + $0x4c] ss:$12 sps:$4 sm:$0xff]  }
 0x75c   :  { %v5743_v26 = vadd.f32 %v4655_v51, %v1675_v19  ;;  %v1676_v44 = vmul.f32 %v1674_v9, %v1664_v8 }
 0x75e   :  { %v5745_v54 = vadd.f32 %v4657_v5, %v1676_v44 }
 0x760   :  { %v5752_v62 = vpack.c.bf16 %v5745_v54, %v5743_v26 }
 0x762   :  { %1731 = vmatmul.mubr.bf16.vlgmr.msra.gmra.mrb[28].mxu0 %v5752_v62  ;;  %4084 = vmatmul.mubr.bf16.vlgmr.msra.gmra.mrb[44].mxu1 %v5752_v62 }
 0x763   :  { %2013 = vmatpush1.bf16.msra.mxu1 %v4502_v56  ;;  %4088 = vmatpush3.bf16.msra.mxu0 %v4505_v61  ;;  %v4514_v61 = vld [vmem:[%s6639_s4 + $0x48] ss:$12 sps:$4 sm:$0xff]  }
 0x764   :  { %4103 = vmatprep.mubr.bf16.mxu0 %v5290_v39  ;;  %2014 = vmatprep.subr.bf16.mxu1 %v4508_v6 }
 0x765   :  { %4089 = vmatprep.subr.bf16.mxu0 %v4509_v27  ;;  %2044 = vmatprep.mubr.bf16.mxu1 %v6662_v59 }
 0x767   :  { %2015 = vmatpush1.bf16.msra.mxu1 %v4506_v12  ;;  %4090 = vmatpush3.bf16.msra.mxu0 %v4509_v27 }
 0x768   :  { %2016 = vmatprep.subr.bf16.mxu1 %v4512_v13  ;;  %4091 = vmatprep.subr.bf16.mxu0 %v4513_v1 }
 0x76b   :  { %2017 = vmatpush1.bf16.msra.mxu1 %v4510_v18  ;;  %4092 = vmatpush3.bf16.msra.mxu0 %v4513_v1 }
 0x76c   :  { %2018 = vmatprep.subr.bf16.mxu1 %v4516_v24  ;;  %4093 = vmatprep.subr.bf16.mxu0 %v4517_v0 }
 0x76f   :  { %2019 = vmatpush1.bf16.msra.mxu1 %v4514_v61  ;;  %4094 = vmatpush3.bf16.msra.mxu0 %v4517_v0 }
 0x770   :  { %2020 = vmatprep.subr.bf16.mxu1 %v4520_v60  ;;  %4095 = vmatprep.subr.bf16.mxu0 %v4521_v22 }
 0x773   :  { %2021 = vmatpush1.bf16.msra.mxu1 %v4518_v15  ;;  %4096 = vmatpush3.bf16.msra.mxu0 %v4521_v22 }
 0x774   :  { %2022 = vmatprep.subr.bf16.mxu1 %v4524_v17  ;;  %4097 = vmatprep.subr.bf16.mxu0 %v4525_v30  ;;  %v6663_v17 = vld [vmem:[#allocation5_spill] sm:$0xff] }
 0x777   :  { %2023 = vmatpush1.bf16.msra.mxu1 %v4522_v10  ;;  %4098 = vmatpush3.bf16.msra.mxu0 %v4525_v30 }
 0x778   :  { %2024 = vmatprep.subr.bf16.mxu1 %v4528_v21  ;;  %4099 = vmatprep.subr.bf16.mxu0 %v4529_v28 }
 0x77b   :  { %2025 = vmatpush1.bf16.msra.mxu1 %v4526_v31  ;;  %4100 = vmatpush3.bf16.msra.mxu0 %v4529_v28 }
 0x77c   :  { %2026 = vmatprep.subr.bf16.mxu1 %v4532_v32  ;;  %4101 = vmatprep.subr.bf16.mxu0 %v4533_v34 }
 0x77f   :  { %2027 = vmatpush1.bf16.msra.mxu1 %v4530_v35  ;;  %4102 = vmatpush3.bf16.msra.mxu0 %v4533_v34 }
 0x780   :  { %2440 = vmatprep.subr.bf16.mxu1 %v5824_v37  ;;  %4119 = vmatprep.subr.bf16.mxu0 %v6661_v58 }
 0x782   :  { %2045 = vmatmul.mubr.bf16.vlgmr.msra.gmra.mrb[48].mxu1 %v5290_v39  ;;  %4104 = vmatmul.mubr.bf16.vlgmr.msra.gmra.mrb[32].mxu0 %v5345_v7  ;;  %v5869_v39 = vld [vmem:[%s6640_s6 + $0x34] ss:$12 sps:$4 sm:$0xff]  }
 0x783   :  { %4107 = vmatprep.mubr.bf16.mxu0 %v5400_v16  ;;  %2054 = vmatprep.mubr.bf16.mxu1 %v6662_v59 }
 0x784   :  { %2441 = vmatpush1.bf16.msra.mxu1 %v5830_v38 }
 0x785   :  { %2442 = vmatprep.subr.bf16.mxu1 %v5836_v40 }
 0x788   :  { %2443 = vmatpush1.bf16.msra.mxu1 %v5846_v41 }
 0x789   :  { %2444 = vmatprep.subr.bf16.mxu1 %v5869_v39 }
 0x78a   :  { %2055 = vmatmul.mubr.bf16.gmra.mrb[52].mxu1 %v5345_v7  ;;  %4108 = vmatmul.mubr.bf16.gmra.mrb[36].mxu0 %v5455_v14  ;;  %v5874_v7 = vld [vmem:[%s6640_s6 + $0x30] ss:$12 sps:$4 sm:$0xff]  }
 0x78b   :  { %4111 = vmatprep.mubr.bf16.mxu0 %v5525_v29  ;;  %2064 = vmatprep.mubr.bf16.mxu1 %v6662_v59 }
 0x78c   :  { %2445 = vmatpush1.bf16.msra.mxu1 %v5874_v7 }
 0x792   :  { %2065 = vmatmul.mubr.bf16.gmra.mrb[56].mxu1 %v5400_v16  ;;  %4112 = vmatmul.mubr.bf16.gmra.mrb[40].mxu0 %v5685_v23  ;;  %v5881_v16 = vld [vmem:[%s6640_s6 + $0x4c] ss:$12 sps:$4 sm:$0xff]  }
 0x793   :  { %4115 = vmatprep.mubr.bf16.mxu0 %v5752_v62  ;;  %2074 = vmatprep.mubr.bf16.mxu1 %v6662_v59 }
 0x794   :  { %2446 = vmatprep.subr.bf16.mxu1 %v5881_v16 }
 0x79a   :  { %2075 = vmatmul.mubr.bf16.gmra.mrb[60].mxu1 %v5455_v14  ;;  %v5886_v14 = vld [vmem:[%s6640_s6 + $0x48] ss:$12 sps:$4 sm:$0xff]  }
 0x79b   :  { %2084 = vmatprep.mubr.bf16.mxu1 %v6662_v59  ;;  %2447 = vmatpush1.bf16.msra.mxu1 %v5886_v14 }
 0x7a2   :  { %2085 = vmatmul.mubr.bf16.gmra.mrb[64].mxu1 %v5525_v29  ;;  %v5893_v29 = vld [vmem:[%s6640_s6 + $0x8] ss:$12 sps:$4 sm:$0xff]  }
 0x7a3   :  { %2094 = vmatprep.mubr.bf16.mxu1 %v6662_v59  ;;  %4120 = vmatpush3.bf16.msra.mxu0 %v5893_v29 }
 0x7a4   :  { %4121 = vmatprep.subr.bf16.mxu0 %v6661_v58 }
 0x7a7   :  { %4122 = vmatpush3.bf16.msra.mxu0 %v5927_v49 }
 0x7a8   :  { %4123 = vmatprep.subr.bf16.mxu0 %v6661_v58 }
 0x7aa   :  { %2095 = vmatmul.mubr.bf16.gmra.mrb[68].mxu1 %v5685_v23  ;;  %v5898_v23 = vld [vmem:[%s6640_s6 + $0x64] ss:$12 sps:$4 sm:$0xff]  }
 0x7ab   :  { %2104 = vmatprep.mubr.bf16.mxu1 %v6662_v59  ;;  %2448 = vmatprep.subr.bf16.mxu1 %v5898_v23 }
 0x7ac   :  { %2449 = vmatpush1.bf16.msra.mxu1 %v5903_v42  ;;  %4124 = vmatpush3.bf16.msra.mxu0 %v5941_v3 }
 0x7ad   :  { %2450 = vmatprep.subr.bf16.mxu1 %v5912_v43  ;;  %4125 = vmatprep.subr.bf16.mxu0 %v6661_v58 }
 0x7b0   :  { %2451 = vmatpush1.bf16.msra.mxu1 %v5917_v45  ;;  %4126 = vmatpush3.bf16.msra.mxu0 %v5960_v2 }
 0x7b1   :  { %2452 = vmatprep.subr.bf16.mxu1 %v5922_v46  ;;  %4127 = vmatprep.subr.bf16.mxu0 %v6661_v58 }
 0x7b2   :  { %2105 = vmatmul.mubr.bf16.gmra.mrb[72].mxu1 %v5752_v62 }
 0x7b3   :  { %2114 = vmatprep.mubr.bf16.mxu1 %v6662_v59 }
 0x7b4   :  { %2453 = vmatpush1.bf16.msra.mxu1 %v5935_v50  ;;  %4128 = vmatpush3.bf16.msra.mxu0 %v5969_v36 }
 0x7b5   :  { %2454 = vmatprep.subr.bf16.mxu1 %v5947_v33  ;;  %4129 = vmatprep.subr.bf16.mxu0 %v6661_v58 }
 0x7b8   :  { %2455 = vmatpush1.bf16.msra.mxu1 %v5954_v4  ;;  %4130 = vmatpush3.bf16.msra.mxu0 %v5976_v63 }
 0x7b9   :  { %2573 = vmatprep.subr.bf16.mxu1 %v5824_v37  ;;  %4131 = vmatprep.subr.bf16.mxu0 %v6661_v58 }
 0x7bc   :  { %4132 = vmatpush3.bf16.msra.mxu0 %v5983_v48 }
 0x7bd   :  { %4133 = vmatprep.subr.bf16.mxu0 %v6661_v58 }
 0x7c0   :  { %4134 = vmatpush3.bf16.msra.mxu0 %v5990_v25 }
 0x7c1   :  { %4139 = vmatprep.subr.bf16.mxu0 %v6661_v58 }
 0x835   :  { %v1732_v52 = vpop.f32.mrb[28].mxu0  ;;  %v1775_v20 = vpop.f32.mrb[44].mxu1 }
 0x836   :  { %v4327_v51 = vadd.f32 %v1732_v52, %v5262_v11  ;;  %v1734_v55 = vpop.f32.mrb[29].mxu0  ;;  %v4085_v57 = vpop.f32.mrb[45].mxu1  ;;  %v1802_v61 = vadd.f32 %v5735_v47, %v1775_v20 }
 0x837   :  { %v1736_v5 = vpop.f32.mrb[30].mxu0  ;;  %v1778_v19 = vpop.f32.mrb[46].mxu1  ;;  %v4328_v6 = vadd.f32 %v1734_v55, %v5269_v53 }
 0x838   :  { %v1784_v8 = vmul.f32 0.5, %v4327_v51  ;;  %v4329_v9 = vadd.f32 %v1736_v5, %v5262_v11  ;;  %v1738_v44 = vpop.f32.mrb[31].mxu0  ;;  %v4086_v56 = vpop.f32.mrb[47].mxu1  ;;  %v1803_v15 = vadd.f32 %v5735_v47, %v1778_v19 }
 0x839   :  { %v4330_v27 = vadd.f32 %v1738_v44, %v5269_v53  ;;  %v1794_v12 = vmul.f32 0.5, %v4328_v6  ;;  %v6664_v53 = vld [vmem:[#allocation6_spill] sm:$0xff] }
 0x83a   :  { %4658 = vtanh.f32 %v1784_v8  ;;  %v1785_v62 = vmul.f32 0.5, %v4329_v9 }
 0x83b   :  { %v1795_v18 = vmul.f32 0.5, %v4330_v27 }
 0x83c   :  { %4660 = vtanh.f32 %v1785_v62 }
 0x83d   :  { %4662 = vtanh.f32 %v1794_v12 }
 0x83e   :  { %4664 = vtanh.f32 %v1795_v18 }
 0x844   :  { %v4659_v13 = vpop.eup %4658 }
 0x845   :  { %v1788_v1 = vmul.f32 0.5, %v4659_v13 }
 0x846   :  { %v4661_v24 = vpop.eup %4660 }
 0x847   :  { %v1790_v0 = vadd.f32 0.5, %v1788_v1  ;;  %v1789_v60 = vmul.f32 0.5, %v4661_v24  ;;  %v4663_v28 = vpop.eup %4662  ;;  %v6036_v1 = vld [vmem:[%s6642_s2 + $0x8] sm:$0xff] }
 0x848   :  { %v4665_v31 = vpop.eup %4664  ;;  %v1798_v32 = vmul.f32 0.5, %v4663_v28 }
 0x849   :  { %v1804_v11 = vmul.f32 %v1802_v61, %v1790_v0  ;;  %v1791_v22 = vadd.f32 0.5, %v1789_v60  ;;  %v1799_v35 = vmul.f32 0.5, %v4665_v31 }
 0x84a   :  { %v1800_v47 = vadd.f32 0.5, %v1798_v32 }
 0x84b   :  { %v1806_v30 = vadd.f32 %v1804_v11, %v6663_v17  ;;  %v1805_v10 = vmul.f32 %v1803_v15, %v1791_v22  ;;  %v1801_v8 = vadd.f32 0.5, %v1799_v35 }
 0x84d   :  { %4666 = vtanh.f32 %v1806_v30  ;;  %v1807_v21 = vadd.f32 %v1805_v10, %v6664_v53  ;;  %v1867_v30 = vld [vmem:[%s6643_s8] sm:$0x7] }
 0x84e   :  { %v6668_v10 = vld [vmem:[#allocation4_spill] sm:$0xff] }
 0x84f   :  { %4668 = vtanh.f32 %v1807_v21  ;;  %v6669_v53 = vsub.s32 0, %v6668_v10 }
 0x851   :  { %v6098_v21 = vrot.slane %v1867_v30, %v6669_v53  ;;  %v6111_v53 = vld [vmem:[%s6644_s10] ss:$0 sm:$0xff] }
 0x855   :  { %v6003_v34 = vpop.f32.mrb[32].mxu0 }
 0x856   :  { %v6005_v52 = vpop.f32.mrb[33].mxu0 }
 0x857   :  { %v4667_v20 = vpop.eup %4666  ;;  %v6007_v51 = vpop.f32.mrb[34].mxu0 }
 0x858   :  { %v1810_v55 = vsub.f32 %v5743_v26, %v4667_v20  ;;  %v6010_v57 = vpop.f32.mrb[35].mxu0 }
 0x859   :  { %v4669_v5 = vpop.eup %4668 }
 0x85a   :  { %v1812_v19 = vmul.f32 %v1810_v55, %v1800_v47  ;;  %v1811_v9 = vsub.f32 %v5745_v54, %v4669_v5  ;;  %v6031_v54 = vld [vmem:[%s6642_s2] sm:$0xff] }
 0x85b   :  { %v2311_v0 = vpack.c.bf16 %v6036_v1, %v6031_v54 }
 0x85c   :  { %v1813_v44 = vmul.f32 %v1811_v9, %v1801_v8  ;;  %v1814_v56 = vadd.f32 %v4667_v20, %v1812_v19 }
 0x85d   :  { %v6013_v62 = vpop.f32.mrb[36].mxu0 }
 0x85e   :  { %v6015_v6 = vpop.f32.mrb[37].mxu0  ;;  %v1815_v27 = vadd.f32 %v4669_v5, %v1813_v44  ;;  %1825 = vst [vmem:[%s6641_s13] sm:$0xff] %v1814_v56 }
 0x85f   :  { %v6020_v12 = vpop.f32.mrb[38].mxu0 }
 0x860   :  { %v6022_v26 = vpop.f32.mrb[39].mxu0  ;;  %v1816_v13 = vpack.c.bf16 %v1815_v27, %v1814_v56  ;;  %1826 = vst [vmem:[%s6641_s13 + $0x8] sm:$0xff] %v1815_v27  ;;  %v6670_v56 = vsub.s32 1, %v6668_v10 }
 0x862   :  { %2115 = vmatmul.mubr.bf16.gmra.mrb[76].mxu1 %v1816_v13  ;;  %4116 = vmatmul.mubr.bf16.gmra.mrb[44].mxu0 %v1816_v13  ;;  %v6104_v27 = vrot.slane %v1867_v30, %v6670_v56 }
 0x863   :  { %2472 = vmatprep.mubr.bf16.mxu1 %v6662_v59  ;;  %4135 = vmatprep.mubr.msk.bf16.mxu0 %vm4818_vm0, %v6661_v58 }
 0x865   :  { %v6040_v18 = vpop.f32.mrb[40].mxu0 }
 0x866   :  { %v6042_v24 = vpop.f32.mrb[41].mxu0 }
 0x867   :  { %v6046_v61 = vpop.f32.mrb[42].mxu0 }
 0x868   :  { %v6048_v60 = vpop.f32.mrb[43].mxu0 }
 0x86a   :  { %2473 = vmatmul.mubr.bf16.vlgmr.msra.gmra.mrb[48].mxu1 %v2311_v0  ;;  %4136 = vmatmul.mubr.bf16.vlgmr.msra.gmra.mrb[48].mxu0 %v2311_v0 }
 0x86b   :  { %2574 = vmatpush1.bf16.msra.mxu1 %v5830_v38  ;;  %4140 = vmatpush3.bf16.msra.mxu0 %v5893_v29 }
 0x86c   :  { %2575 = vmatprep.subr.bf16.mxu1 %v5836_v40  ;;  %4141 = vmatprep.subr.bf16.mxu0 %v6661_v58 }
 0x86d   :  { %2605 = vmatprep.mubr.bf16.mxu1 %v6662_v59  ;;  %4155 = vmatprep.mubr.msk.bf16.mxu0 %vm4818_vm0, %v6661_v58 }
 0x86f   :  { %2576 = vmatpush1.bf16.msra.mxu1 %v5846_v41  ;;  %4142 = vmatpush3.bf16.msra.mxu0 %v5927_v49 }
 0x870   :  { %2577 = vmatprep.subr.bf16.mxu1 %v5869_v39  ;;  %4143 = vmatprep.subr.bf16.mxu0 %v6661_v58 }
 0x873   :  { %2578 = vmatpush1.bf16.msra.mxu1 %v5874_v7  ;;  %4144 = vmatpush3.bf16.msra.mxu0 %v5941_v3 }
 0x874   :  { %2579 = vmatprep.subr.bf16.mxu1 %v5881_v16  ;;  %4145 = vmatprep.subr.bf16.mxu0 %v6661_v58 }
 0x877   :  { %2580 = vmatpush1.bf16.msra.mxu1 %v5886_v14  ;;  %4146 = vmatpush3.bf16.msra.mxu0 %v5960_v2 }
 0x878   :  { %2581 = vmatprep.subr.bf16.mxu1 %v5898_v23  ;;  %4147 = vmatprep.subr.bf16.mxu0 %v6661_v58 }
 0x87b   :  { %2582 = vmatpush1.bf16.msra.mxu1 %v5903_v42  ;;  %4148 = vmatpush3.bf16.msra.mxu0 %v5969_v36 }
 0x87c   :  { %2583 = vmatprep.subr.bf16.mxu1 %v5912_v43  ;;  %4149 = vmatprep.subr.bf16.mxu0 %v6661_v58 }
 0x87f   :  { %2584 = vmatpush1.bf16.msra.mxu1 %v5917_v45  ;;  %4150 = vmatpush3.bf16.msra.mxu0 %v5976_v63 }
 0x880   :  { %2585 = vmatprep.subr.bf16.mxu1 %v5922_v46  ;;  %4151 = vmatprep.subr.bf16.mxu0 %v6661_v58 }
 0x883   :  { %2586 = vmatpush1.bf16.msra.mxu1 %v5935_v50  ;;  %4152 = vmatpush3.bf16.msra.mxu0 %v5983_v48 }
 0x884   :  { %2587 = vmatprep.subr.bf16.mxu1 %v5947_v33  ;;  %4153 = vmatprep.subr.bf16.mxu0 %v6661_v58 }
 0x887   :  { %2588 = vmatpush1.bf16.msra.mxu1 %v5954_v4  ;;  %4154 = vmatpush3.bf16.msra.mxu0 %v5990_v25 }
 0x888   :  { %2700 = vmatprep.subr.bf16.mxu1 %v5824_v37  ;;  %4159 = vmatprep.subr.bf16.mxu0 %v6661_v58 }
 0x935   :  { %v6085_v11 = vpop.f32.mrb[44].mxu0 }
 0x936   :  { %6665 = vst [vmem:[#allocation5_spill] sm:$0xff] %v6085_v11  ;;  %v6087_v22 = vpop.f32.mrb[45].mxu0 }
 0x937   :  { %v6089_v15 = vpop.f32.mrb[46].mxu0 }
 0x938   :  { %6666 = vst [vmem:[#allocation6_spill] sm:$0xff] %v6089_v15  ;;  %v6091_v17 = vpop.f32.mrb[47].mxu0 }
 0x939   :  { %6667 = vst [vmem:[#allocation7_spill] sm:$0xff] %v6091_v17 }
 0x93d   :  { %v2474_v28 = vpop.f32.mrb[48].mxu1  ;;  %v2517_v31 = vpop.f32.mrb[48].mxu0 }
 0x93e   :  { %v4331_v32 = vadd.f32 %v2474_v28, %v6098_v21  ;;  %v2476_v35 = vpop.f32.mrb[49].mxu1  ;;  %v4137_v20 = vpop.f32.mrb[49].mxu0 }
 0x93f   :  { %v2478_v47 = vpop.f32.mrb[50].mxu1  ;;  %v2520_v55 = vpop.f32.mrb[50].mxu0  ;;  %v4332_v13 = vadd.f32 %v2476_v35, %v6104_v27  ;;  %v6671_v20 = vsub.s32 2, %v6668_v10 }
 0x940   :  { %v2526_v5 = vmul.f32 0.5, %v4331_v32  ;;  %v4333_v19 = vadd.f32 %v2478_v47, %v6098_v21  ;;  %v2480_v8 = vpop.f32.mrb[51].mxu1  ;;  %v4138_v9 = vpop.f32.mrb[51].mxu0 }
 0x941   :  { %v4334_v0 = vadd.f32 %v2480_v8, %v6104_v27  ;;  %v2536_v28 = vmul.f32 0.5, %v4332_v13  ;;  %v6115_v47 = vrot.slane %v1867_v30, %v6671_v20  ;;  %v2550_v9 = vadd.f32 %v6111_v53, %v2517_v31 }
 0x942   :  { %4670 = vtanh.f32 %v2526_v5  ;;  %v2527_v44 = vmul.f32 0.5, %v4333_v19  ;;  %v2551_v13 = vadd.f32 %v6111_v53, %v2520_v55 }
 0x943   :  { %v2537_v19 = vmul.f32 0.5, %v4334_v0  ;;  %v2160_v8 = vadd.f32 %v6005_v52, %v6115_v47  ;;  %v2163_v30 = vadd.f32 %v6010_v57, %v6115_v47 }
 0x944   :  { %4672 = vtanh.f32 %v2527_v44 }
 0x945   :  { %4674 = vtanh.f32 %v2536_v28 }
 0x946   :  { %4676 = vtanh.f32 %v2537_v19 }
 0x94c   :  { %v4671_v32 = vpop.eup %4670 }
 0x94d   :  { %v2530_v5 = vmul.f32 0.5, %v4671_v32 }
 0x94e   :  { %v4673_v44 = vpop.eup %4672 }
 0x94f   :  { %v2531_v35 = vmul.f32 0.5, %v4673_v44  ;;  %v2532_v56 = vadd.f32 0.5, %v2530_v5  ;;  %v4675_v31 = vpop.eup %4674 }
 0x950   :  { %v4677_v28 = vpop.eup %4676  ;;  %v2540_v20 = vmul.f32 0.5, %v4675_v31 }
 0x951   :  { %v2552_v15 = vmul.f32 %v2550_v9, %v2532_v56  ;;  %v2533_v11 = vadd.f32 0.5, %v2531_v35  ;;  %v2541_v5 = vmul.f32 0.5, %v4677_v28 }
 0x952   :  { %v2542_v17 = vadd.f32 0.5, %v2540_v20 }
 0x953   :  { %v2554_v10 = vadd.f32 %v2552_v15, %v2160_v8  ;;  %v2553_v32 = vmul.f32 %v2551_v13, %v2533_v11  ;;  %v2543_v9 = vadd.f32 0.5, %v2541_v5 }
 0x955   :  { %4678 = vtanh.f32 %v2554_v10  ;;  %v2555_v0 = vadd.f32 %v2553_v32, %v2163_v30 }
 0x957   :  { %4680 = vtanh.f32 %v2555_v0 }
 0x95f   :  { %v4679_v44 = vpop.eup %4678 }
 0x960   :  { %v2558_v52 = vsub.f32 %v6031_v54, %v4679_v44 }
 0x961   :  { %v4681_v19 = vpop.eup %4680 }
 0x962   :  { %v2559_v55 = vsub.f32 %v6036_v1, %v4681_v19  ;;  %v2560_v35 = vmul.f32 %v2558_v52, %v2542_v17 }
 0x964   :  { %v2561_v56 = vmul.f32 %v2559_v55, %v2543_v9  ;;  %v6125_v57 = vadd.f32 %v4679_v44, %v2560_v35 }
 0x966   :  { %v6127_v11 = vadd.f32 %v4681_v19, %v2561_v56 }
 0x968   :  { %v2572_v15 = vpack.c.bf16 %v6127_v11, %v6125_v57 }
 0x96a   :  { %2606 = vmatmul.mubr.bf16.vlgmr.msra.gmra.mrb[52].mxu1 %v2572_v15  ;;  %4156 = vmatmul.mubr.bf16.vlgmr.msra.gmra.mrb[52].mxu0 %v2572_v15 }
 0x96b   :  { %2701 = vmatpush1.bf16.msra.mxu1 %v5830_v38  ;;  %4160 = vmatpush3.bf16.msra.mxu0 %v5893_v29 }
 0x96c   :  { %2702 = vmatprep.subr.bf16.mxu1 %v5836_v40  ;;  %4161 = vmatprep.subr.bf16.mxu0 %v6661_v58 }
 0x96d   :  { %2732 = vmatprep.mubr.bf16.mxu1 %v6662_v59  ;;  %4175 = vmatprep.mubr.msk.bf16.mxu0 %vm4818_vm0, %v6661_v58 }
 0x96f   :  { %2703 = vmatpush1.bf16.msra.mxu1 %v5846_v41  ;;  %4162 = vmatpush3.bf16.msra.mxu0 %v5927_v49 }
 0x970   :  { %2704 = vmatprep.subr.bf16.mxu1 %v5869_v39  ;;  %4163 = vmatprep.subr.bf16.mxu0 %v6661_v58 }
 0x973   :  { %2705 = vmatpush1.bf16.msra.mxu1 %v5874_v7  ;;  %4164 = vmatpush3.bf16.msra.mxu0 %v5941_v3 }
 0x974   :  { %2706 = vmatprep.subr.bf16.mxu1 %v5881_v16  ;;  %4165 = vmatprep.subr.bf16.mxu0 %v6661_v58 }
 0x977   :  { %2707 = vmatpush1.bf16.msra.mxu1 %v5886_v14  ;;  %4166 = vmatpush3.bf16.msra.mxu0 %v5960_v2 }
 0x978   :  { %2708 = vmatprep.subr.bf16.mxu1 %v5898_v23  ;;  %4167 = vmatprep.subr.bf16.mxu0 %v6661_v58 }
 0x97b   :  { %2709 = vmatpush1.bf16.msra.mxu1 %v5903_v42  ;;  %4168 = vmatpush3.bf16.msra.mxu0 %v5969_v36 }
 0x97c   :  { %2710 = vmatprep.subr.bf16.mxu1 %v5912_v43  ;;  %4169 = vmatprep.subr.bf16.mxu0 %v6661_v58 }
 0x97f   :  { %2711 = vmatpush1.bf16.msra.mxu1 %v5917_v45  ;;  %4170 = vmatpush3.bf16.msra.mxu0 %v5976_v63 }
 0x980   :  { %2712 = vmatprep.subr.bf16.mxu1 %v5922_v46  ;;  %4171 = vmatprep.subr.bf16.mxu0 %v6661_v58 }
 0x983   :  { %2713 = vmatpush1.bf16.msra.mxu1 %v5935_v50  ;;  %4172 = vmatpush3.bf16.msra.mxu0 %v5983_v48 }
 0x984   :  { %2714 = vmatprep.subr.bf16.mxu1 %v5947_v33  ;;  %4173 = vmatprep.subr.bf16.mxu0 %v6661_v58 }
 0x987   :  { %2715 = vmatpush1.bf16.msra.mxu1 %v5954_v4  ;;  %4174 = vmatpush3.bf16.msra.mxu0 %v5990_v25 }
 0x988   :  { %2827 = vmatprep.subr.bf16.mxu1 %v5824_v37  ;;  %4179 = vmatprep.subr.bf16.mxu0 %v6661_v58 }
 0xa3d   :  { %v2607_v54 = vpop.f32.mrb[52].mxu1  ;;  %v2650_v1 = vpop.f32.mrb[52].mxu0 }
 0xa3e   :  { %v4335_v17 = vadd.f32 %v2607_v54, %v6098_v21  ;;  %v2609_v8 = vpop.f32.mrb[53].mxu1  ;;  %v4157_v13 = vpop.f32.mrb[53].mxu0  ;;  %v2677_v15 = vadd.f32 %v6111_v53, %v2650_v1 }
 0xa3f   :  { %v2611_v30 = vpop.f32.mrb[54].mxu1  ;;  %v2653_v10 = vpop.f32.mrb[54].mxu0  ;;  %v4336_v5 = vadd.f32 %v2609_v8, %v6104_v27  ;;  %v2171_v8 = vadd.f32 %v6007_v51, %v6115_v47 }
 0xa40   :  { %v2659_v32 = vmul.f32 0.5, %v4335_v17  ;;  %v4337_v0 = vadd.f32 %v2611_v30, %v6098_v21  ;;  %v2613_v31 = vpop.f32.mrb[55].mxu1  ;;  %v4158_v28 = vpop.f32.mrb[55].mxu0  ;;  %v2168_v17 = vadd.f32 %v6003_v34, %v6115_v47 }
 0xa41   :  { %v4338_v44 = vadd.f32 %v2613_v31, %v6104_v27  ;;  %v2669_v52 = vmul.f32 0.5, %v4336_v5 }
 0xa42   :  { %4682 = vtanh.f32 %v2659_v32  ;;  %v2660_v20 = vmul.f32 0.5, %v4337_v0  ;;  %v2678_v32 = vadd.f32 %v6111_v53, %v2653_v10 }
 0xa43   :  { %v2670_v55 = vmul.f32 0.5, %v4338_v44 }
 0xa44   :  { %4684 = vtanh.f32 %v2660_v20 }
 0xa45   :  { %4686 = vtanh.f32 %v2669_v52 }
 0xa46   :  { %4688 = vtanh.f32 %v2670_v55 }
 0xa4c   :  { %v4683_v19 = vpop.eup %4682 }
 0xa4d   :  { %v2663_v9 = vmul.f32 0.5, %v4683_v19 }
 0xa4e   :  { %v4685_v35 = vpop.eup %4684 }
 0xa4f   :  { %v2665_v56 = vadd.f32 0.5, %v2663_v9  ;;  %v2664_v54 = vmul.f32 0.5, %v4685_v35  ;;  %v4687_v20 = vpop.eup %4686 }
 0xa50   :  { %v4689_v1 = vpop.eup %4688  ;;  %v2673_v5 = vmul.f32 0.5, %v4687_v20 }
 0xa51   :  { %v2679_v13 = vmul.f32 %v2677_v15, %v2665_v56  ;;  %v2666_v30 = vadd.f32 0.5, %v2664_v54  ;;  %v2674_v44 = vmul.f32 0.5, %v4689_v1 }
 0xa52   :  { %v2675_v19 = vadd.f32 0.5, %v2673_v5 }
 0xa53   :  { %v2681_v0 = vadd.f32 %v2679_v13, %v2168_v17  ;;  %v2680_v31 = vmul.f32 %v2678_v32, %v2666_v30  ;;  %v2676_v10 = vadd.f32 0.5, %v2674_v44 }
 0xa55   :  { %4690 = vtanh.f32 %v2681_v0  ;;  %v2682_v28 = vadd.f32 %v2680_v31, %v2171_v8 }
 0xa57   :  { %4692 = vtanh.f32 %v2682_v28 }
 0xa5f   :  { %v4691_v52 = vpop.eup %4690 }
 0xa60   :  { %v2685_v34 = vsub.f32 %v6125_v57, %v4691_v52 }
 0xa61   :  { %v4693_v9 = vpop.eup %4692 }
 0xa62   :  { %v2687_v35 = vmul.f32 %v2685_v34, %v2675_v19  ;;  %v2686_v55 = vsub.f32 %v6127_v11, %v4693_v9 }
 0xa64   :  { %v6178_v56 = vadd.f32 %v4691_v52, %v2687_v35  ;;  %v2688_v51 = vmul.f32 %v2686_v55, %v2676_v10 }
 0xa66   :  { %v6180_v15 = vadd.f32 %v4693_v9, %v2688_v51 }
 0xa68   :  { %v2699_v54 = vpack.c.bf16 %v6180_v15, %v6178_v56 }
 0xa6a   :  { %2733 = vmatmul.mubr.bf16.vlgmr.msra.gmra.mrb[56].mxu1 %v2699_v54  ;;  %4176 = vmatmul.mubr.bf16.vlgmr.msra.gmra.mrb[56].mxu0 %v2699_v54  ;;  %v2176_v54 = vadd.f32 %v6015_v6, %v6115_v47 }
 0xa6b   :  { %2828 = vmatpush1.bf16.msra.mxu1 %v5830_v38  ;;  %4180 = vmatpush3.bf16.msra.mxu0 %v5893_v29 }
 0xa6c   :  { %2829 = vmatprep.subr.bf16.mxu1 %v5836_v40  ;;  %4181 = vmatprep.subr.bf16.mxu0 %v6661_v58 }
 0xa6d   :  { %2859 = vmatprep.mubr.bf16.mxu1 %v6662_v59  ;;  %4195 = vmatprep.mubr.msk.bf16.mxu0 %vm4818_vm0, %v6661_v58 }
 0xa6f   :  { %2830 = vmatpush1.bf16.msra.mxu1 %v5846_v41  ;;  %4182 = vmatpush3.bf16.msra.mxu0 %v5927_v49 }
 0xa70   :  { %2831 = vmatprep.subr.bf16.mxu1 %v5869_v39  ;;  %4183 = vmatprep.subr.bf16.mxu0 %v6661_v58 }
 0xa73   :  { %2832 = vmatpush1.bf16.msra.mxu1 %v5874_v7  ;;  %4184 = vmatpush3.bf16.msra.mxu0 %v5941_v3 }
 0xa74   :  { %2833 = vmatprep.subr.bf16.mxu1 %v5881_v16  ;;  %4185 = vmatprep.subr.bf16.mxu0 %v6661_v58 }
 0xa77   :  { %2834 = vmatpush1.bf16.msra.mxu1 %v5886_v14  ;;  %4186 = vmatpush3.bf16.msra.mxu0 %v5960_v2 }
 0xa78   :  { %2835 = vmatprep.subr.bf16.mxu1 %v5898_v23  ;;  %4187 = vmatprep.subr.bf16.mxu0 %v6661_v58 }
 0xa7b   :  { %2836 = vmatpush1.bf16.msra.mxu1 %v5903_v42  ;;  %4188 = vmatpush3.bf16.msra.mxu0 %v5969_v36 }
 0xa7c   :  { %2837 = vmatprep.subr.bf16.mxu1 %v5912_v43  ;;  %4189 = vmatprep.subr.bf16.mxu0 %v6661_v58 }
 0xa7f   :  { %2838 = vmatpush1.bf16.msra.mxu1 %v5917_v45  ;;  %4190 = vmatpush3.bf16.msra.mxu0 %v5976_v63 }
 0xa80   :  { %2839 = vmatprep.subr.bf16.mxu1 %v5922_v46  ;;  %4191 = vmatprep.subr.bf16.mxu0 %v6661_v58 }
 0xa83   :  { %2840 = vmatpush1.bf16.msra.mxu1 %v5935_v50  ;;  %4192 = vmatpush3.bf16.msra.mxu0 %v5983_v48 }
 0xa84   :  { %2841 = vmatprep.subr.bf16.mxu1 %v5947_v33  ;;  %4193 = vmatprep.subr.bf16.mxu0 %v6661_v58 }
 0xa87   :  { %2842 = vmatpush1.bf16.msra.mxu1 %v5954_v4  ;;  %4194 = vmatpush3.bf16.msra.mxu0 %v5990_v25 }
 0xa88   :  { %2954 = vmatprep.subr.bf16.mxu1 %v5824_v37  ;;  %4199 = vmatprep.subr.bf16.mxu0 %v6661_v58 }
 0xb3d   :  { %v2734_v57 = vpop.f32.mrb[56].mxu1  ;;  %v2777_v11 = vpop.f32.mrb[56].mxu0 }
 0xb3e   :  { %v4339_v17 = vadd.f32 %v2734_v57, %v6098_v21  ;;  %v2736_v13 = vpop.f32.mrb[57].mxu1  ;;  %v4177_v30 = vpop.f32.mrb[57].mxu0  ;;  %v2804_v55 = vadd.f32 %v6111_v53, %v2777_v11 }
 0xb3f   :  { %v2738_v32 = vpop.f32.mrb[58].mxu1  ;;  %v2780_v8 = vpop.f32.mrb[58].mxu0  ;;  %v4340_v5 = vadd.f32 %v2736_v13, %v6104_v27  ;;  %v2179_v13 = vadd.f32 %v6022_v26, %v6115_v47 }
 0xb40   :  { %v2786_v0 = vmul.f32 0.5, %v4339_v17  ;;  %v4341_v31 = vadd.f32 %v2738_v32, %v6098_v21  ;;  %v2740_v28 = vpop.f32.mrb[59].mxu1  ;;  %v4178_v20 = vpop.f32.mrb[59].mxu0  ;;  %v2805_v30 = vadd.f32 %v6111_v53, %v2780_v8 }
 0xb41   :  { %v4342_v44 = vadd.f32 %v2740_v28, %v6104_v27  ;;  %v2796_v52 = vmul.f32 0.5, %v4340_v5 }
 0xb42   :  { %4694 = vtanh.f32 %v2786_v0  ;;  %v2787_v1 = vmul.f32 0.5, %v4341_v31 }
 0xb43   :  { %v2797_v9 = vmul.f32 0.5, %v4342_v44 }
 0xb44   :  { %4696 = vtanh.f32 %v2787_v1 }
 0xb45   :  { %4698 = vtanh.f32 %v2796_v52 }
 0xb46   :  { %4700 = vtanh.f32 %v2797_v9 }
 0xb4c   :  { %v4695_v19 = vpop.eup %4694 }
 0xb4d   :  { %v2790_v34 = vmul.f32 0.5, %v4695_v19 }
 0xb4e   :  { %v4697_v35 = vpop.eup %4696 }
 0xb4f   :  { %v2792_v10 = vadd.f32 0.5, %v2790_v34  ;;  %v2791_v51 = vmul.f32 0.5, %v4697_v35  ;;  %v4699_v28 = vpop.eup %4698 }
 0xb50   :  { %v4701_v11 = vpop.eup %4700  ;;  %v2800_v20 = vmul.f32 0.5, %v4699_v28 }
 0xb51   :  { %v2806_v57 = vmul.f32 %v2804_v55, %v2792_v10  ;;  %v2793_v17 = vadd.f32 0.5, %v2791_v51  ;;  %v2801_v1 = vmul.f32 0.5, %v4701_v11 }
 0xb52   :  { %v2802_v44 = vadd.f32 0.5, %v2800_v20 }
 0xb53   :  { %v2808_v32 = vadd.f32 %v2806_v57, %v2176_v54  ;;  %v2807_v0 = vmul.f32 %v2805_v30, %v2793_v17  ;;  %v2803_v8 = vadd.f32 0.5, %v2801_v1 }
 0xb55   :  { %4702 = vtanh.f32 %v2808_v32  ;;  %v2809_v31 = vadd.f32 %v2807_v0, %v2179_v13 }
 0xb57   :  { %4704 = vtanh.f32 %v2809_v31 }
 0xb5f   :  { %v4703_v5 = vpop.eup %4702 }
 0xb60   :  { %v2812_v6 = vsub.f32 %v6178_v56, %v4703_v5 }
 0xb61   :  { %v4705_v52 = vpop.eup %4704 }
 0xb62   :  { %v2814_v19 = vmul.f32 %v2812_v6, %v2802_v44  ;;  %v2813_v34 = vsub.f32 %v6180_v15, %v4705_v52 }
 0xb64   :  { %v6231_v9 = vadd.f32 %v4703_v5, %v2814_v19  ;;  %v2815_v26 = vmul.f32 %v2813_v34, %v2803_v8  ;;  %v2184_v8 = vadd.f32 %v6013_v62, %v6115_v47 }
 0xb66   :  { %v6233_v35 = vadd.f32 %v4705_v52, %v2815_v26 }
 0xb68   :  { %v2826_v10 = vpack.c.bf16 %v6233_v35, %v6231_v9 }
 0xb6a   :  { %2860 = vmatmul.mubr.bf16.vlgmr.msra.gmra.mrb[60].mxu1 %v2826_v10  ;;  %4196 = vmatmul.mubr.bf16.vlgmr.msra.gmra.mrb[60].mxu0 %v2826_v10 }
 0xb6b   :  { %2955 = vmatpush1.bf16.msra.mxu1 %v5830_v38  ;;  %4200 = vmatpush3.bf16.msra.mxu0 %v5893_v29 }
 0xb6c   :  { %2956 = vmatprep.subr.bf16.mxu1 %v5836_v40  ;;  %4201 = vmatprep.subr.bf16.mxu0 %v6661_v58 }
 0xb6d   :  { %2986 = vmatprep.mubr.bf16.mxu1 %v6662_v59  ;;  %4215 = vmatprep.mubr.msk.bf16.mxu0 %vm4818_vm0, %v6661_v58 }
 0xb6f   :  { %2957 = vmatpush1.bf16.msra.mxu1 %v5846_v41  ;;  %4202 = vmatpush3.bf16.msra.mxu0 %v5927_v49 }
 0xb70   :  { %2958 = vmatprep.subr.bf16.mxu1 %v5869_v39  ;;  %4203 = vmatprep.subr.bf16.mxu0 %v6661_v58 }
 0xb73   :  { %2959 = vmatpush1.bf16.msra.mxu1 %v5874_v7  ;;  %4204 = vmatpush3.bf16.msra.mxu0 %v5941_v3 }
 0xb74   :  { %2960 = vmatprep.subr.bf16.mxu1 %v5881_v16  ;;  %4205 = vmatprep.subr.bf16.mxu0 %v6661_v58 }
 0xb77   :  { %2961 = vmatpush1.bf16.msra.mxu1 %v5886_v14  ;;  %4206 = vmatpush3.bf16.msra.mxu0 %v5960_v2 }
 0xb78   :  { %2962 = vmatprep.subr.bf16.mxu1 %v5898_v23  ;;  %4207 = vmatprep.subr.bf16.mxu0 %v6661_v58 }
 0xb7b   :  { %2963 = vmatpush1.bf16.msra.mxu1 %v5903_v42  ;;  %4208 = vmatpush3.bf16.msra.mxu0 %v5969_v36 }
 0xb7c   :  { %2964 = vmatprep.subr.bf16.mxu1 %v5912_v43  ;;  %4209 = vmatprep.subr.bf16.mxu0 %v6661_v58 }
 0xb7f   :  { %2965 = vmatpush1.bf16.msra.mxu1 %v5917_v45  ;;  %4210 = vmatpush3.bf16.msra.mxu0 %v5976_v63 }
 0xb80   :  { %2966 = vmatprep.subr.bf16.mxu1 %v5922_v46  ;;  %4211 = vmatprep.subr.bf16.mxu0 %v6661_v58 }
 0xb83   :  { %2967 = vmatpush1.bf16.msra.mxu1 %v5935_v50  ;;  %4212 = vmatpush3.bf16.msra.mxu0 %v5983_v48 }
 0xb84   :  { %2968 = vmatprep.subr.bf16.mxu1 %v5947_v33  ;;  %4213 = vmatprep.subr.bf16.mxu0 %v6661_v58 }
 0xb87   :  { %2969 = vmatpush1.bf16.msra.mxu1 %v5954_v4  ;;  %4214 = vmatpush3.bf16.msra.mxu0 %v5990_v25 }
 0xb88   :  { %3081 = vmatprep.subr.bf16.mxu1 %v5824_v37  ;;  %4219 = vmatprep.subr.bf16.mxu0 %v6661_v58 }
 0xc3d   :  { %v2861_v56 = vpop.f32.mrb[60].mxu1  ;;  %v2904_v15 = vpop.f32.mrb[60].mxu0 }
 0xc3e   :  { %v4343_v55 = vadd.f32 %v2861_v56, %v6098_v21  ;;  %v2863_v51 = vpop.f32.mrb[61].mxu1  ;;  %v4197_v54 = vpop.f32.mrb[61].mxu0  ;;  %v2931_v52 = vadd.f32 %v6111_v53, %v2904_v15  ;;  %v2187_v56 = vadd.f32 %v6020_v12, %v6115_v47 }
 0xc3f   :  { %v2865_v57 = vpop.f32.mrb[62].mxu1  ;;  %v2907_v17 = vpop.f32.mrb[62].mxu0  ;;  %v4344_v37 = vadd.f32 %v2863_v51, %v6104_v27 }
 0xc40   :  { %v2913_v30 = vmul.f32 0.5, %v4343_v55  ;;  %v4345_v13 = vadd.f32 %v2865_v57, %v6098_v21  ;;  %v2867_v32 = vpop.f32.mrb[63].mxu1  ;;  %v4198_v0 = vpop.f32.mrb[63].mxu0  ;;  %v2932_v10 = vadd.f32 %v6111_v53, %v2907_v17 }
 0xc41   :  { %v4346_v28 = vadd.f32 %v2867_v32, %v6104_v27  ;;  %v2923_v11 = vmul.f32 0.5, %v4344_v37 }
 0xc42   :  { %4706 = vtanh.f32 %v2913_v30  ;;  %v2914_v31 = vmul.f32 0.5, %v4345_v13 }
 0xc43   :  { %v2924_v5 = vmul.f32 0.5, %v4346_v28 }
 0xc44   :  { %4708 = vtanh.f32 %v2914_v31 }
 0xc45   :  { %4710 = vtanh.f32 %v2923_v11 }
 0xc46   :  { %4712 = vtanh.f32 %v2924_v5 }
 0xc4c   :  { %v4707_v20 = vpop.eup %4706 }
 0xc4d   :  { %v2917_v1 = vmul.f32 0.5, %v4707_v20 }
 0xc4e   :  { %v4709_v44 = vpop.eup %4708 }
 0xc4f   :  { %v2919_v6 = vadd.f32 0.5, %v2917_v1  ;;  %v2918_v19 = vmul.f32 0.5, %v4709_v44  ;;  %v4711_v57 = vpop.eup %4710 }
 0xc50   :  { %v4713_v15 = vpop.eup %4712  ;;  %v2927_v30 = vmul.f32 0.5, %v4711_v57 }
 0xc51   :  { %v2933_v34 = vmul.f32 %v2931_v52, %v2919_v6  ;;  %v2920_v26 = vadd.f32 0.5, %v2918_v19  ;;  %v2928_v13 = vmul.f32 0.5, %v4713_v15  ;;  %v2195_v6 = vadd.f32 %v6048_v60, %v6115_v47 }
 0xc52   :  { %v2929_v0 = vadd.f32 0.5, %v2927_v30 }
 0xc53   :  { %v2935_v55 = vadd.f32 %v2933_v34, %v2184_v8  ;;  %v2934_v51 = vmul.f32 %v2932_v10, %v2920_v26  ;;  %v2930_v17 = vadd.f32 0.5, %v2928_v13 }
 0xc55   :  { %4714 = vtanh.f32 %v2935_v55  ;;  %v2936_v54 = vadd.f32 %v2934_v51, %v2187_v56 }
 0xc57   :  { %4716 = vtanh.f32 %v2936_v54 }
 0xc5f   :  { %v4715_v32 = vpop.eup %4714 }
 0xc60   :  { %v2939_v62 = vsub.f32 %v6231_v9, %v4715_v32  ;;  %v2192_v9 = vadd.f32 %v6042_v24, %v6115_v47 }
 0xc61   :  { %v4717_v31 = vpop.eup %4716 }
 0xc62   :  { %v2941_v37 = vmul.f32 %v2939_v62, %v2929_v0  ;;  %v2940_v28 = vsub.f32 %v6233_v35, %v4717_v31  ;;  %v6351_v62 = vld [vmem:[%s6640_s6] ss:$12 sps:$4 sm:$0xff]  }
 0xc64   :  { %v6284_v11 = vadd.f32 %v4715_v32, %v2941_v37  ;;  %v2942_v12 = vmul.f32 %v2940_v28, %v2930_v17  ;;  %v6363_v37 = vld [vmem:[%s6640_s6 + $0x1c] ss:$12 sps:$4 sm:$0xff]   ;;  %v6373_v17 = vld [vmem:[%s6640_s6 + $0x18] ss:$12 sps:$4 sm:$0xff]   ;;  %v6379_v28 = vld [vmem:[%s6640_s6 + $0x20] ss:$12 sps:$4 sm:$0xff]  }
 0xc66   :  { %v6286_v20 = vadd.f32 %v4717_v31, %v2942_v12  ;;  %v6357_v31 = vld [vmem:[%s6640_s6 + $0x8] ss:$12 sps:$4 sm:$0xff]   ;;  %v6392_v12 = vld [vmem:[%s6640_s6 + $0x30] ss:$12 sps:$4 sm:$0xff]  }
 0xc68   :  { %v2953_v1 = vpack.c.bf16 %v6286_v20, %v6284_v11 }
 0xc6a   :  { %2987 = vmatmul.mubr.bf16.vlgmr.msra.gmra.mrb[64].mxu1 %v2953_v1  ;;  %4216 = vmatmul.mubr.bf16.vlgmr.msra.gmra.mrb[64].mxu0 %v2953_v1  ;;  %v6404_v1 = vld [vmem:[%s6640_s6 + $0x4c] ss:$12 sps:$4 sm:$0xff]  }
 0xc6b   :  { %3082 = vmatpush1.bf16.msra.mxu1 %v5830_v38  ;;  %4220 = vmatpush3.bf16.msra.mxu0 %v5893_v29  ;;  %v6326_v38 = vld [vmem:[%s6640_s6 + $0x4] ss:$12 sps:$4 sm:$0xff]  }
 0xc6c   :  { %3083 = vmatprep.subr.bf16.mxu1 %v5836_v40  ;;  %4221 = vmatprep.subr.bf16.mxu0 %v6661_v58 }
 0xc6d   :  { %3113 = vmatprep.mubr.bf16.mxu1 %v6662_v59  ;;  %4235 = vmatprep.mubr.msk.bf16.mxu0 %vm4818_vm0, %v6661_v58 }
 0xc6f   :  { %3084 = vmatpush1.bf16.msra.mxu1 %v5846_v41  ;;  %4222 = vmatpush3.bf16.msra.mxu0 %v5927_v49 }
 0xc70   :  { %3085 = vmatprep.subr.bf16.mxu1 %v5869_v39  ;;  %4223 = vmatprep.subr.bf16.mxu0 %v6661_v58 }
 0xc73   :  { %3086 = vmatpush1.bf16.msra.mxu1 %v5874_v7  ;;  %4224 = vmatpush3.bf16.msra.mxu0 %v5941_v3 }
 0xc74   :  { %3087 = vmatprep.subr.bf16.mxu1 %v5881_v16  ;;  %4225 = vmatprep.subr.bf16.mxu0 %v6661_v58 }
 0xc77   :  { %3088 = vmatpush1.bf16.msra.mxu1 %v5886_v14  ;;  %4226 = vmatpush3.bf16.msra.mxu0 %v5960_v2 }
 0xc78   :  { %3089 = vmatprep.subr.bf16.mxu1 %v5898_v23  ;;  %4227 = vmatprep.subr.bf16.mxu0 %v6661_v58 }
 0xc7b   :  { %3090 = vmatpush1.bf16.msra.mxu1 %v5903_v42  ;;  %4228 = vmatpush3.bf16.msra.mxu0 %v5969_v36 }
 0xc7c   :  { %3091 = vmatprep.subr.bf16.mxu1 %v5912_v43  ;;  %4229 = vmatprep.subr.bf16.mxu0 %v6661_v58 }
 0xc7f   :  { %3092 = vmatpush1.bf16.msra.mxu1 %v5917_v45  ;;  %4230 = vmatpush3.bf16.msra.mxu0 %v5976_v63 }
 0xc80   :  { %3093 = vmatprep.subr.bf16.mxu1 %v5922_v46  ;;  %4231 = vmatprep.subr.bf16.mxu0 %v6661_v58 }
 0xc83   :  { %3094 = vmatpush1.bf16.msra.mxu1 %v5935_v50  ;;  %4232 = vmatpush3.bf16.msra.mxu0 %v5983_v48 }
 0xc84   :  { %3095 = vmatprep.subr.bf16.mxu1 %v5947_v33  ;;  %4233 = vmatprep.subr.bf16.mxu0 %v6661_v58 }
 0xc87   :  { %3096 = vmatpush1.bf16.msra.mxu1 %v5954_v4  ;;  %4234 = vmatpush3.bf16.msra.mxu0 %v5990_v25 }
 0xc88   :  { %3208 = vmatprep.subr.bf16.mxu1 %v6326_v38  ;;  %4239 = vmatprep.subr.bf16.mxu0 %v6661_v58 }
 0xd3d   :  { %v2988_v40 = vpop.f32.mrb[64].mxu1  ;;  %v3031_v41 = vpop.f32.mrb[64].mxu0 }
 0xd3e   :  { %v4347_v39 = vadd.f32 %v2988_v40, %v6098_v21  ;;  %v2990_v7 = vpop.f32.mrb[65].mxu1  ;;  %v4217_v16 = vpop.f32.mrb[65].mxu0  ;;  %v3058_v48 = vadd.f32 %v6111_v53, %v3031_v41  ;;  %v6411_v40 = vld [vmem:[%s6640_s6 + $0x48] ss:$12 sps:$4 sm:$0xff]   ;;  %v6417_v41 = vld [vmem:[%s6640_s6 + $0x50] ss:$12 sps:$4 sm:$0xff]  }
 0xd3f   :  { %v2992_v14 = vpop.f32.mrb[66].mxu1  ;;  %v3034_v29 = vpop.f32.mrb[66].mxu0  ;;  %v4348_v49 = vadd.f32 %v2990_v7, %v6104_v27  ;;  %v6430_v7 = vld [vmem:[%s6640_s6 + $0x60] ss:$12 sps:$4 sm:$0xff]   ;;  %v6436_v16 = vld [vmem:[%s6640_s6 + $0x68] ss:$12 sps:$4 sm:$0xff]  }
 0xd40   :  { %v3040_v23 = vmul.f32 0.5, %v4347_v39  ;;  %v4349_v42 = vadd.f32 %v2992_v14, %v6098_v21  ;;  %v2994_v43 = vpop.f32.mrb[67].mxu1  ;;  %v4218_v45 = vpop.f32.mrb[67].mxu0  ;;  %v3059_v44 = vadd.f32 %v6111_v53, %v3034_v29  ;;  %v6423_v39 = vld [vmem:[%s6640_s6 + $0x64] ss:$12 sps:$4 sm:$0xff]  }
 0xd41   :  { %v4350_v50 = vadd.f32 %v2994_v43, %v6104_v27  ;;  %v3050_v3 = vmul.f32 0.5, %v4348_v49  ;;  %v6442_v14 = vld [vmem:[%s6640_s6 + $0x7c] ss:$12 sps:$4 sm:$0xff]   ;;  %v6449_v29 = vld [vmem:[%s6640_s6 + $0x78] ss:$12 sps:$4 sm:$0xff]  }
 0xd42   :  { %4718 = vtanh.f32 %v3040_v23  ;;  %v3041_v46 = vmul.f32 0.5, %v4349_v42  ;;  %v6455_v23 = vld [vmem:[%s6640_s6 + $0x80] ss:$12 sps:$4 sm:$0xff]   ;;  %v6468_v43 = vld [vmem:[%s6640_s6 + $0x90] ss:$12 sps:$4 sm:$0xff]  }
 0xd43   :  { %v3051_v2 = vmul.f32 0.5, %v4350_v50  ;;  %v6461_v42 = vld [vmem:[%s6640_s6 + $0x94] ss:$12 sps:$4 sm:$0xff]   ;;  %v6474_v45 = vld [vmem:[%s6640_s6 + $0x98] ss:$12 sps:$4 sm:$0xff]  }
 0xd44   :  { %4720 = vtanh.f32 %v3041_v46  ;;  %v6480_v46 = vld [vmem:[%s6640_s6 + $0xac] ss:$12 sps:$4 sm:$0xff]   ;;  %v6487_v49 = vld [vmem:[%s6640_s6 + $0xa8] ss:$12 sps:$4 sm:$0xff]   ;;  %v6493_v50 = vld [vmem:[%s6640_s6 + $0xb0] ss:$12 sps:$4 sm:$0xff]  }
 0xd45   :  { %4722 = vtanh.f32 %v3050_v3 }
 0xd46   :  { %4724 = vtanh.f32 %v3051_v2 }
 0xd4c   :  { %v4719_v33 = vpop.eup %4718 }
 0xd4d   :  { %v3044_v4 = vmul.f32 0.5, %v4719_v33 }
 0xd4e   :  { %v4721_v36 = vpop.eup %4720 }
 0xd4f   :  { %v3046_v63 = vadd.f32 0.5, %v3044_v4  ;;  %v3045_v25 = vmul.f32 0.5, %v4721_v36  ;;  %v4723_v34 = vpop.eup %4722 }
 0xd50   :  { %v4725_v26 = vpop.eup %4724  ;;  %v3054_v10 = vmul.f32 0.5, %v4723_v34 }
 0xd51   :  { %v3060_v35 = vmul.f32 %v3058_v48, %v3046_v63  ;;  %v3047_v5 = vadd.f32 0.5, %v3045_v25  ;;  %v3055_v56 = vmul.f32 0.5, %v4725_v26 }
 0xd52   :  { %v3056_v51 = vadd.f32 0.5, %v3054_v10 }
 0xd53   :  { %v3062_v52 = vadd.f32 %v3060_v35, %v2192_v9  ;;  %v3061_v19 = vmul.f32 %v3059_v44, %v3047_v5  ;;  %v3057_v15 = vadd.f32 0.5, %v3055_v56 }
 0xd55   :  { %4726 = vtanh.f32 %v3062_v52  ;;  %v3063_v8 = vadd.f32 %v3061_v19, %v2195_v6 }
 0xd57   :  { %4728 = vtanh.f32 %v3063_v8 }
 0xd5f   :  { %v4727_v55 = vpop.eup %4726 }
 0xd60   :  { %v3066_v24 = vsub.f32 %v6284_v11, %v4727_v55  ;;  %v6385_v11 = vld [vmem:[%s6640_s6 + $0x34] ss:$12 sps:$4 sm:$0xff]  }
 0xd61   :  { %v4729_v54 = vpop.eup %4728 }
 0xd62   :  { %v3068_v57 = vmul.f32 %v3066_v24, %v3056_v51  ;;  %v3067_v30 = vsub.f32 %v6286_v20, %v4729_v54  ;;  %v6398_v20 = vld [vmem:[%s6640_s6 + $0x38] ss:$12 sps:$4 sm:$0xff]   ;;  %v2200_v51 = vadd.f32 %v6040_v18, %v6115_v47 }
 0xd64   :  { %v6342_v13 = vadd.f32 %v4727_v55, %v3068_v57  ;;  %v3069_v60 = vmul.f32 %v3067_v30, %v3057_v15  ;;  %v2203_v15 = vadd.f32 %v6046_v61, %v6115_v47 }
 0xd66   :  { %v6344_v32 = vadd.f32 %v4729_v54, %v3069_v60 }
 0xd68   :  { %v3080_v0 = vpack.c.bf16 %v6344_v32, %v6342_v13 }
 0xd6a   :  { %3114 = vmatmul.mubr.bf16.vlgmr.msra.gmra.mrb[68].mxu1 %v3080_v0  ;;  %4236 = vmatmul.mubr.bf16.vlgmr.msra.gmra.mrb[68].mxu0 %v3080_v0 }
 0xd6b   :  { %3209 = vmatpush1.bf16.msra.mxu1 %v6351_v62  ;;  %4240 = vmatpush3.bf16.msra.mxu0 %v6357_v31 }
 0xd6c   :  { %3210 = vmatprep.subr.bf16.mxu1 %v6363_v37  ;;  %4241 = vmatprep.subr.bf16.mxu0 %v6661_v58 }
 0xd6d   :  { %3240 = vmatprep.mubr.bf16.mxu1 %v6662_v59  ;;  %4255 = vmatprep.mubr.msk.bf16.mxu0 %vm4818_vm0, %v6661_v58 }
 0xd6f   :  { %3211 = vmatpush1.bf16.msra.mxu1 %v6373_v17  ;;  %4242 = vmatpush3.bf16.msra.mxu0 %v6379_v28 }
 0xd70   :  { %3212 = vmatprep.subr.bf16.mxu1 %v6385_v11  ;;  %4243 = vmatprep.subr.bf16.mxu0 %v6661_v58 }
 0xd73   :  { %3213 = vmatpush1.bf16.msra.mxu1 %v6392_v12  ;;  %4244 = vmatpush3.bf16.msra.mxu0 %v6398_v20 }
 0xd74   :  { %3214 = vmatprep.subr.bf16.mxu1 %v6404_v1  ;;  %4245 = vmatprep.subr.bf16.mxu0 %v6661_v58 }
 0xd77   :  { %3215 = vmatpush1.bf16.msra.mxu1 %v6411_v40  ;;  %4246 = vmatpush3.bf16.msra.mxu0 %v6417_v41 }
 0xd78   :  { %3216 = vmatprep.subr.bf16.mxu1 %v6423_v39  ;;  %4247 = vmatprep.subr.bf16.mxu0 %v6661_v58 }
 0xd7b   :  { %3217 = vmatpush1.bf16.msra.mxu1 %v6430_v7  ;;  %4248 = vmatpush3.bf16.msra.mxu0 %v6436_v16 }
 0xd7c   :  { %3218 = vmatprep.subr.bf16.mxu1 %v6442_v14  ;;  %4249 = vmatprep.subr.bf16.mxu0 %v6661_v58 }
 0xd7f   :  { %3219 = vmatpush1.bf16.msra.mxu1 %v6449_v29  ;;  %4250 = vmatpush3.bf16.msra.mxu0 %v6455_v23 }
 0xd80   :  { %3220 = vmatprep.subr.bf16.mxu1 %v6461_v42  ;;  %4251 = vmatprep.subr.bf16.mxu0 %v6661_v58 }
 0xd83   :  { %3221 = vmatpush1.bf16.msra.mxu1 %v6468_v43  ;;  %4252 = vmatpush3.bf16.msra.mxu0 %v6474_v45 }
 0xd84   :  { %3222 = vmatprep.subr.bf16.mxu1 %v6480_v46  ;;  %4253 = vmatprep.subr.bf16.mxu0 %v6661_v58 }
 0xd87   :  { %3223 = vmatpush1.bf16.msra.mxu1 %v6487_v49  ;;  %4254 = vmatpush3.bf16.msra.mxu0 %v6493_v50 }
 0xd88   :  { %3335 = vmatprep.subr.bf16.mxu1 %v6326_v38  ;;  %4259 = vmatprep.subr.bf16.mxu0 %v6661_v58 }
 0xe3d   :  { %v3115_v3 = vpop.f32.mrb[68].mxu1  ;;  %v3158_v33 = vpop.f32.mrb[68].mxu0 }
 0xe3e   :  { %v4351_v4 = vadd.f32 %v3115_v3, %v6098_v21  ;;  %v3117_v2 = vpop.f32.mrb[69].mxu1  ;;  %v4237_v36 = vpop.f32.mrb[69].mxu0  ;;  %v3185_v56 = vadd.f32 %v6111_v53, %v3158_v33 }
 0xe3f   :  { %v3119_v63 = vpop.f32.mrb[70].mxu1  ;;  %v3161_v48 = vpop.f32.mrb[70].mxu0  ;;  %v4352_v38 = vadd.f32 %v3117_v2, %v6104_v27 }
 0xe40   :  { %v3167_v25 = vmul.f32 0.5, %v4351_v4  ;;  %v4353_v9 = vadd.f32 %v3119_v63, %v6098_v21  ;;  %v3121_v35 = vpop.f32.mrb[71].mxu1  ;;  %v4238_v5 = vpop.f32.mrb[71].mxu0  ;;  %v3186_v57 = vadd.f32 %v6111_v53, %v3161_v48 }
 0xe41   :  { %v4354_v6 = vadd.f32 %v3121_v35, %v6104_v27  ;;  %v3177_v52 = vmul.f32 0.5, %v4352_v38 }
 0xe42   :  { %4730 = vtanh.f32 %v3167_v25  ;;  %v3168_v44 = vmul.f32 0.5, %v4353_v9 }
 0xe43   :  { %v3178_v34 = vmul.f32 0.5, %v4354_v6  ;;  %v6672_v6 = vld [vmem:[#allocation7_spill] sm:$0xff] }
 0xe44   :  { %4732 = vtanh.f32 %v3168_v44 }
 0xe45   :  { %4734 = vtanh.f32 %v3177_v52  ;;  %v2211_v52 = vadd.f32 %v6672_v6, %v6115_v47 }
 0xe46   :  { %4736 = vtanh.f32 %v3178_v34 }
 0xe4c   :  { %v4731_v19 = vpop.eup %4730 }
 0xe4d   :  { %v3171_v8 = vmul.f32 0.5, %v4731_v19 }
 0xe4e   :  { %v4733_v26 = vpop.eup %4732 }
 0xe4f   :  { %v3173_v10 = vadd.f32 0.5, %v3171_v8  ;;  %v3172_v55 = vmul.f32 0.5, %v4733_v26  ;;  %v4735_v3 = vpop.eup %4734 }
 0xe50   :  { %v4737_v33 = vpop.eup %4736  ;;  %v3181_v4 = vmul.f32 0.5, %v4735_v3 }
 0xe51   :  { %v3187_v24 = vmul.f32 %v3185_v56, %v3173_v10  ;;  %v3174_v54 = vadd.f32 0.5, %v3172_v55  ;;  %v3182_v2 = vmul.f32 0.5, %v4737_v33 }
 0xe52   :  { %v3183_v63 = vadd.f32 0.5, %v3181_v4  ;;  %v4566_v4 = vld [vmem:[%s6645_s11] sm:$0xff]  }
 0xe53   :  { %v3189_v30 = vadd.f32 %v3187_v24, %v2200_v51  ;;  %v3188_v60 = vmul.f32 %v3186_v57, %v3174_v54  ;;  %v3184_v53 = vadd.f32 0.5, %v3182_v2  ;;  %v4567_v2 = vld [vmem:[%s6645_s11 + $0x8] sm:$0xff]  }
 0xe55   :  { %4738 = vtanh.f32 %v3189_v30  ;;  %v3190_v0 = vadd.f32 %v3188_v60, %v2203_v15 }
 0xe57   :  { %4740 = vtanh.f32 %v3190_v0 }
 0xe5f   :  { %v4739_v36 = vpop.eup %4738 }
 0xe60   :  { %v3193_v18 = vsub.f32 %v6342_v13, %v4739_v36 }
 0xe61   :  { %v4741_v25 = vpop.eup %4740 }
 0xe62   :  { %v3195_v9 = vmul.f32 %v3193_v18, %v3183_v63  ;;  %v3194_v48 = vsub.f32 %v6344_v32, %v4741_v25  ;;  %v4569_v63 = vld [vmem:[%s6645_s11 + $0x18] sm:$0xff]   ;;  %v4570_v18 = vld [vmem:[%s6645_s11 + $0x20] sm:$0xff]  }
 0xe64   :  { %v6510_v35 = vadd.f32 %v4739_v36, %v3195_v9  ;;  %v3196_v61 = vmul.f32 %v3194_v48, %v3184_v53  ;;  %v4568_v36 = vld [vmem:[%s6645_s11 + $0x10] sm:$0xff]   ;;  %v4573_v53 = vld [vmem:[%s6645_s11 + $0x38] sm:$0xff]  }
 0xe65   :  { %v4572_v9 = vld [vmem:[%s6645_s11 + $0x30] sm:$0xff]  }
 0xe66   :  { %v6512_v5 = vadd.f32 %v4741_v25, %v3196_v61  ;;  %v4571_v25 = vld [vmem:[%s6645_s11 + $0x28] sm:$0xff]  }
 0xe68   :  { %v3207_v44 = vpack.c.bf16 %v6512_v5, %v6510_v35 }
 0xe6a   :  { %3241 = vmatmul.mubr.bf16.vlgmr.msra.gmra.mrb[72].mxu1 %v3207_v44  ;;  %4256 = vmatmul.mubr.bf16.vlgmr.msra.gmra.mrb[72].mxu0 %v3207_v44 }
 0xe6b   :  { %3336 = vmatpush1.bf16.msra.mxu1 %v6351_v62  ;;  %4260 = vmatpush3.bf16.msra.mxu0 %v6357_v31 }
 0xe6c   :  { %3337 = vmatprep.subr.bf16.mxu1 %v6363_v37  ;;  %4261 = vmatprep.subr.bf16.mxu0 %v6661_v58 }
 0xe6d   :  { %3367 = vmatprep.mubr.bf16.mxu1 %v6662_v59  ;;  %4275 = vmatprep.mubr.msk.bf16.mxu0 %vm4818_vm0, %v6661_v58 }
 0xe6f   :  { %3338 = vmatpush1.bf16.msra.mxu1 %v6373_v17  ;;  %4262 = vmatpush3.bf16.msra.mxu0 %v6379_v28 }
 0xe70   :  { %3339 = vmatprep.subr.bf16.mxu1 %v6385_v11  ;;  %4263 = vmatprep.subr.bf16.mxu0 %v6661_v58 }
 0xe73   :  { %3340 = vmatpush1.bf16.msra.mxu1 %v6392_v12  ;;  %4264 = vmatpush3.bf16.msra.mxu0 %v6398_v20 }
 0xe74   :  { %3341 = vmatprep.subr.bf16.mxu1 %v6404_v1  ;;  %4265 = vmatprep.subr.bf16.mxu0 %v6661_v58 }
 0xe77   :  { %3342 = vmatpush1.bf16.msra.mxu1 %v6411_v40  ;;  %4266 = vmatpush3.bf16.msra.mxu0 %v6417_v41 }
 0xe78   :  { %3343 = vmatprep.subr.bf16.mxu1 %v6423_v39  ;;  %4267 = vmatprep.subr.bf16.mxu0 %v6661_v58 }
 0xe7b   :  { %3344 = vmatpush1.bf16.msra.mxu1 %v6430_v7  ;;  %4268 = vmatpush3.bf16.msra.mxu0 %v6436_v16 }
 0xe7c   :  { %3345 = vmatprep.subr.bf16.mxu1 %v6442_v14  ;;  %4269 = vmatprep.subr.bf16.mxu0 %v6661_v58 }
 0xe7f   :  { %3346 = vmatpush1.bf16.msra.mxu1 %v6449_v29  ;;  %4270 = vmatpush3.bf16.msra.mxu0 %v6455_v23 }
 0xe80   :  { %3347 = vmatprep.subr.bf16.mxu1 %v6461_v42  ;;  %4271 = vmatprep.subr.bf16.mxu0 %v6661_v58  ;;  %v6557_v42 = vld [vmem:[%s6644_s10] ss:$0 sm:$0xff] }
 0xe83   :  { %3348 = vmatpush1.bf16.msra.mxu1 %v6468_v43  ;;  %4272 = vmatpush3.bf16.msra.mxu0 %v6474_v45 }
 0xe84   :  { %3349 = vmatprep.subr.bf16.mxu1 %v6480_v46  ;;  %4273 = vmatprep.subr.bf16.mxu0 %v6661_v58  ;;  %v2208_v46 = vadd.f32 %v6087_v22, %v6115_v47 }
 0xe87   :  { %3350 = vmatpush1.bf16.msra.mxu1 %v6487_v49  ;;  %4274 = vmatpush3.bf16.msra.mxu0 %v6493_v50 }
 0xe88   :  { %4279 = vmatprep.subr.bf16.mxu0 %v6661_v58 }
 0xf3d   :  { %v3242_v59 = vpop.f32.mrb[72].mxu1  ;;  %v3285_v13 = vpop.f32.mrb[72].mxu0 }
 0xf3e   :  { %v4355_v32 = vadd.f32 %v3242_v59, %v6098_v21  ;;  %v3244_v62 = vpop.f32.mrb[73].mxu1  ;;  %v4257_v31 = vpop.f32.mrb[73].mxu0  ;;  %v3312_v43 = vadd.f32 %v6557_v42, %v3285_v13 }
 0xf3f   :  { %v3246_v37 = vpop.f32.mrb[74].mxu1  ;;  %v3288_v17 = vpop.f32.mrb[74].mxu0  ;;  %v4356_v40 = vadd.f32 %v3244_v62, %v6104_v27 }
 0xf40   :  { %v3294_v28 = vmul.f32 0.5, %v4355_v32  ;;  %v4357_v11 = vadd.f32 %v3246_v37, %v6098_v21  ;;  %v3248_v12 = vpop.f32.mrb[75].mxu1  ;;  %v4258_v20 = vpop.f32.mrb[75].mxu0  ;;  %v3313_v38 = vadd.f32 %v6557_v42, %v3288_v17 }
 0xf41   :  { %v4358_v41 = vadd.f32 %v3248_v12, %v6104_v27  ;;  %v3304_v39 = vmul.f32 0.5, %v4356_v40 }
 0xf42   :  { %4742 = vtanh.f32 %v3294_v28  ;;  %v3295_v1 = vmul.f32 0.5, %v4357_v11 }
 0xf43   :  { %v3305_v14 = vmul.f32 0.5, %v4358_v41 }
 0xf44   :  { %4744 = vtanh.f32 %v3295_v1 }
 0xf45   :  { %4746 = vtanh.f32 %v3304_v39 }
 0xf46   :  { %4748 = vtanh.f32 %v3305_v14 }
 0xf4c   :  { %v4743_v7 = vpop.eup %4742 }
 0xf4d   :  { %v3298_v16 = vmul.f32 0.5, %v4743_v7 }
 0xf4e   :  { %v4745_v29 = vpop.eup %4744 }
 0xf4f   :  { %v3300_v23 = vadd.f32 0.5, %v3298_v16  ;;  %v3299_v45 = vmul.f32 0.5, %v4745_v29  ;;  %v4747_v26 = vpop.eup %4746 }
 0xf50   :  { %v4749_v10 = vpop.eup %4748  ;;  %v3308_v56 = vmul.f32 0.5, %v4747_v26 }
 0xf51   :  { %v3314_v49 = vmul.f32 %v3312_v43, %v3300_v23  ;;  %v3301_v50 = vadd.f32 0.5, %v3299_v45  ;;  %v3309_v55 = vmul.f32 0.5, %v4749_v10 }
 0xf52   :  { %v3310_v24 = vadd.f32 0.5, %v3308_v56 }
 0xf53   :  { %v3316_v19 = vadd.f32 %v3314_v49, %v2208_v46  ;;  %v3315_v8 = vmul.f32 %v3313_v38, %v3301_v50  ;;  %v3311_v15 = vadd.f32 0.5, %v3309_v55 }
 0xf55   :  { %4750 = vtanh.f32 %v3316_v19  ;;  %v3317_v34 = vadd.f32 %v3315_v8, %v2211_v52 }
 0xf57   :  { %4752 = vtanh.f32 %v3317_v34 }
 0xf5f   :  { %v4751_v51 = vpop.eup %4750 }
 0xf60   :  { %v3320_v22 = vsub.f32 %v6510_v35, %v4751_v51 }
 0xf61   :  { %v4753_v54 = vpop.eup %4752 }
 0xf62   :  { %v3322_v57 = vmul.f32 %v3320_v22, %v3310_v24  ;;  %v3321_v30 = vsub.f32 %v6512_v5, %v4753_v54 }
 0xf64   :  { %v6567_v60 = vadd.f32 %v4751_v51, %v3322_v57  ;;  %v3323_v0 = vmul.f32 %v3321_v30, %v3311_v15  ;;  %v3701_v57 = vld [vmem:[%s6647_s12] ss:$0 sm:$0xff] }
 0xf66   :  { %v6569_v3 = vadd.f32 %v4753_v54, %v3323_v0 }
 0xf68   :  { %v3334_v33 = vpack.c.bf16 %v6569_v3, %v6567_v60 }
 0xf6a   :  { %3368 = vmatmul.mubr.bf16.vlgmr.msra.gmra.mrb[76].mxu1 %v3334_v33  ;;  %4276 = vmatmul.mubr.bf16.vlgmr.msra.gmra.mrb[76].mxu0 %v3334_v33 }
 0xf6b   :  { %4295 = vmatprep.mubr.msk.bf16.mxu0 %vm4818_vm0, %v6661_v58  ;;  %4280 = vmatpush3.bf16.msra.mxu0 %v4566_v4 }
 0xf6c   :  { %4281 = vmatprep.subr.bf16.mxu0 %v6661_v58 }
 0xf6f   :  { %4282 = vmatpush3.bf16.msra.mxu0 %v4567_v2 }
 0xf70   :  { %4283 = vmatprep.subr.bf16.mxu0 %v6661_v58 }
 0xf73   :  { %4284 = vmatpush3.bf16.msra.mxu0 %v4568_v36 }
 0xf74   :  { %4285 = vmatprep.subr.bf16.mxu0 %v6661_v58 }
 0xf77   :  { %4286 = vmatpush3.bf16.msra.mxu0 %v4569_v63 }
 0xf78   :  { %4287 = vmatprep.subr.bf16.mxu0 %v6661_v58 }
 0xf7b   :  { %4288 = vmatpush3.bf16.msra.mxu0 %v4570_v18 }
 0xf7c   :  { %4289 = vmatprep.subr.bf16.mxu0 %v6661_v58 }
 0xf7f   :  { %4290 = vmatpush3.bf16.msra.mxu0 %v4571_v25 }
 0xf80   :  { %4291 = vmatprep.subr.bf16.mxu0 %v6661_v58 }
 0xf83   :  { %4292 = vmatpush3.bf16.msra.mxu0 %v4572_v9 }
 0xf84   :  { %4293 = vmatprep.subr.bf16.mxu0 %v6661_v58 }
 0xf87   :  { %4294 = vmatpush3.bf16.msra.mxu0 %v4573_v53 }
0x103d   :  { %v3369_v48 = vpop.f32.mrb[76].mxu1  ;;  %v3412_v35 = vpop.f32.mrb[76].mxu0 }
0x103e   :  { %v4359_v61 = vadd.f32 %v3369_v48, %v6098_v21  ;;  %v3371_v5 = vpop.f32.mrb[77].mxu1  ;;  %v4277_v44 = vpop.f32.mrb[77].mxu0  ;;  %v3439_v39 = vadd.f32 %v6557_v42, %v3412_v35 }
0x103f   :  { %v3373_v59 = vpop.f32.mrb[78].mxu1  ;;  %v3415_v13 = vpop.f32.mrb[78].mxu0  ;;  %v4360_v17 = vadd.f32 %v3371_v5, %v6104_v27 }
0x1040   :  { %v3421_v32 = vmul.f32 0.5, %v4359_v61  ;;  %v4361_v62 = vadd.f32 %v3373_v59, %v6098_v21  ;;  %v3375_v31 = vpop.f32.mrb[79].mxu1  ;;  %v4278_v37 = vpop.f32.mrb[79].mxu0  ;;  %v6673_v21 = vld [vmem:[#allocation5_spill] sm:$0xff]  ;;  %v3440_v23 = vadd.f32 %v6557_v42, %v3415_v13 }
0x1041   :  { %v4362_v28 = vadd.f32 %v3375_v31, %v6104_v27  ;;  %v3431_v11 = vmul.f32 0.5, %v4360_v17  ;;  %v2216_v16 = vadd.f32 %v6673_v21, %v6115_v47  ;;  %v6674_v27 = vld [vmem:[#allocation6_spill] sm:$0xff] }
0x1042   :  { %4754 = vtanh.f32 %v3421_v32  ;;  %v3422_v58 = vmul.f32 0.5, %v4361_v62  ;;  %v2219_v43 = vadd.f32 %v6674_v27, %v6115_v47 }
0x1043   :  { %v3432_v1 = vmul.f32 0.5, %v4362_v28 }
0x1044   :  { %4756 = vtanh.f32 %v3422_v58 }
0x1045   :  { %4758 = vtanh.f32 %v3431_v11 }
0x1046   :  { %4760 = vtanh.f32 %v3432_v1 }
0x104c   :  { %v4755_v12 = vpop.eup %4754 }
0x104d   :  { %v3425_v20 = vmul.f32 0.5, %v4755_v12 }
0x104e   :  { %v4757_v40 = vpop.eup %4756 }
0x104f   :  { %v3427_v41 = vadd.f32 0.5, %v3425_v20  ;;  %v3426_v7 = vmul.f32 0.5, %v4757_v40  ;;  %v4759_v50 = vpop.eup %4758 }
0x1050   :  { %v4761_v38 = vpop.eup %4760  ;;  %v3435_v6 = vmul.f32 0.5, %v4759_v50 }
0x1051   :  { %v3441_v14 = vmul.f32 %v3439_v39, %v3427_v41  ;;  %v3428_v29 = vadd.f32 0.5, %v3426_v7  ;;  %v3436_v52 = vmul.f32 0.5, %v4761_v38 }
0x1052   :  { %v3437_v8 = vadd.f32 0.5, %v3435_v6 }
0x1053   :  { %v3443_v45 = vadd.f32 %v3441_v14, %v2216_v16  ;;  %v3442_v46 = vmul.f32 %v3440_v23, %v3428_v29  ;;  %v3438_v42 = vadd.f32 0.5, %v3436_v52 }
0x1055   :  { %4762 = vtanh.f32 %v3443_v45  ;;  %v3444_v49 = vadd.f32 %v3442_v46, %v2219_v43 }
0x1057   :  { %4764 = vtanh.f32 %v3444_v49 }
0x105f   :  { %v4763_v19 = vpop.eup %4762 }
0x1060   :  { %v3447_v34 = vsub.f32 %v6567_v60, %v4763_v19 }
0x1061   :  { %v4765_v26 = vpop.eup %4764 }
0x1062   :  { %v3449_v10 = vmul.f32 %v3447_v34, %v3437_v8  ;;  %v3448_v56 = vsub.f32 %v6569_v3, %v4765_v26 }
0x1064   :  { %v3451_v55 = vadd.f32 %v4763_v19, %v3449_v10  ;;  %v3450_v47 = vmul.f32 %v3448_v56, %v3438_v42 }
0x1066   :  { %3455 = vst [vmem:[%s6646_s14] sm:$0xff] %v3451_v55  ;;  %v3452_v51 = vadd.f32 %v4765_v26, %v3450_v47  ;;  %v3459_v24 = vmax.f32 %v3451_v55, 0.0 }
0x1068   :  { %3456 = vst [vmem:[%s6646_s14 + $0x8] sm:$0xff] %v3452_v51  ;;  %v3460_v22 = vmax.f32 %v3452_v51, 0.0 }
0x106a   :  { %v3461_v54 = vpack.c.bf16 %v3460_v22, %v3459_v24 }
0x106c   :  { %4296 = vmatmul.mubr.bf16.vlgmr.msra.gmra.mrb[80].mxu0 %v3461_v54 }
0x113f   :  { %v3567_v15 = vpop.f32.mrb[80].mxu0 }
0x1140   :  { %v3568_v30 = vadd.f32 %v3701_v57, %v3567_v15  ;;  %v4297_v60 = vpop.f32.mrb[81].mxu0 }
0x1141   :  { %v3570_v0 = vpop.f32.mrb[82].mxu0 }
0x1142   :  { %3574 = vst [vmem:[%s6648_s15] sm:$0xff] %v3568_v30  ;;  %v3571_v3 = vadd.f32 %v3701_v57, %v3570_v0  ;;  %v4298_v33 = vpop.f32.mrb[83].mxu0 }
0x1144   :  { %3575 = vst [vmem:[%s6648_s15 + $0x8] sm:$0xff] %v3571_v3 }

</bundles_post_ra>
